<compile_context>
chip_gen: v7x
topology: tpu7x:2x2x1
jax: 0.10.0
libtpu: 0.0.40
codegen_flags: <defaults>
</compile_context>

<pallas_src>
import jax
import jax.numpy as jnp
import numpy as np
from jax.experimental import pallas as pl
from jax.experimental.pallas import tpu as pltpu

# Static network geometry: 160x160 -> conv1(s4) 40x40 -> pool 20x20
#                          -> conv2(s1) 20x20 -> pool 10x10, 32 ch -> 3200
H_IN = W_IN = 160
C1_OUT = 16
C2_OUT = 32
OH1 = OW1 = 40          # conv1 output grid
PH1 = PW1 = 20          # after pool1 (conv2 input grid)
PH2 = PW2 = 10          # after pool2
N_POS1 = PH1 * PW1      # 400
N_POS2 = PH2 * PW2      # 100
FLAT = N_POS2 * C2_OUT  # 3200
HID = 50
N_CLASS = 12
_PAD = 24               # zero padding (lanes) covering all 3x3 tap shifts


# ----------------------------- Pallas kernels ------------------------------

def fused_conv_kernel(p_ref, w1_ref, b1_ref, w2_ref, b2_ref,
                      mask_l_ref, mask_r_ref, sel_ref, out_ref):
    """Per-sample conv1+ReLU+pool1 -> conv2+ReLU+pool2 (channel-major layout)."""
    p = p_ref[0]                       # (4, 9, 400): [pool-member, tap, position]
    w1 = w1_ref[...]                   # (16, 9)

    # ---- conv1 at the 4 members of each 2x2 window + running max == pool1 ----
    y = jnp.dot(w1, p[0], preferred_element_type=jnp.float32)          # (16, 400)
    for g in range(1, 4):
        y = jnp.maximum(y, jnp.dot(w1, p[g],
                                   preferred_element_type=jnp.float32))
    a1 = jnp.maximum(y + b1_ref[...], 0.0)                              # (16, 400)

    # ---- conv2: in-VMEM im2col via 9 lane-shifted slices + MXU accumulation ----
    zpad = jnp.zeros((C1_OUT, _PAD), jnp.float32)
    ap = jnp.concatenate([zpad, a1, zpad], axis=1)                      # (16, 448)
    mask_l = mask_l_ref[...]                                            # (1,400): pw >= 1
    mask_r = mask_r_ref[...]                                            # (1,400): pw <= 18
    acc = jnp.zeros((C2_OUT, N_POS1), jnp.float32)
    for t in range(9):
        dh, dw = t // 3 - 1, t % 3 - 1
        shift = dh * PW1 + dw
        tap = ap[:, _PAD + shift:_PAD + shift + N_POS1]                 # (16, 400)
        if dw == -1:
            tap = tap * mask_l
        elif dw == 1:
            tap = tap * mask_r
        acc = acc + jnp.dot(w2_ref[t], tap,
                            preferred_element_type=jnp.float32)
    y2 = jnp.maximum(acc + b2_ref[...], 0.0)                            # (32, 400)

    # ---- pool2: max of 4 lane-shifted slices, then 0/1 lane-compaction matmul ----
    y2p = jnp.concatenate(
        [y2, jnp.zeros((C2_OUT, _PAD), jnp.float32)], axis=1)           # (32, 424)
    m = jnp.maximum(jnp.maximum(y2p[:, 0:N_POS1], y2p[:, 1:N_POS1 + 1]),
                    jnp.maximum(y2p[:, PW1:N_POS1 + PW1],
                                y2p[:, PW1 + 1:N_POS1 + PW1 + 1]))      # (32, 400)
    out_ref[0] = jnp.dot(m, sel_ref[...],
                         preferred_element_type=jnp.float32)            # (32, 100)


def mlp_head_kernel(x_ref, w1_ref, b1_ref, w2_ref, b2_ref, o_ref):
    """o = log_softmax(relu(x @ w1 + b1) @ w2 + b2, axis=-1)."""
    h = jnp.dot(x_ref[...], w1_ref[...], preferred_element_type=jnp.float32)
    h = jnp.maximum(h + b1_ref[...], 0.0)
    z = jnp.dot(h, w2_ref[...], preferred_element_type=jnp.float32) + b2_ref[...]
    mx = jnp.max(z, axis=-1, keepdims=True)
    zs = z - mx
    lse = jnp.log(jnp.sum(jnp.exp(zs), axis=-1, keepdims=True))
    o_ref[...] = (zs - lse).astype(o_ref.dtype)


# ----------------------------- pallas_call wrappers -------------------------

def _const_spec(shape):
    n = len(shape)
    return pl.BlockSpec(shape, lambda i: (0,) * n)


def fused_conv(p, w1, b1, w2, b2, mask_l, mask_r, sel):
    N = p.shape[0]
    return pl.pallas_call(
        fused_conv_kernel,
        out_shape=jax.ShapeDtypeStruct((N, C2_OUT, N_POS2), jnp.float32),
        grid=(N,),
        in_specs=[
            pl.BlockSpec((1, 4, 9, N_POS1), lambda i: (i, 0, 0, 0)),  # per-sample patches
            _const_spec(w1.shape), _const_spec(b1.shape),             # weights stay resident
            _const_spec(w2.shape), _const_spec(b2.shape),
            _const_spec(mask_l.shape), _const_spec(mask_r.shape),
            _const_spec(sel.shape),
        ],
        out_specs=pl.BlockSpec((1, C2_OUT, N_POS2), lambda i: (i, 0, 0)),
        compiler_params=pltpu.CompilerParams(
            dimension_semantics=("parallel",)),
    )(p, w1, b1, w2, b2, mask_l, mask_r, sel)


def mlp_head(x, w1, b1, w2, b2):
    N = x.shape[0]
    O = w2.shape[1]
    return pl.pallas_call(
        mlp_head_kernel,
        out_shape=jax.ShapeDtypeStruct((N, O), jnp.float32),
        grid=(1,),
        in_specs=[_const_spec(x.shape), _const_spec(w1.shape), _const_spec(b1.shape),
                  _const_spec(w2.shape), _const_spec(b2.shape)],
        out_specs=_const_spec((N, O)),
    )(x, w1, b1, w2, b2)


# ----------------------------- host-side glue --------------------------------

def build_conv1_patches(x_nchw):
    """Stride-4 3x3 'same' patches for conv1, channel-major friendly layout.

    Returns (N, 4, 9, 400): [sample, pool-member g = r*2+s, tap kh*3+kw,
    pooled position ph*20+pw] with conv1 output position (2*ph+r, 2*pw+s).
    """
    x = x_nchw[:, 0, :, :]                                      # Cin = 1
    N = x.shape[0]
    xp = jnp.pad(x, ((0, 0), (1, 1), (1, 1)))
    taps = []
    for kh in range(3):
        for kw in range(3):
            taps.append(xp[:, kh:kh + 4 * (OH1 - 1) + 1:4,
                            kw:kw + 4 * (OW1 - 1) + 1:4])       # (N, 40, 40)
    t = jnp.stack(taps, axis=-1)                                # (N, 40, 40, 9)
    t = t.reshape(N, PH1, 2, PW1, 2, 9)                         # [n, ph, r, pw, s, tap]
    t = t.transpose(0, 2, 4, 5, 1, 3)                           # [n, r, s, tap, ph, pw]
    return t.reshape(N, 4, 9, N_POS1)


def init_params(key):
    """Deterministic synthetic params; shapes match the (fixed) PyTorch module."""
    ks = jax.random.split(key, 8)

    def uni(k, shape, fan_in):
        bound = 1.0 / np.sqrt(fan_in)
        return jax.random.uniform(k, shape, jnp.float32, -bound, bound)

    # conv1: 3x3 stride 4 pad 1, 1 -> 16; columns ordered (kh, kw)
    w1 = uni(ks[0], (C1_OUT, 9), 9)
    b1 = uni(ks[1], (C1_OUT, 1), 9)
    # conv2: 3x3 stride 1 pad 1, 16 -> 32; (tap, cout, cin), tap = kh*3 + kw
    w2 = uni(ks[2], (9, C2_OUT, C1_OUT), 9 * C1_OUT)
    b2 = uni(ks[3], (C2_OUT, 1), 9 * C1_OUT)
    # fc1 / fc2: rows in PyTorch NCHW-flatten order (c, qh, qw) — which is
    # exactly the kernel's output order, so no permutation is needed.
    wf1 = uni(ks[4], (FLAT, HID), FLAT)
    bf1 = uni(ks[5], (1, HID), FLAT)
    wf2 = uni(ks[6], (HID, N_CLASS), HID)
    bf2 = uni(ks[7], (1, N_CLASS), HID)

    # Constant helpers for the fused kernel (loaded into VMEM once).
    pw = np.arange(N_POS1) % PW1
    mask_l = (pw >= 1).astype(np.float32)[None, :]              # (1, 400)
    mask_r = (pw <= PW1 - 2).astype(np.float32)[None, :]        # (1, 400)
    q = np.arange(N_POS2)
    sel = np.zeros((N_POS1, N_POS2), np.float32)
    sel[2 * PW1 * (q // PW2) + 2 * (q % PW2), q] = 1.0          # top-left of each window
    return dict(w1=w1, b1=b1, w2=w2, b2=b2, wf1=wf1, bf1=bf1, wf2=wf2, bf2=bf2,
                mask_l=jnp.asarray(mask_l), mask_r=jnp.asarray(mask_r),
                pool_sel=jnp.asarray(sel))


@jax.jit
def cnn160_forward(x_nchw, params):
    N = x_nchw.shape[0]
    p = build_conv1_patches(x_nchw.astype(jnp.float32))         # (N, 4, 9, 400)
    feats = fused_conv(p, params["w1"], params["b1"],
                       params["w2"], params["b2"],
                       params["mask_l"], params["mask_r"],
                       params["pool_sel"])                      # (N, 32, 100)
    flat = feats.reshape(N, FLAT)      # free: already PyTorch's (c, qh, qw) order
    return mlp_head(flat, params["wf1"], params["bf1"],
                    params["wf2"], params["bf2"])               # (N, 12)


if __name__ == "__main__":
    key = jax.random.PRNGKey(0)
    kx, kp = jax.random.split(key)

    # The architecture implies a 160x160 single-channel input (fc1 in = 3200).
    N = 2
    x = jax.random.normal(kx, (N, 1, H_IN, W_IN), jnp.float32)
    params = init_params(kp)

    out = cnn160_forward(x, params)
    out = jax.block_until_ready(out)

    assert out.shape == (N, N_CLASS), out.shape
    assert bool(jnp.all(jnp.isfinite(out)))
    # log_softmax rows must sum to ~1 in probability space
    probs = jnp.exp(out).sum(axis=1)
    assert np.allclose(np.asarray(probs), 1.0, atol=1e-4), probs

    print("KERNEL_OK")
</pallas_src>

<mosaic_0001>
module attributes {stable_mosaic.version = 11 : i64} {
  func.func @fused_conv_kernel(%arg0: i32, %arg1: memref<1x4x9x400xf32, #tpu.memory_space<vmem>>, %arg2: memref<16x9xf32, #tpu.memory_space<vmem>>, %arg3: memref<16x1xf32, #tpu.memory_space<vmem>>, %arg4: memref<9x32x16xf32, #tpu.memory_space<vmem>>, %arg5: memref<32x1xf32, #tpu.memory_space<vmem>>, %arg6: memref<1x400xf32, #tpu.memory_space<vmem>>, %arg7: memref<1x400xf32, #tpu.memory_space<vmem>>, %arg8: memref<400x100xf32, #tpu.memory_space<vmem>>, %arg9: memref<1x32x100xf32, #tpu.memory_space<vmem>>) attributes {dimension_semantics = [#tpu.dimension_semantics<parallel>], iteration_bounds = array<i64: 2>, scalar_prefetch = 0 : i64, scratch_operands = 0 : i64, tpu.core_type = #tpu.core_type<tc>, window_params = [{transform_indices = @transform_0, window_bounds = array<i64: 1, 4, 9, 400>}, {pipeline_mode = #tpu.pipeline_mode<synchronous>, transform_indices = @transform_1, window_bounds = array<i64: 16, 9>}, {pipeline_mode = #tpu.pipeline_mode<synchronous>, transform_indices = @transform_2, window_bounds = array<i64: 16, 1>}, {pipeline_mode = #tpu.pipeline_mode<synchronous>, transform_indices = @transform_3, window_bounds = array<i64: 9, 32, 16>}, {pipeline_mode = #tpu.pipeline_mode<synchronous>, transform_indices = @transform_4, window_bounds = array<i64: 32, 1>}, {pipeline_mode = #tpu.pipeline_mode<synchronous>, transform_indices = @transform_5, window_bounds = array<i64: 1, 400>}, {pipeline_mode = #tpu.pipeline_mode<synchronous>, transform_indices = @transform_6, window_bounds = array<i64: 1, 400>}, {pipeline_mode = #tpu.pipeline_mode<synchronous>, transform_indices = @transform_7, window_bounds = array<i64: 400, 100>}, {transform_indices = @transform_8, window_bounds = array<i64: 1, 32, 100>}]} {
    %c0 = arith.constant 0 : index
    %c0_0 = arith.constant 0 : index
    %c0_1 = arith.constant 0 : index
    %c0_2 = arith.constant 0 : index
    %0 = vector.load %arg1[%c0, %c0_0, %c0_1, %c0_2] : memref<1x4x9x400xf32, #tpu.memory_space<vmem>>, vector<1x4x9x400xf32>
    %1 = vector.shape_cast %0 : vector<1x4x9x400xf32> to vector<4x9x400xf32>
    %c0_3 = arith.constant 0 : index
    %c0_4 = arith.constant 0 : index
    %2 = vector.load %arg2[%c0_3, %c0_4] : memref<16x9xf32, #tpu.memory_space<vmem>>, vector<16x9xf32>
    %3 = vector.extract_strided_slice %1 {offsets = [0, 0, 0], sizes = [1, 9, 400], strides = [1, 1, 1]} : vector<4x9x400xf32> to vector<1x9x400xf32>
    %4 = vector.shape_cast %3 : vector<1x9x400xf32> to vector<9x400xf32>
    %cst = arith.constant dense<0.000000e+00> : vector<16x400xf32>
    %5 = tpu.matmul %2, %4, %cst {dimension_numbers = #tpu.dot_dimension_numbers<[1], [0], [0], [1], [0, 0, 1, 1], [], []>} : vector<16x9xf32>, vector<9x400xf32>, vector<16x400xf32> -> vector<16x400xf32>
    %6 = vector.extract_strided_slice %1 {offsets = [1, 0, 0], sizes = [1, 9, 400], strides = [1, 1, 1]} : vector<4x9x400xf32> to vector<1x9x400xf32>
    %7 = vector.shape_cast %6 : vector<1x9x400xf32> to vector<9x400xf32>
    %cst_5 = arith.constant dense<0.000000e+00> : vector<16x400xf32>
    %8 = tpu.matmul %2, %7, %cst_5 {dimension_numbers = #tpu.dot_dimension_numbers<[1], [0], [0], [1], [0, 0, 1, 1], [], []>} : vector<16x9xf32>, vector<9x400xf32>, vector<16x400xf32> -> vector<16x400xf32>
    %9 = arith.maximumf %5, %8 : vector<16x400xf32>
    %10 = vector.extract_strided_slice %1 {offsets = [2, 0, 0], sizes = [1, 9, 400], strides = [1, 1, 1]} : vector<4x9x400xf32> to vector<1x9x400xf32>
    %11 = vector.shape_cast %10 : vector<1x9x400xf32> to vector<9x400xf32>
    %cst_6 = arith.constant dense<0.000000e+00> : vector<16x400xf32>
    %12 = tpu.matmul %2, %11, %cst_6 {dimension_numbers = #tpu.dot_dimension_numbers<[1], [0], [0], [1], [0, 0, 1, 1], [], []>} : vector<16x9xf32>, vector<9x400xf32>, vector<16x400xf32> -> vector<16x400xf32>
    %13 = arith.maximumf %9, %12 : vector<16x400xf32>
    %14 = vector.extract_strided_slice %1 {offsets = [3, 0, 0], sizes = [1, 9, 400], strides = [1, 1, 1]} : vector<4x9x400xf32> to vector<1x9x400xf32>
    %15 = vector.shape_cast %14 : vector<1x9x400xf32> to vector<9x400xf32>
    %cst_7 = arith.constant dense<0.000000e+00> : vector<16x400xf32>
    %16 = tpu.matmul %2, %15, %cst_7 {dimension_numbers = #tpu.dot_dimension_numbers<[1], [0], [0], [1], [0, 0, 1, 1], [], []>} : vector<16x9xf32>, vector<9x400xf32>, vector<16x400xf32> -> vector<16x400xf32>
    %17 = arith.maximumf %13, %16 : vector<16x400xf32>
    %c0_8 = arith.constant 0 : index
    %c0_9 = arith.constant 0 : index
    %18 = vector.load %arg3[%c0_8, %c0_9] : memref<16x1xf32, #tpu.memory_space<vmem>>, vector<16x1xf32>
    %19 = vector.broadcast %18 : vector<16x1xf32> to vector<16x400xf32>
    %20 = arith.addf %17, %19 : vector<16x400xf32>
    %cst_10 = arith.constant 0.000000e+00 : f32
    %21 = vector.broadcast %cst_10 : f32 to vector<16x400xf32>
    %22 = arith.maximumf %20, %21 : vector<16x400xf32>
    %cst_11 = arith.constant 0.000000e+00 : f32
    %23 = vector.broadcast %cst_11 : f32 to vector<16x24xf32>
    %24 = tpu.concatenate %23, %22, %23 in 1 : vector<16x24xf32>, vector<16x400xf32>, vector<16x24xf32> -> vector<16x448xf32>
    %c0_12 = arith.constant 0 : index
    %c0_13 = arith.constant 0 : index
    %25 = vector.load %arg6[%c0_12, %c0_13] : memref<1x400xf32, #tpu.memory_space<vmem>>, vector<1x400xf32>
    %c0_14 = arith.constant 0 : index
    %c0_15 = arith.constant 0 : index
    %26 = vector.load %arg7[%c0_14, %c0_15] : memref<1x400xf32, #tpu.memory_space<vmem>>, vector<1x400xf32>
    %cst_16 = arith.constant 0.000000e+00 : f32
    %27 = vector.broadcast %cst_16 : f32 to vector<32x400xf32>
    %28 = vector.extract_strided_slice %24 {offsets = [0, 3], sizes = [16, 400], strides = [1, 1]} : vector<16x448xf32> to vector<16x400xf32>
    %29 = vector.broadcast %25 : vector<1x400xf32> to vector<16x400xf32>
    %30 = arith.mulf %28, %29 : vector<16x400xf32>
    %c0_17 = arith.constant 0 : index
    %c0_18 = arith.constant 0 : index
    %c0_19 = arith.constant 0 : index
    %31 = vector.load %arg4[%c0_17, %c0_18, %c0_19] : memref<9x32x16xf32, #tpu.memory_space<vmem>>, vector<1x32x16xf32>
    %32 = vector.shape_cast %31 : vector<1x32x16xf32> to vector<32x16xf32>
    %cst_20 = arith.constant dense<0.000000e+00> : vector<32x400xf32>
    %33 = tpu.matmul %32, %30, %cst_20 {dimension_numbers = #tpu.dot_dimension_numbers<[1], [0], [0], [1], [0, 0, 1, 1], [], []>} : vector<32x16xf32>, vector<16x400xf32>, vector<32x400xf32> -> vector<32x400xf32>
    %34 = arith.addf %27, %33 : vector<32x400xf32>
    %35 = vector.extract_strided_slice %24 {offsets = [0, 4], sizes = [16, 400], strides = [1, 1]} : vector<16x448xf32> to vector<16x400xf32>
    %c1 = arith.constant 1 : index
    %c0_21 = arith.constant 0 : index
    %c0_22 = arith.constant 0 : index
    %36 = vector.load %arg4[%c1, %c0_21, %c0_22] : memref<9x32x16xf32, #tpu.memory_space<vmem>>, vector<1x32x16xf32>
    %37 = vector.shape_cast %36 : vector<1x32x16xf32> to vector<32x16xf32>
    %cst_23 = arith.constant dense<0.000000e+00> : vector<32x400xf32>
    %38 = tpu.matmul %37, %35, %cst_23 {dimension_numbers = #tpu.dot_dimension_numbers<[1], [0], [0], [1], [0, 0, 1, 1], [], []>} : vector<32x16xf32>, vector<16x400xf32>, vector<32x400xf32> -> vector<32x400xf32>
    %39 = arith.addf %34, %38 : vector<32x400xf32>
    %40 = vector.extract_strided_slice %24 {offsets = [0, 5], sizes = [16, 400], strides = [1, 1]} : vector<16x448xf32> to vector<16x400xf32>
    %41 = vector.broadcast %26 : vector<1x400xf32> to vector<16x400xf32>
    %42 = arith.mulf %40, %41 : vector<16x400xf32>
    %c2 = arith.constant 2 : index
    %c0_24 = arith.constant 0 : index
    %c0_25 = arith.constant 0 : index
    %43 = vector.load %arg4[%c2, %c0_24, %c0_25] : memref<9x32x16xf32, #tpu.memory_space<vmem>>, vector<1x32x16xf32>
    %44 = vector.shape_cast %43 : vector<1x32x16xf32> to vector<32x16xf32>
    %cst_26 = arith.constant dense<0.000000e+00> : vector<32x400xf32>
    %45 = tpu.matmul %44, %42, %cst_26 {dimension_numbers = #tpu.dot_dimension_numbers<[1], [0], [0], [1], [0, 0, 1, 1], [], []>} : vector<32x16xf32>, vector<16x400xf32>, vector<32x400xf32> -> vector<32x400xf32>
    %46 = arith.addf %39, %45 : vector<32x400xf32>
    %47 = vector.extract_strided_slice %24 {offsets = [0, 23], sizes = [16, 400], strides = [1, 1]} : vector<16x448xf32> to vector<16x400xf32>
    %48 = vector.broadcast %25 : vector<1x400xf32> to vector<16x400xf32>
    %49 = arith.mulf %47, %48 : vector<16x400xf32>
    %c3 = arith.constant 3 : index
    %c0_27 = arith.constant 0 : index
    %c0_28 = arith.constant 0 : index
    %50 = vector.load %arg4[%c3, %c0_27, %c0_28] : memref<9x32x16xf32, #tpu.memory_space<vmem>>, vector<1x32x16xf32>
    %51 = vector.shape_cast %50 : vector<1x32x16xf32> to vector<32x16xf32>
    %cst_29 = arith.constant dense<0.000000e+00> : vector<32x400xf32>
    %52 = tpu.matmul %51, %49, %cst_29 {dimension_numbers = #tpu.dot_dimension_numbers<[1], [0], [0], [1], [0, 0, 1, 1], [], []>} : vector<32x16xf32>, vector<16x400xf32>, vector<32x400xf32> -> vector<32x400xf32>
    %53 = arith.addf %46, %52 : vector<32x400xf32>
    %54 = vector.extract_strided_slice %24 {offsets = [0, 24], sizes = [16, 400], strides = [1, 1]} : vector<16x448xf32> to vector<16x400xf32>
    %c4 = arith.constant 4 : index
    %c0_30 = arith.constant 0 : index
    %c0_31 = arith.constant 0 : index
    %55 = vector.load %arg4[%c4, %c0_30, %c0_31] : memref<9x32x16xf32, #tpu.memory_space<vmem>>, vector<1x32x16xf32>
    %56 = vector.shape_cast %55 : vector<1x32x16xf32> to vector<32x16xf32>
    %cst_32 = arith.constant dense<0.000000e+00> : vector<32x400xf32>
    %57 = tpu.matmul %56, %54, %cst_32 {dimension_numbers = #tpu.dot_dimension_numbers<[1], [0], [0], [1], [0, 0, 1, 1], [], []>} : vector<32x16xf32>, vector<16x400xf32>, vector<32x400xf32> -> vector<32x400xf32>
    %58 = arith.addf %53, %57 : vector<32x400xf32>
    %59 = vector.extract_strided_slice %24 {offsets = [0, 25], sizes = [16, 400], strides = [1, 1]} : vector<16x448xf32> to vector<16x400xf32>
    %60 = vector.broadcast %26 : vector<1x400xf32> to vector<16x400xf32>
    %61 = arith.mulf %59, %60 : vector<16x400xf32>
    %c5 = arith.constant 5 : index
    %c0_33 = arith.constant 0 : index
    %c0_34 = arith.constant 0 : index
    %62 = vector.load %arg4[%c5, %c0_33, %c0_34] : memref<9x32x16xf32, #tpu.memory_space<vmem>>, vector<1x32x16xf32>
    %63 = vector.shape_cast %62 : vector<1x32x16xf32> to vector<32x16xf32>
    %cst_35 = arith.constant dense<0.000000e+00> : vector<32x400xf32>
    %64 = tpu.matmul %63, %61, %cst_35 {dimension_numbers = #tpu.dot_dimension_numbers<[1], [0], [0], [1], [0, 0, 1, 1], [], []>} : vector<32x16xf32>, vector<16x400xf32>, vector<32x400xf32> -> vector<32x400xf32>
    %65 = arith.addf %58, %64 : vector<32x400xf32>
    %66 = vector.extract_strided_slice %24 {offsets = [0, 43], sizes = [16, 400], strides = [1, 1]} : vector<16x448xf32> to vector<16x400xf32>
    %67 = vector.broadcast %25 : vector<1x400xf32> to vector<16x400xf32>
    %68 = arith.mulf %66, %67 : vector<16x400xf32>
    %c6 = arith.constant 6 : index
    %c0_36 = arith.constant 0 : index
    %c0_37 = arith.constant 0 : index
    %69 = vector.load %arg4[%c6, %c0_36, %c0_37] : memref<9x32x16xf32, #tpu.memory_space<vmem>>, vector<1x32x16xf32>
    %70 = vector.shape_cast %69 : vector<1x32x16xf32> to vector<32x16xf32>
    %cst_38 = arith.constant dense<0.000000e+00> : vector<32x400xf32>
    %71 = tpu.matmul %70, %68, %cst_38 {dimension_numbers = #tpu.dot_dimension_numbers<[1], [0], [0], [1], [0, 0, 1, 1], [], []>} : vector<32x16xf32>, vector<16x400xf32>, vector<32x400xf32> -> vector<32x400xf32>
    %72 = arith.addf %65, %71 : vector<32x400xf32>
    %73 = vector.extract_strided_slice %24 {offsets = [0, 44], sizes = [16, 400], strides = [1, 1]} : vector<16x448xf32> to vector<16x400xf32>
    %c7 = arith.constant 7 : index
    %c0_39 = arith.constant 0 : index
    %c0_40 = arith.constant 0 : index
    %74 = vector.load %arg4[%c7, %c0_39, %c0_40] : memref<9x32x16xf32, #tpu.memory_space<vmem>>, vector<1x32x16xf32>
    %75 = vector.shape_cast %74 : vector<1x32x16xf32> to vector<32x16xf32>
    %cst_41 = arith.constant dense<0.000000e+00> : vector<32x400xf32>
    %76 = tpu.matmul %75, %73, %cst_41 {dimension_numbers = #tpu.dot_dimension_numbers<[1], [0], [0], [1], [0, 0, 1, 1], [], []>} : vector<32x16xf32>, vector<16x400xf32>, vector<32x400xf32> -> vector<32x400xf32>
    %77 = arith.addf %72, %76 : vector<32x400xf32>
    %78 = vector.extract_strided_slice %24 {offsets = [0, 45], sizes = [16, 400], strides = [1, 1]} : vector<16x448xf32> to vector<16x400xf32>
    %79 = vector.broadcast %26 : vector<1x400xf32> to vector<16x400xf32>
    %80 = arith.mulf %78, %79 : vector<16x400xf32>
    %c8 = arith.constant 8 : index
    %c0_42 = arith.constant 0 : index
    %c0_43 = arith.constant 0 : index
    %81 = vector.load %arg4[%c8, %c0_42, %c0_43] : memref<9x32x16xf32, #tpu.memory_space<vmem>>, vector<1x32x16xf32>
    %82 = vector.shape_cast %81 : vector<1x32x16xf32> to vector<32x16xf32>
    %cst_44 = arith.constant dense<0.000000e+00> : vector<32x400xf32>
    %83 = tpu.matmul %82, %80, %cst_44 {dimension_numbers = #tpu.dot_dimension_numbers<[1], [0], [0], [1], [0, 0, 1, 1], [], []>} : vector<32x16xf32>, vector<16x400xf32>, vector<32x400xf32> -> vector<32x400xf32>
    %84 = arith.addf %77, %83 : vector<32x400xf32>
    %c0_45 = arith.constant 0 : index
    %c0_46 = arith.constant 0 : index
    %85 = vector.load %arg5[%c0_45, %c0_46] : memref<32x1xf32, #tpu.memory_space<vmem>>, vector<32x1xf32>
    %86 = vector.broadcast %85 : vector<32x1xf32> to vector<32x400xf32>
    %87 = arith.addf %84, %86 : vector<32x400xf32>
    %cst_47 = arith.constant 0.000000e+00 : f32
    %88 = vector.broadcast %cst_47 : f32 to vector<32x400xf32>
    %89 = arith.maximumf %87, %88 : vector<32x400xf32>
    %cst_48 = arith.constant 0.000000e+00 : f32
    %90 = vector.broadcast %cst_48 : f32 to vector<32x24xf32>
    %91 = tpu.concatenate %89, %90 in 1 : vector<32x400xf32>, vector<32x24xf32> -> vector<32x424xf32>
    %92 = vector.extract_strided_slice %91 {offsets = [0, 0], sizes = [32, 400], strides = [1, 1]} : vector<32x424xf32> to vector<32x400xf32>
    %93 = vector.extract_strided_slice %91 {offsets = [0, 1], sizes = [32, 400], strides = [1, 1]} : vector<32x424xf32> to vector<32x400xf32>
    %94 = arith.maximumf %92, %93 : vector<32x400xf32>
    %95 = vector.extract_strided_slice %91 {offsets = [0, 20], sizes = [32, 400], strides = [1, 1]} : vector<32x424xf32> to vector<32x400xf32>
    %96 = vector.extract_strided_slice %91 {offsets = [0, 21], sizes = [32, 400], strides = [1, 1]} : vector<32x424xf32> to vector<32x400xf32>
    %97 = arith.maximumf %95, %96 : vector<32x400xf32>
    %98 = arith.maximumf %94, %97 : vector<32x400xf32>
    %c0_49 = arith.constant 0 : index
    %c0_50 = arith.constant 0 : index
    %99 = vector.load %arg8[%c0_49, %c0_50] : memref<400x100xf32, #tpu.memory_space<vmem>>, vector<400x100xf32>
    %cst_51 = arith.constant dense<0.000000e+00> : vector<32x100xf32>
    %100 = tpu.matmul %98, %99, %cst_51 {dimension_numbers = #tpu.dot_dimension_numbers<[1], [0], [0], [1], [0, 0, 1, 1], [], []>} : vector<32x400xf32>, vector<400x100xf32>, vector<32x100xf32> -> vector<32x100xf32>
    %c0_52 = arith.constant 0 : index
    %c0_53 = arith.constant 0 : index
    %c0_54 = arith.constant 0 : index
    %101 = vector.load %arg9[%c0_52, %c0_53, %c0_54] : memref<1x32x100xf32, #tpu.memory_space<vmem>>, vector<1x32x100xf32>
    %102 = vector.shape_cast %101 : vector<1x32x100xf32> to vector<32x100xf32>
    %103 = vector.shape_cast %100 : vector<32x100xf32> to vector<1x32x100xf32>
    tpu.vector_store %arg9[%c0_52, %c0_53, %c0_54], %103 {strides = array<i32>} : memref<1x32x100xf32, #tpu.memory_space<vmem>>, vector<1x32x100xf32>,
    return
  }
  func.func @transform_0(%arg0: i32) -> (i32, i32, i32, i32) {
    %c0_i32 = arith.constant 0 : i32
    %c0_i32_0 = arith.constant 0 : i32
    %c0_i32_1 = arith.constant 0 : i32
    %c0_i32_2 = arith.constant 0 : i32
    return %arg0, %c0_i32, %c0_i32_0, %c0_i32_1 : i32, i32, i32, i32
  }
  func.func @transform_1(%arg0: i32) -> (i32, i32) {
    %c0_i32 = arith.constant 0 : i32
    %c0_i32_0 = arith.constant 0 : i32
    %c0_i32_1 = arith.constant 0 : i32
    return %c0_i32, %c0_i32_0 : i32, i32
  }
  func.func @transform_2(%arg0: i32) -> (i32, i32) {
    %c0_i32 = arith.constant 0 : i32
    %c0_i32_0 = arith.constant 0 : i32
    %c0_i32_1 = arith.constant 0 : i32
    return %c0_i32, %c0_i32_0 : i32, i32
  }
  func.func @transform_3(%arg0: i32) -> (i32, i32, i32) {
    %c0_i32 = arith.constant 0 : i32
    %c0_i32_0 = arith.constant 0 : i32
    %c0_i32_1 = arith.constant 0 : i32
    %c0_i32_2 = arith.constant 0 : i32
    return %c0_i32, %c0_i32_0, %c0_i32_1 : i32, i32, i32
  }
  func.func @transform_4(%arg0: i32) -> (i32, i32) {
    %c0_i32 = arith.constant 0 : i32
    %c0_i32_0 = arith.constant 0 : i32
    %c0_i32_1 = arith.constant 0 : i32
    return %c0_i32, %c0_i32_0 : i32, i32
  }
  func.func @transform_5(%arg0: i32) -> (i32, i32) {
    %c0_i32 = arith.constant 0 : i32
    %c0_i32_0 = arith.constant 0 : i32
    %c0_i32_1 = arith.constant 0 : i32
    return %c0_i32, %c0_i32_0 : i32, i32
  }
  func.func @transform_6(%arg0: i32) -> (i32, i32) {
    %c0_i32 = arith.constant 0 : i32
    %c0_i32_0 = arith.constant 0 : i32
    %c0_i32_1 = arith.constant 0 : i32
    return %c0_i32, %c0_i32_0 : i32, i32
  }
  func.func @transform_7(%arg0: i32) -> (i32, i32) {
    %c0_i32 = arith.constant 0 : i32
    %c0_i32_0 = arith.constant 0 : i32
    %c0_i32_1 = arith.constant 0 : i32
    return %c0_i32, %c0_i32_0 : i32, i32
  }
  func.func @transform_8(%arg0: i32) -> (i32, i32, i32) {
    %c0_i32 = arith.constant 0 : i32
    %c0_i32_0 = arith.constant 0 : i32
    %c0_i32_1 = arith.constant 0 : i32
    return %arg0, %c0_i32, %c0_i32_0 : i32, i32, i32
  }
}

module attributes {stable_mosaic.version = 11 : i64} {
  func.func @mlp_head_kernel(%arg0: i32, %arg1: memref<2x3200xf32, #tpu.memory_space<vmem>>, %arg2: memref<3200x50xf32, #tpu.memory_space<vmem>>, %arg3: memref<1x50xf32, #tpu.memory_space<vmem>>, %arg4: memref<50x12xf32, #tpu.memory_space<vmem>>, %arg5: memref<1x12xf32, #tpu.memory_space<vmem>>, %arg6: memref<2x12xf32, #tpu.memory_space<vmem>>) attributes {dimension_semantics = [#tpu.dimension_semantics<arbitrary>], iteration_bounds = array<i64: 1>, scalar_prefetch = 0 : i64, scratch_operands = 0 : i64, tpu.core_type = #tpu.core_type<tc>, window_params = [{pipeline_mode = #tpu.pipeline_mode<synchronous>, transform_indices = @transform_0, window_bounds = array<i64: 2, 3200>}, {pipeline_mode = #tpu.pipeline_mode<synchronous>, transform_indices = @transform_1, window_bounds = array<i64: 3200, 50>}, {pipeline_mode = #tpu.pipeline_mode<synchronous>, transform_indices = @transform_2, window_bounds = array<i64: 1, 50>}, {pipeline_mode = #tpu.pipeline_mode<synchronous>, transform_indices = @transform_3, window_bounds = array<i64: 50, 12>}, {pipeline_mode = #tpu.pipeline_mode<synchronous>, transform_indices = @transform_4, window_bounds = array<i64: 1, 12>}, {pipeline_mode = #tpu.pipeline_mode<synchronous>, transform_indices = @transform_5, window_bounds = array<i64: 2, 12>}]} {
    %c0 = arith.constant 0 : index
    %c0_0 = arith.constant 0 : index
    %0 = vector.load %arg1[%c0, %c0_0] : memref<2x3200xf32, #tpu.memory_space<vmem>>, vector<2x3200xf32>
    %c0_1 = arith.constant 0 : index
    %c0_2 = arith.constant 0 : index
    %1 = vector.load %arg2[%c0_1, %c0_2] : memref<3200x50xf32, #tpu.memory_space<vmem>>, vector<3200x50xf32>
    %cst = arith.constant dense<0.000000e+00> : vector<2x50xf32>
    %2 = tpu.matmul %0, %1, %cst {dimension_numbers = #tpu.dot_dimension_numbers<[1], [0], [0], [1], [0, 0, 1, 1], [], []>} : vector<2x3200xf32>, vector<3200x50xf32>, vector<2x50xf32> -> vector<2x50xf32>
    %c0_3 = arith.constant 0 : index
    %c0_4 = arith.constant 0 : index
    %3 = vector.load %arg3[%c0_3, %c0_4] : memref<1x50xf32, #tpu.memory_space<vmem>>, vector<1x50xf32>
    %4 = vector.broadcast %3 : vector<1x50xf32> to vector<2x50xf32>
    %5 = arith.addf %2, %4 : vector<2x50xf32>
    %cst_5 = arith.constant 0.000000e+00 : f32
    %6 = vector.broadcast %cst_5 : f32 to vector<2x50xf32>
    %7 = arith.maximumf %5, %6 : vector<2x50xf32>
    %c0_6 = arith.constant 0 : index
    %c0_7 = arith.constant 0 : index
    %8 = vector.load %arg4[%c0_6, %c0_7] : memref<50x12xf32, #tpu.memory_space<vmem>>, vector<50x12xf32>
    %cst_8 = arith.constant dense<0.000000e+00> : vector<2x12xf32>
    %9 = tpu.matmul %7, %8, %cst_8 {dimension_numbers = #tpu.dot_dimension_numbers<[1], [0], [0], [1], [0, 0, 1, 1], [], []>} : vector<2x50xf32>, vector<50x12xf32>, vector<2x12xf32> -> vector<2x12xf32>
    %c0_9 = arith.constant 0 : index
    %c0_10 = arith.constant 0 : index
    %10 = vector.load %arg5[%c0_9, %c0_10] : memref<1x12xf32, #tpu.memory_space<vmem>>, vector<1x12xf32>
    %11 = vector.broadcast %10 : vector<1x12xf32> to vector<2x12xf32>
    %12 = arith.addf %9, %11 : vector<2x12xf32>
    %cst_11 = arith.constant dense<0xFF800000> : vector<2xf32>
    %13 = vector.multi_reduction <maximumf>, %12, %cst_11 [1] : vector<2x12xf32> to vector<2xf32>
    %14 = vector.shape_cast %13 : vector<2xf32> to vector<2x1xf32>
    %15 = vector.broadcast %14 : vector<2x1xf32> to vector<2x12xf32>
    %16 = arith.subf %12, %15 : vector<2x12xf32>
    %17 = math.exp %16 : vector<2x12xf32>
    %cst_12 = arith.constant dense<0.000000e+00> : vector<2xf32>
    %18 = vector.multi_reduction <add>, %17, %cst_12 [1] : vector<2x12xf32> to vector<2xf32>
    %19 = vector.shape_cast %18 : vector<2xf32> to vector<2x1xf32>
    %20 = math.log %19 : vector<2x1xf32>
    %21 = vector.broadcast %20 : vector<2x1xf32> to vector<2x12xf32>
    %22 = arith.subf %16, %21 : vector<2x12xf32>
    %c0_13 = arith.constant 0 : index
    %c0_14 = arith.constant 0 : index
    %23 = vector.load %arg6[%c0_13, %c0_14] : memref<2x12xf32, #tpu.memory_space<vmem>>, vector<2x12xf32>
    tpu.vector_store %arg6[%c0_13, %c0_14], %22 {strides = array<i32>} : memref<2x12xf32, #tpu.memory_space<vmem>>, vector<2x12xf32>,
    return
  }
  func.func @transform_0(%arg0: i32) -> (i32, i32) {
    %c0_i32 = arith.constant 0 : i32
    %c0_i32_0 = arith.constant 0 : i32
    %c0_i32_1 = arith.constant 0 : i32
    return %c0_i32, %c0_i32_0 : i32, i32
  }
  func.func @transform_1(%arg0: i32) -> (i32, i32) {
    %c0_i32 = arith.constant 0 : i32
    %c0_i32_0 = arith.constant 0 : i32
    %c0_i32_1 = arith.constant 0 : i32
    return %c0_i32, %c0_i32_0 : i32, i32
  }
  func.func @transform_2(%arg0: i32) -> (i32, i32) {
    %c0_i32 = arith.constant 0 : i32
    %c0_i32_0 = arith.constant 0 : i32
    %c0_i32_1 = arith.constant 0 : i32
    return %c0_i32, %c0_i32_0 : i32, i32
  }
  func.func @transform_3(%arg0: i32) -> (i32, i32) {
    %c0_i32 = arith.constant 0 : i32
    %c0_i32_0 = arith.constant 0 : i32
    %c0_i32_1 = arith.constant 0 : i32
    return %c0_i32, %c0_i32_0 : i32, i32
  }
  func.func @transform_4(%arg0: i32) -> (i32, i32) {
    %c0_i32 = arith.constant 0 : i32
    %c0_i32_0 = arith.constant 0 : i32
    %c0_i32_1 = arith.constant 0 : i32
    return %c0_i32, %c0_i32_0 : i32, i32
  }
  func.func @transform_5(%arg0: i32) -> (i32, i32) {
    %c0_i32 = arith.constant 0 : i32
    %c0_i32_0 = arith.constant 0 : i32
    %c0_i32_1 = arith.constant 0 : i32
    return %c0_i32, %c0_i32_0 : i32, i32
  }
}

</mosaic_0001>

<bundles_post_ra>
// kernel: cnn160_forward.2
= control target key start
LH: loop header
LB: loop body
LE: loop exit
PB: predicated region body
PF: predicated region fallthrough
CT: control target
= control target key end

     0   :  { %s4875_s27 = smov 0   ;;  %s5889_s0 = inlined_call_operand.vmem [shape: f32[2,4,9,400], index: 0, kind: input, shape index: {}]   ;;  %s5890_s1 = inlined_call_operand.vmem [shape: f32[16,9], index: 1, kind: input, shape index: {}]   ;;  %s5891_s2 = inlined_call_operand.vmem [shape: f32[16,1], index: 2, kind: input, shape index: {}]   ;;  %s5892_s3 = inlined_call_operand.vmem [shape: f32[9,32,16], index: 3, kind: input, shape index: {}]   ;;  %s5893_s4 = inlined_call_operand.vmem [shape: f32[32,1], index: 4, kind: input, shape index: {}]   ;;  %s5894_s5 = inlined_call_operand.vmem [shape: f32[1,400], index: 5, kind: input, shape index: {}]   ;;  %s5895_s6 = inlined_call_operand.vmem [shape: f32[1,400], index: 6, kind: input, shape index: {}]   ;;  %s5896_s7 = inlined_call_operand.vmem [shape: f32[400,100], index: 7, kind: input, shape index: {}]   ;;  %s5897_s8 = inlined_call_operand.vmem [shape: f32[2,32,100], index: 8, kind: output, shape index: {}]  }
   0x1 LB: > { %s4024_s28 = sadd.s32 4294967295, %s4806_s27   ;;  %p4028_p0 = scmp.ge.s32.totalorder %s4806_s27, 1  ;;  %s4806_s27 = sphi %s4875_s27, %s18_s27  }
   0x2   : > { %p262_p1 = scmp.lt.s32.totalorder %s4806_s27, 3 }
   0x4   : > { %p263_p2 = pnand %p4028_p0, %p262_p1 }
   0x5   : > { %p296_p3 = scmp.lt.s32.totalorder (!%p263_p2), %s4024_s28, 1  ;;  %v4808_v0 = vmov (!%p263_p2), 0.0   ;;  %v1036_v1 = vld [vmem:[%s5891_s2] sm:$0xff] (!%p263_p2)  ;;  %vm347_vm0 = vcmask (!%p263_p2), 1040384   ;;  %v4809_v2 = vmov (!%p263_p2), 0   ;;  %v1037_v3 = vld [vmem:[%s5891_s2 + $0x8] sm:$0xff] (!%p263_p2) }
   0x6   : > { %266 = sbr.rel (%p263_p2) target bundleno = 1417 (0x589), region = 52  ;;  %424 = vmatprep.mubr.f32.mxu0 (!%p263_p2), %v4808_v0  ;;  %501 = vmatprep.mubr.f32.mxu1 (!%p263_p2), %v4808_v0  ;;  %vm4810_vm1 = vmmov (!%p263_p2), 1   ;;  %v4914_v16 = vld [vmem:[%s5890_s1] sm:$0xff] (!%p263_p2)  ;;  %vm340_vm3 = vcmask (!%p263_p2), 72704   ;;  %v339_v36 = vld [vmem:[%s5890_s1 + $0x8] sm:$0xff] (!%p263_p2)  ;;  %s4811_s19 = smov (!%p263_p2), 24  }
   0x7   : > { %4558 = vset.pattern.permute.xlu0 (!%p263_p2), %v4809_v2  ;;  %4739 = vset.pattern.permute.xlu1 (!%p263_p2), %v4809_v2  ;;  %vm4899_vm2 = vmpackc.low (!%p263_p2), %vm347_vm0, %vm4810_vm1  ;;  %s4812_s22 = smov (!%p263_p2), 3   ;;  %s4813_s25 = smov (!%p263_p2), 5   ;;  %vm1088_vm4 = vcmask (!%p263_p2), 195584   ;;  %vm1105_vm5 = vcmask (!%p263_p2), 326656   ;;  %vm1135_vm6 = vcmask (!%p263_p2), 23552   ;;  %vm1640_vm7 = vcmask (!%p263_p2), 39936  }
   0x8   : > { %1040 = vperm.xlu0 (!%p263_p2), %4558, %v1036_v1   ;;  %s4814_s26 = smov (!%p263_p2), 23   ;;  %s4815_s29 = smov (!%p263_p2), 124   ;;  %vm1914_vm8 = vcmask (!%p263_p2), 187392   ;;  %vm1180_vm9 = vcmask (!%p263_p2), 1014784   ;;  %vm1195_vm10 = vcmask (!%p263_p2), 130048   ;;  %vm2430_vm11 = vcmask (!%p263_p2), 203776  }
   0x9   : > { %s4816_s30 = smov (!%p263_p2), 125   ;;  %s4818_s10 = smov (!%p263_p2), 123   ;;  %vm1410_vm12 = vcmask (!%p263_p2), 1022976   ;;  %vm1685_vm13 = vcmask (!%p263_p2), 1006592   ;;  %vm2704_vm14 = vcmask (!%p263_p2), 351232   ;;  %vm1959_vm15 = vcmask (!%p263_p2), 859136  }
   0xa   : > { %s4819_s11 = smov (!%p263_p2), 43   ;;  %s4820_s12 = smov (!%p263_p2), 105   ;;  %vm2201_vm0 = vcmask (!%p263_p2), 850944   ;;  %vm3220_vm1 = vcmask (!%p263_p2), 367616  }
   0xb   : > { %s4821_s13 = smov (!%p263_p2), 104   ;;  %s4825_s17 = smov (!%p263_p2), 84  }
   0xc   : > { %1045 = vperm.xlu0 (!%p263_p2), %4558, %v1037_v3   ;;  %s4829_s16 = smov (!%p263_p2), 108  }
   0xd   : > { %s5901_s28 = smov (!%p296_p3, %s4024_s28), 1 }
   0xe   : > { %s4175_s9 = sshll.u32 %s5901_s28, 8  ;;  %s4176_s21 = sshll.u32 %s5901_s28, 5 }
   0xf   : > { %s4897_s14 = scalar_lea.vmem %s5889_s0, %s4175_s9  ;;  %s4817_s9 = smov 25  }
  0x10   : > { %v307_v5 = vld [vmem:[%s4897_s14 + $0x8] sm:$0xff]  ;;  %v309_v7 = vld [vmem:[%s4897_s14 + $0x18] sm:$0xff]  ;;  %v306_v10 = vld [vmem:[%s4897_s14] sm:$0xff]  ;;  %s305_s24 = scalar_lea.vmem %s5897_s8, %s4176_s21 }
  0x11   : > { %v311_v6 = vld [vmem:[%s4897_s14 + $0x28] sm:$0x1]  ;;  %v313_v9 = vld [vmem:[%s4897_s14 + $0x38] sm:$0x1]  ;;  %v310_v11 = vld [vmem:[%s4897_s14 + $0x20] sm:$0x1] }
  0x12   : > { %v4221_v8 = vpack.c.bf16 %v311_v6, %v307_v5  ;;  %v4227_v12 = vpack.c.bf16 %v313_v9, %v309_v7  ;;  %v4224_v13 = vpack.c.bf16 %v310_v11, %v306_v10  ;;  %v308_v14 = vld [vmem:[%s4897_s14 + $0x10] sm:$0xff]  ;;  %v315_v17 = vld [vmem:[%s4897_s14 + $0x48] sm:$0xff]  ;;  %v317_v20 = vld [vmem:[%s4897_s14 + $0x58] sm:$0xff] }
  0x13   : > { %v312_v15 = vld [vmem:[%s4897_s14 + $0x30] sm:$0x1]  ;;  %v319_v19 = vld [vmem:[%s4897_s14 + $0x68] sm:$0x1]  ;;  %v321_v21 = vld [vmem:[%s4897_s14 + $0x78] sm:$0x1] }
  0x14   : > { %4223 = vmatprep.subr.msk.bf16.mxu0 %vm4899_vm2, %v4221_v8  ;;  %v4230_v18 = vpack.c.bf16 %v312_v15, %v308_v14  ;;  %4229 = vmatprep.subr.msk.bf16.mxu1 %vm4899_vm2, %v4227_v12  ;;  %v4233_v22 = vpack.c.bf16 %v319_v19, %v315_v17  ;;  %v4239_v23 = vpack.c.bf16 %v321_v21, %v317_v20  ;;  %v314_v24 = vld [vmem:[%s4897_s14 + $0x40] sm:$0xff]  ;;  %v316_v26 = vld [vmem:[%s4897_s14 + $0x50] sm:$0xff]  ;;  %v323_v29 = vld [vmem:[%s4897_s14 + $0x88] sm:$0xff] }
  0x15   : > { %4226 = vmatpush1.bf16.msk.msra.mxu0 %vm4899_vm2, %v4224_v13  ;;  %v318_v25 = vld [vmem:[%s4897_s14 + $0x60] sm:$0x1]  ;;  %v320_v28 = vld [vmem:[%s4897_s14 + $0x70] sm:$0x1]  ;;  %v327_v30 = vld [vmem:[%s4897_s14 + $0xa8] sm:$0x1] }
  0x16   : > { %4232 = vmatpush1.bf16.msk.msra.mxu1 %vm4899_vm2, %v4230_v18  ;;  %v4236_v27 = vpack.c.bf16 %v318_v25, %v314_v24  ;;  %4235 = vmatprep.subr.msk.bf16.mxu0 %vm4899_vm2, %v4233_v22  ;;  %v4242_v31 = vpack.c.bf16 %v320_v28, %v316_v26  ;;  %v4245_v32 = vpack.c.bf16 %v327_v30, %v323_v29  ;;  %v325_v33 = vld [vmem:[%s4897_s14 + $0x98] sm:$0xff]  ;;  %v322_v37 = vld [vmem:[%s4897_s14 + $0x80] sm:$0xff]  ;;  %v324_v39 = vld [vmem:[%s4897_s14 + $0x90] sm:$0xff] }
  0x17   : > { %4241 = vmatprep.subr.msk.bf16.mxu1 %vm4899_vm2, %v4239_v23  ;;  %v329_v34 = vld [vmem:[%s4897_s14 + $0xb8] sm:$0x1]  ;;  %v326_v38 = vld [vmem:[%s4897_s14 + $0xa0] sm:$0x1]  ;;  %v328_v40 = vld [vmem:[%s4897_s14 + $0xb0] sm:$0x1] }
  0x18   : > { %4035 = vmatmul.mubr.msk.f32.vlgmr.msra.gmra.mrb[0].mxu0 %vm340_vm3, %v4914_v16  ;;  %v4251_v35 = vpack.c.bf16 %v329_v34, %v325_v33  ;;  %v331_v41 = vld [vmem:[%s4897_s14 + $0xc8] sm:$0xff]  ;;  %v333_v43 = vld [vmem:[%s4897_s14 + $0xd8] sm:$0xff]  ;;  %v4248_v45 = vpack.c.bf16 %v326_v38, %v322_v37  ;;  %v4254_v46 = vpack.c.bf16 %v328_v40, %v324_v39  ;;  %v330_v49 = vld [vmem:[%s4897_s14 + $0xc0] sm:$0xff] }
  0x19   : > { %4039 = vmatmul.mubr.msk.f32.vlgmr.msra.gmra.mrb[0].mxu1 %vm340_vm3, %v4914_v16  ;;  %430 = vmatprep.mubr.f32.mxu0 %v4808_v0  ;;  %v335_v42 = vld [vmem:[%s4897_s14 + $0xe8] sm:$0x1]  ;;  %v337_v44 = vld [vmem:[%s4897_s14 + $0xf8] sm:$0x1]  ;;  %v334_v50 = vld [vmem:[%s4897_s14 + $0xe0] sm:$0x1] }
  0x1a   : > { %507 = vmatprep.mubr.f32.mxu1 %v4808_v0  ;;  %4238 = vmatpush1.bf16.msk.msra.mxu0 %vm4899_vm2, %v4236_v27  ;;  %v4257_v47 = vpack.c.bf16 %v335_v42, %v331_v41  ;;  %v4263_v48 = vpack.c.bf16 %v337_v44, %v333_v43  ;;  %v332_v51 = vld [vmem:[%s4897_s14 + $0xd0] sm:$0xff]  ;;  %v4260_v53 = vpack.c.bf16 %v334_v50, %v330_v49  ;;  %v1111_v44 = vlaneseq }
  0x1b   : > { %4244 = vmatpush1.bf16.msk.msra.mxu1 %vm4899_vm2, %v4242_v31  ;;  %4247 = vmatprep.subr.msk.bf16.mxu0 %vm4899_vm2, %v4245_v32  ;;  %v336_v52 = vld [vmem:[%s4897_s14 + $0xf0] sm:$0x1]  ;;  %s4822_s14 = smov 45  }
  0x1c   : > { %4036 = vmatmul.mubr.msk.f32.gmra.mrb[2].mxu0 %vm340_vm3, %v339_v36  ;;  %4253 = vmatprep.subr.msk.bf16.mxu1 %vm4899_vm2, %v4251_v35  ;;  %v4266_v54 = vpack.c.bf16 %v336_v52, %v332_v51 }
  0x1d   : > { %4040 = vmatmul.mubr.msk.f32.gmra.mrb[2].mxu1 %vm340_vm3, %v339_v36  ;;  %590 = vmatprep.mubr.f32.mxu0 %v4808_v0 }
  0x1e   : > { %667 = vmatprep.mubr.f32.mxu1 %v4808_v0 }
  0x20   : > { %4043 = vmatmul.mubr.msk.f32.vlgmr.msra.gmra.mrb[4].mxu0 %vm340_vm3, %v4914_v16 }
  0x21   : > { %4047 = vmatmul.mubr.msk.f32.vlgmr.msra.gmra.mrb[4].mxu1 %vm340_vm3, %v4914_v16  ;;  %596 = vmatprep.mubr.f32.mxu0 %v4808_v0 }
  0x22   : > { %673 = vmatprep.mubr.f32.mxu1 %v4808_v0  ;;  %4250 = vmatpush1.bf16.msk.msra.mxu0 %vm4899_vm2, %v4248_v45 }
  0x23   : > { %4256 = vmatpush1.bf16.msk.msra.mxu1 %vm4899_vm2, %v4254_v46  ;;  %4259 = vmatprep.subr.msk.bf16.mxu0 %vm4899_vm2, %v4257_v47 }
  0x24   : > { %4044 = vmatmul.mubr.msk.f32.gmra.mrb[6].mxu0 %vm340_vm3, %v339_v36  ;;  %4265 = vmatprep.subr.msk.bf16.mxu1 %vm4899_vm2, %v4263_v48 }
  0x25   : > { %4048 = vmatmul.mubr.msk.f32.gmra.mrb[6].mxu1 %vm340_vm3, %v339_v36  ;;  %764 = vmatprep.mubr.f32.mxu0 %v4808_v0 }
  0x26   : > { %841 = vmatprep.mubr.f32.mxu1 %v4808_v0 }
  0x28   : > { %4051 = vmatmul.mubr.msk.f32.vlgmr.msra.gmra.mrb[8].mxu0 %vm340_vm3, %v4914_v16 }
  0x29   : > { %4055 = vmatmul.mubr.msk.f32.vlgmr.msra.gmra.mrb[8].mxu1 %vm340_vm3, %v4914_v16  ;;  %770 = vmatprep.mubr.f32.mxu0 %v4808_v0 }
  0x2a   : > { %847 = vmatprep.mubr.f32.mxu1 %v4808_v0  ;;  %4262 = vmatpush1.bf16.msk.msra.mxu0 %vm4899_vm2, %v4260_v53 }
  0x2b   : > { %4268 = vmatpush1.bf16.msk.msra.mxu1 %vm4899_vm2, %v4266_v54  ;;  %vm2475_vm2 = vcmask 842752  }
  0x2c   : > { %4052 = vmatmul.mubr.msk.f32.gmra.mrb[10].mxu0 %vm340_vm3, %v339_v36 }
  0x2d   : > { %4056 = vmatmul.mubr.msk.f32.gmra.mrb[10].mxu1 %vm340_vm3, %v339_v36  ;;  %938 = vmatprep.mubr.f32.mxu0 %v4808_v0 }
  0x2e   : > { %1015 = vmatprep.mubr.f32.mxu1 %v4808_v0 }
  0x30   : > { %4059 = vmatmul.mubr.msk.f32.vlgmr.msra.gmra.mrb[12].mxu0 %vm340_vm3, %v4914_v16 }
  0x31   : > { %4063 = vmatmul.mubr.msk.f32.vlgmr.msra.gmra.mrb[12].mxu1 %vm340_vm3, %v4914_v16  ;;  %944 = vmatprep.mubr.f32.mxu0 %v4808_v0 }
  0x32   : > { %1021 = vmatprep.mubr.f32.mxu1 %v4808_v0 }
  0x34   : > { %4060 = vmatmul.mubr.msk.f32.gmra.mrb[14].mxu0 %vm340_vm3, %v339_v36 }
  0x35   : > { %4064 = vmatmul.mubr.msk.f32.gmra.mrb[14].mxu1 %vm340_vm3, %v339_v36  ;;  %1272 = vmatprep.mubr.f32.mxu0 %v4808_v0  ;;  %vm2749_vm3 = vcmask 695296  }
  0x36   : > { %1361 = vmatprep.mubr.f32.mxu1 %v4808_v0 }
  0x87   : > { %v1041_v32 = vpop.permute.xlu0 %1040 }
  0x8b   : > { %v1046_v54 = vpop.permute.xlu0 %1045 }
  0xeb   : > { %v426_v55 = vpop.f32.mrb[0].mxu0 }
  0xec   : > { %v503_v56 = vpop.f32.mrb[0].mxu1  ;;  %v428_v57 = vpop.f32.mrb[1].mxu0 }
  0xed   : > { %v505_v58 = vpop.f32.mrb[1].mxu1 }
  0xef   : > { %v432_v59 = vpop.f32.mrb[2].mxu0 }
  0xf0   : > { %v509_v60 = vpop.f32.mrb[2].mxu1  ;;  %v434_v61 = vpop.f32.mrb[3].mxu0 }
  0xf1   : > { %v511_v62 = vpop.f32.mrb[3].mxu1 }
  0xf3   : > { %v592_v63 = vpop.f32.mrb[4].mxu0 }
  0xf4   : > { %v680_v1 = vmax.f32 %v426_v55, %v592_v63  ;;  %v669_v2 = vpop.f32.mrb[4].mxu1  ;;  %v594_v3 = vpop.f32.mrb[5].mxu0  ;;  %v1108_v63 = vld [vmem:[%s5894_s5] sm:$0xf] }
  0xf5   : > { %v682_v4 = vmax.f32 %v503_v56, %v669_v2  ;;  %v681_v5 = vmax.f32 %v428_v57, %v594_v3  ;;  %v671_v6 = vpop.f32.mrb[5].mxu1  ;;  %v1112_v57 = vshrl.u32 %v1111_v44, 7 }
  0xf6   : > { %v683_v7 = vmax.f32 %v505_v58, %v671_v6 }
  0xf7   : > { %v598_v8 = vpop.f32.mrb[6].mxu0 }
  0xf8   : > { %v684_v9 = vmax.f32 %v432_v59, %v598_v8  ;;  %v675_v10 = vpop.f32.mrb[6].mxu1  ;;  %v600_v11 = vpop.f32.mrb[7].mxu0 }
  0xf9   : > { %v686_v12 = vmax.f32 %v509_v60, %v675_v10  ;;  %v685_v13 = vmax.f32 %v434_v61, %v600_v11  ;;  %v677_v14 = vpop.f32.mrb[7].mxu1  ;;  %v1109_v10 = vld [vmem:[%s5895_s6] sm:$0xf] }
  0xfa   : > { %v687_v15 = vmax.f32 %v511_v62, %v677_v14  ;;  %v1113_v62 = vsub.s32 0, %v1112_v57  ;;  %v1125_v14 = vsub.s32 3, %v1112_v57 }
  0xfb   : > { %v766_v16 = vpop.f32.mrb[8].mxu0 }
  0xfc   : > { %v854_v17 = vmax.f32 %v680_v1, %v766_v16  ;;  %v843_v18 = vpop.f32.mrb[8].mxu1  ;;  %v768_v19 = vpop.f32.mrb[9].mxu0  ;;  %v5043_v16 = vrot.slane %v1108_v63, %v1125_v14 }
  0xfd   : > { %v856_v20 = vmax.f32 %v682_v4, %v843_v18  ;;  %v855_v21 = vmax.f32 %v681_v5, %v768_v19  ;;  %v845_v22 = vpop.f32.mrb[9].mxu1  ;;  %v5024_v4 = vrot.slane %v1108_v63, %v1113_v62  ;;  %v1121_v5 = vsub.s32 2, %v1112_v57 }
  0xfe   : > { %v857_v23 = vmax.f32 %v683_v7, %v845_v22  ;;  %v5051_v18 = vrot.slane %v1109_v10, %v1125_v14 }
  0xff   : > { %v772_v24 = vpop.f32.mrb[10].mxu0  ;;  %v5028_v8 = vrot.slane %v1108_v63, %v1121_v5 }
 0x100   : > { %v858_v25 = vmax.f32 %v684_v9, %v772_v24  ;;  %v849_v26 = vpop.f32.mrb[10].mxu1  ;;  %v774_v27 = vpop.f32.mrb[11].mxu0  ;;  %v1117_v9 = vsub.s32 1, %v1112_v57 }
 0x101   : > { %v860_v28 = vmax.f32 %v686_v12, %v849_v26  ;;  %v859_v29 = vmax.f32 %v685_v13, %v774_v27  ;;  %v851_v30 = vpop.f32.mrb[11].mxu1  ;;  %v5035_v12 = vrot.slane %v1109_v10, %v1113_v62 }
 0x102   : > { %v861_v31 = vmax.f32 %v687_v15, %v851_v30  ;;  %v5037_v13 = vrot.slane %v1108_v63, %v1117_v9  ;;  %v5041_v15 = vrot.slane %v1109_v10, %v1121_v5 }
 0x103   : > { %v940_v33 = vpop.f32.mrb[12].mxu0 }
 0x104   : > { %v1028_v34 = vmax.f32 %v854_v17, %v940_v33  ;;  %v1017_v35 = vpop.f32.mrb[12].mxu1  ;;  %v942_v36 = vpop.f32.mrb[13].mxu0  ;;  %v5047_v17 = vrot.slane %v1109_v10, %v1117_v9 }
 0x105   : > { %v1030_v37 = vmax.f32 %v856_v20, %v1017_v35  ;;  %v1029_v38 = vmax.f32 %v855_v21, %v942_v36  ;;  %v1019_v39 = vpop.f32.mrb[13].mxu1 }
 0x106   : > { %v1048_v40 = vadd.f32 %v1041_v32, %v1028_v34  ;;  %v1031_v41 = vmax.f32 %v857_v23, %v1019_v39 }
 0x107   : > { %v946_v42 = vpop.f32.mrb[14].mxu0  ;;  %v1050_v43 = vadd.f32 %v1041_v32, %v1030_v37  ;;  %v1049_v58 = vadd.f32 %v1041_v32, %v1029_v38 }
 0x108   : > { %v1056_v45 = vmax.f32 %v1048_v40, 0.0  ;;  %v1032_v46 = vmax.f32 %v858_v25, %v946_v42  ;;  %v1023_v47 = vpop.f32.mrb[14].mxu1  ;;  %v948_v48 = vpop.f32.mrb[15].mxu0  ;;  %v1051_v49 = vadd.f32 %v1041_v32, %v1031_v41 }
 0x109   : > { %v1034_v50 = vmax.f32 %v860_v28, %v1023_v47  ;;  %v1033_v51 = vmax.f32 %v859_v29, %v948_v48  ;;  %v1025_v52 = vpop.f32.mrb[15].mxu1  ;;  %v1058_v53 = vmax.f32 %v1050_v43, 0.0  ;;  %v1057_v1 = vmax.f32 %v1049_v58, 0.0 }
 0x10a   : > { %v1035_v55 = vmax.f32 %v861_v31, %v1025_v52  ;;  %1072 = vrot.lane.b32.xlu0 %v1056_v45, %s4811_s19  ;;  %v1059_v59 = vmax.f32 %v1051_v49, 0.0  ;;  %v1052_v60 = vadd.f32 %v1046_v54, %v1032_v46 }
 0x10b   : > { %v1054_v56 = vadd.f32 %v1046_v54, %v1034_v50  ;;  %1076 = vrot.lane.b32.xlu1 %v1058_v53, %s4811_s19  ;;  %v1053_v6 = vadd.f32 %v1046_v54, %v1033_v51 }
 0x10c   : > { %v1060_v2 = vmax.f32 %v1052_v60, 0.0  ;;  %v1055_v3 = vadd.f32 %v1046_v54, %v1035_v55 }
 0x10d   : > { %v1062_v61 = vmax.f32 %v1054_v56, 0.0  ;;  %v1061_v11 = vmax.f32 %v1053_v6, 0.0 }
 0x10e   : > { %v1063_v7 = vmax.f32 %v1055_v3, 0.0 }
 0x10f   : > { %1078 = vrot.lane.b32.xlu1 %v1059_v59, %s4811_s19  ;;  %1084 = vrot.lane.b32.xlu0 %v1062_v61, %s4811_s19 }
 0x113   : > { %1074 = vrot.lane.b32.xlu1 %v1057_v1, %s4811_s19  ;;  %1080 = vrot.lane.b32.xlu0 %v1060_v2, %s4811_s19 }
 0x117   : > { %1086 = vrot.lane.b32.xlu1 %v1063_v7, %s4811_s19  ;;  %1127 = vrot.lane.b32.xlu0 %v5024_v4, %s4812_s22 }
 0x11b   : > { %1131 = vrot.lane.b32.xlu0 %v5028_v8, %s4812_s22  ;;  %1082 = vrot.lane.b32.xlu1 %v1061_v11, %s4811_s19  ;;  %s4827_s19 = smov 127  }
 0x11f   : > { %1632 = vrot.lane.b32.xlu0 %v5035_v12, %s4813_s25  ;;  %1129 = vrot.lane.b32.xlu1 %v5037_v13, %s4812_s22 }
 0x123   : > { %1636 = vrot.lane.b32.xlu0 %v5041_v15, %s4813_s25  ;;  %1133 = vrot.lane.b32.xlu1 %v5043_v16, %s4812_s22 }
 0x127   : > { %1906 = vrot.lane.b32.xlu0 %v5024_v4, %s4814_s26  ;;  %1634 = vrot.lane.b32.xlu1 %v5047_v17, %s4813_s25 }
 0x12b   : > { %1638 = vrot.lane.b32.xlu1 %v5051_v18, %s4813_s25  ;;  %1910 = vrot.lane.b32.xlu0 %v5028_v8, %s4814_s26  ;;  %s4823_s25 = smov 103  }
 0x12f   : > { %1908 = vrot.lane.b32.xlu1 %v5037_v13, %s4814_s26 }
 0x133   : > { %1912 = vrot.lane.b32.xlu1 %v5043_v16, %s4814_s26  ;;  %s4826_s26 = smov 83  }
 0x17c   : > { %v1073_v19 = vpop.permute.xlu0 %1072 }
 0x17d   : > { %v1077_v20 = vpop.permute.xlu1 %1076  ;;  %v5094_v42 = vsel %vm1088_vm4, 0.0, %v1073_v19 }
 0x181   : > { %v1079_v21 = vpop.permute.xlu1 %1078  ;;  %v1085_v22 = vpop.permute.xlu0 %1084 }
 0x182   : > { %v1091_v29 = vsel %vm1088_vm4, %v1077_v20, %v1079_v21 }
 0x183   : > { %v5070_v33 = vsel %vm1105_vm5, %v1091_v29, 0.0 }
 0x185   : > { %v1075_v23 = vpop.permute.xlu1 %1074  ;;  %v1081_v24 = vpop.permute.xlu0 %1080 }
 0x186   : > { %v5058_v25 = vsel %vm1088_vm4, %v1073_v19, %v1075_v23  ;;  %v5061_v26 = vsel %vm1088_vm4, %v1075_v23, %v1077_v20  ;;  %v5089_v39 = vsel %vm1088_vm4, 0.0, %v1081_v24 }
 0x187   : > { %v5065_v27 = vpack.i.bf16 %v5061_v26, %v5058_v25  ;;  %v5100_v47 = vpack.i.bf16 %v5089_v39, %v5094_v42 }
 0x189   : > { %v1087_v28 = vpop.permute.xlu1 %1086  ;;  %4560 = vrot.lane.b32.xlu0 %v5065_v27, %s4815_s29  ;;  %v1128_v31 = vpop.permute.xlu0 %1127 }
 0x18a   : > { %v1094_v30 = vsel %vm1088_vm4, %v1085_v22, %v1087_v28  ;;  %v1143_v51 = vmul.f32 %v1128_v31, %v5094_v42  ;;  %v1147_v52 = vmul.f32 %v1128_v31, %v5089_v39 }
 0x18b   : > { %v5072_v34 = vsel %vm1105_vm5, %v1094_v30, 0.0  ;;  %vm3265_vm5 = vcmask 678912  }
 0x18c   : > { %v4584_v58 = vpack.i.bf16 %v1147_v52, %v1143_v51 }
 0x18d   : > { %v1083_v32 = vpop.permute.xlu1 %1082  ;;  %v1132_v40 = vpop.permute.xlu0 %1131 }
 0x18e   : > { %v5075_v35 = vsel %vm1088_vm4, %v1081_v24, %v1083_v32  ;;  %v5078_v36 = vsel %vm1088_vm4, %v1083_v32, %v1085_v22  ;;  %vm2991_vm4 = vcmask 687104  }
 0x18f   : > { %v5082_v37 = vpack.i.bf16 %v5072_v34, %v5078_v36  ;;  %v5086_v38 = vpack.i.bf16 %v5075_v35, %v5070_v33 }
 0x191   : > { %4570 = vrot.lane.b32.xlu0 %v5082_v37, %s4815_s29  ;;  %4565 = vrot.lane.b32.xlu1 %v5086_v38, %s4815_s29  ;;  %v1130_v41 = vpop.permute.xlu1 %1129  ;;  %v1633_v53 = vpop.permute.xlu0 %1632 }
 0x192   : > { %v1136_v43 = vsel %vm1135_vm6, %v1128_v31, %v1130_v41  ;;  %v1137_v44 = vsel %vm1135_vm6, %v1130_v41, %v1132_v40  ;;  %v1648_v11 = vmul.f32 %v1633_v53, %v5094_v42  ;;  %v1652_v14 = vmul.f32 %v1633_v53, %v5089_v39 }
 0x193   : > { %v1144_v45 = vmul.f32 %v1136_v43, %v5058_v25  ;;  %v1145_v46 = vmul.f32 %v1137_v44, %v5061_v26  ;;  %v1149_v56 = vmul.f32 %v1137_v44, %v5078_v36  ;;  %v1148_v59 = vmul.f32 %v1136_v43, %v5075_v35 }
 0x194   : > { %v4609_v28 = vpack.i.bf16 %v1652_v14, %v1648_v11  ;;  %v4066_v14 = vld [vmem:[%s5892_s3 + $0x28] sm:$0xff] }
 0x195   : > { %4575 = vrot.lane.b32.xlu1 %v5100_v47, %s4815_s29  ;;  %v1134_v48 = vpop.permute.xlu1 %1133  ;;  %v4579_v49 = vpack.i.bf16 %v1145_v46, %v1144_v45  ;;  %v1637_v60 = vpop.permute.xlu0 %1636 }
 0x196   : > { %v1138_v50 = vsel %vm1135_vm6, %v1132_v40, %v1134_v48  ;;  %vm3594_vm6 = vcmask 1039360  }
 0x197   : > { %4580 = vrot.lane.b32.xlu0 %v4579_v49, %s4816_s30  ;;  %v1150_v54 = vmul.f32 %v1138_v50, %v5072_v34  ;;  %v1146_v57 = vmul.f32 %v1138_v50, %v5070_v33 }
 0x199   : > { %2424 = vrot.lane.b32.xlu1 %v5047_v17, %s4817_s9  ;;  %v1635_v55 = vpop.permute.xlu1 %1634  ;;  %v4594_v62 = vpack.i.bf16 %v1150_v54, %v1149_v56  ;;  %v4589_v2 = vpack.i.bf16 %v1148_v59, %v1146_v57  ;;  %v1907_v19 = vpop.permute.xlu0 %1906 }
 0x19a   : > { %v1641_v63 = vsel %vm1640_vm7, %v1633_v53, %v1635_v55  ;;  %v1642_v1 = vsel %vm1640_vm7, %v1635_v55, %v1637_v60  ;;  %v1922_v48 = vmul.f32 %v1907_v19, %v5094_v42  ;;  %v1926_v49 = vmul.f32 %v1907_v19, %v5089_v39 }
 0x19b   : > { %2422 = vrot.lane.b32.xlu0 %v5035_v12, %s4817_s9  ;;  %v1649_v5 = vmul.f32 %v1641_v63, %v5058_v25  ;;  %v1650_v6 = vmul.f32 %v1642_v1, %v5061_v26  ;;  %v1653_v9 = vmul.f32 %v1641_v63, %v5075_v35  ;;  %v1654_v23 = vmul.f32 %v1642_v1, %v5078_v36 }
 0x19d   : > { %4585 = vrot.lane.b32.xlu1 %v4584_v58, %s4816_s30  ;;  %v1639_v61 = vpop.permute.xlu1 %1638  ;;  %v4599_v10 = vpack.i.bf16 %v1650_v6, %v1649_v5  ;;  %v1911_v24 = vpop.permute.xlu0 %1910  ;;  %v4065_v5 = vld [vmem:[%s5892_s3 + $0x20] sm:$0xff] }
 0x19e   : > { %v1643_v3 = vsel %vm1640_vm7, %v1637_v60, %v1639_v61  ;;  %vm3687_vm7 = vcmask 883712  }
 0x19f   : > { %4595 = vrot.lane.b32.xlu0 %v4594_v62, %s4816_s30  ;;  %v1651_v7 = vmul.f32 %v1643_v3, %v5070_v33  ;;  %v1655_v22 = vmul.f32 %v1643_v3, %v5072_v34 }
 0x1a1   : > { %4590 = vrot.lane.b32.xlu1 %v4589_v2, %s4816_s30  ;;  %v1909_v20 = vpop.permute.xlu1 %1908  ;;  %v4604_v21 = vpack.i.bf16 %v1653_v9, %v1651_v7  ;;  %v4614_v30 = vpack.i.bf16 %v1655_v22, %v1654_v23  ;;  %v4067_v23 = vld [vmem:[%s5892_s3 + $0x30] sm:$0xff] }
 0x1a2   : > { %v1915_v31 = vsel %vm1914_vm8, %v1907_v19, %v1909_v20  ;;  %v1916_v32 = vsel %vm1914_vm8, %v1909_v20, %v1911_v24 }
 0x1a3   : > { %2426 = vrot.lane.b32.xlu0 %v5041_v15, %s4817_s9  ;;  %v1923_v41 = vmul.f32 %v1915_v31, %v5058_v25  ;;  %v1924_v43 = vmul.f32 %v1916_v32, %v5061_v26  ;;  %v1928_v50 = vmul.f32 %v1916_v32, %v5078_v36 }
 0x1a5   : > { %2428 = vrot.lane.b32.xlu1 %v5051_v18, %s4817_s9  ;;  %v1913_v29 = vpop.permute.xlu1 %1912  ;;  %v4619_v46 = vpack.i.bf16 %v1924_v43, %v1923_v41 }
 0x1a6   : > { %v1917_v40 = vsel %vm1914_vm8, %v1911_v24, %v1913_v29  ;;  %vm3964_vm8 = vcmask 818176  }
 0x1a7   : > { %4600 = vrot.lane.b32.xlu0 %v4599_v10, %s4818_s10  ;;  %v1925_v44 = vmul.f32 %v1917_v40, %v5070_v33  ;;  %v1929_v45 = vmul.f32 %v1917_v40, %v5072_v34 }
 0x1a9   : > { %4605 = vrot.lane.b32.xlu1 %v4604_v21, %s4818_s10  ;;  %v4629_v51 = vpack.i.bf16 %v1929_v45, %v1928_v50  ;;  %v4068_v45 = vld [vmem:[%s5892_s3 + $0x38] sm:$0xff] }
 0x1ab   : > { %2696 = vrot.lane.b32.xlu0 %v5024_v4, %s4819_s11  ;;  %v1927_v4 = vmul.f32 %v1915_v31, %v5075_v35 }
 0x1ad   : > { %4610 = vrot.lane.b32.xlu1 %v4609_v28, %s4818_s10 }
 0x1af   : > { %4615 = vrot.lane.b32.xlu0 %v4614_v30, %s4818_s10 }
 0x1b1   : > { %2698 = vrot.lane.b32.xlu1 %v5037_v13, %s4819_s11  ;;  %v4624_v13 = vpack.i.bf16 %v1927_v4, %v1925_v44 }
 0x1b3   : > { %2700 = vrot.lane.b32.xlu0 %v5028_v8, %s4819_s11  ;;  %v4634_v8 = vpack.i.bf16 %v1926_v49, %v1922_v48 }
 0x1b5   : > { %2702 = vrot.lane.b32.xlu1 %v5043_v16, %s4819_s11 }
 0x1b7   : > { %4620 = vrot.lane.b32.xlu0 %v4619_v46, %s4820_s12 }
 0x1b9   : > { %4625 = vrot.lane.b32.xlu1 %v4624_v13, %s4820_s12 }
 0x1bb   : > { %4630 = vrot.lane.b32.xlu0 %v4629_v51, %s4820_s12 }
 0x1bd   : > { %4635 = vrot.lane.b32.xlu1 %v4634_v8, %s4820_s12 }
 0x1bf   : > { %4640 = vrot.lane.b32.xlu0 %v5065_v27, %s4821_s13 }
 0x1c1   : > { %4645 = vrot.lane.b32.xlu1 %v5086_v38, %s4821_s13 }
 0x1c3   : > { %4650 = vrot.lane.b32.xlu0 %v5082_v37, %s4821_s13 }
 0x1c5   : > { %4655 = vrot.lane.b32.xlu1 %v5100_v47, %s4821_s13 }
 0x1c7   : > { %3212 = vrot.lane.b32.xlu0 %v5035_v12, %s4822_s14 }
 0x1c9   : > { %3214 = vrot.lane.b32.xlu1 %v5047_v17, %s4822_s14 }
 0x1cb   : > { %3216 = vrot.lane.b32.xlu0 %v5041_v15, %s4822_s14 }
 0x1cd   : > { %3218 = vrot.lane.b32.xlu1 %v5051_v18, %s4822_s14  ;;  %s4824_s14 = smov 85  }
 0x1fb   : > { %v4561_v16 = vpop.permute.xlu0 %4560 }
 0x1fc   : > { %v4563_v52 = vunpack.i.h.bf16 %v4561_v16  ;;  %v4562_v53 = vunpack.i.l.bf16 %v4561_v16 }
 0x1fe   : > { %v1182_v60 = vsel %vm1180_vm9, %v4562_v53, %v4563_v52 }
 0x203   : > { %v4571_v54 = vpop.permute.xlu0 %4570  ;;  %v4566_v55 = vpop.permute.xlu1 %4565 }
 0x204   : > { %v4573_v56 = vunpack.i.h.bf16 %v4571_v54  ;;  %v4572_v57 = vunpack.i.l.bf16 %v4571_v54  ;;  %v4568_v58 = vunpack.i.h.bf16 %v4566_v55  ;;  %v4567_v59 = vunpack.i.l.bf16 %v4566_v55 }
 0x206   : > { %v1186_v12 = vsel %vm1180_vm9, %v4572_v57, %v4573_v56  ;;  %v1183_v17 = vsel %vm1180_vm9, %v4563_v52, %v4567_v59  ;;  %v4273_v61 = vpack.c.bf16 %v4573_v56, %v4567_v59  ;;  %v1185_v15 = vsel %vm1180_vm9, %v4568_v58, %v4572_v57 }
 0x207   : > { %v4275_v18 = vpack.c.bf16 %v1186_v12, %v1183_v17  ;;  %v4576_v62 = vpop.permute.xlu1 %4575  ;;  %v4269_v63 = vpack.c.bf16 %v1185_v15, %v1182_v60  ;;  %v1151_v17 = vld [vmem:[%s5892_s3] sm:$0xff] }
 0x208   : > { %v4578_v1 = vunpack.i.h.bf16 %v4576_v62  ;;  %v4577_v2 = vunpack.i.l.bf16 %v4576_v62  ;;  %4274 = vmatprep.subr.bf16.mxu1 %v4273_v61 }
 0x209   : > { %v4581_v3 = vpop.permute.xlu0 %4580  ;;  %4270 = vmatprep.subr.bf16.mxu0 %v4269_v63  ;;  %4276 = vmatpush1.bf16.msra.mxu1 %v4275_v18 }
 0x20a   : > { %v1181_v6 = vsel %vm1180_vm9, %v4577_v2, %v4562_v53  ;;  %v1184_v7 = vsel %vm1180_vm9, %v4578_v1, %v4568_v58  ;;  %v4583_v20 = vunpack.i.h.bf16 %v4581_v3  ;;  %v4582_v21 = vunpack.i.l.bf16 %v4581_v3  ;;  %v1152_v3 = vld [vmem:[%s5892_s3 + $0x8] sm:$0xff] }
 0x20b   : > { %v4271_v9 = vpack.c.bf16 %v1184_v7, %v1181_v6  ;;  %v2425_v10 = vpop.permute.xlu1 %2424 }
 0x20c   : > { %4073 = vmatmul.mubr.msk.f32.vlgmr.msra.gmra.mrb[16].mxu1 %vm1195_vm10, %v4065_v5  ;;  %v1412_v46 = vsel %vm1410_vm12, %v4582_v21, %v4583_v20 }
 0x20d   : > { %v2423_v11 = vpop.permute.xlu0 %2422  ;;  %4272 = vmatpush1.bf16.msra.mxu0 %v4271_v9  ;;  %1367 = vmatprep.mubr.f32.mxu1 %v4808_v0 }
 0x20e   : > { %v2431_v24 = vsel %vm2430_vm11, %v2423_v11, %v2425_v10  ;;  %v2438_v62 = vmul.f32 %v2423_v11, %v5094_v42  ;;  %v2442_v63 = vmul.f32 %v2423_v11, %v5089_v39 }
 0x20f   : > { %v4586_v19 = vpop.permute.xlu1 %4585  ;;  %v2439_v43 = vmul.f32 %v2431_v24, %v5058_v25  ;;  %v2443_v51 = vmul.f32 %v2431_v24, %v5075_v35 }
 0x210   : > { %4069 = vmatmul.mubr.msk.f32.vlgmr.msra.gmra.mrb[16].mxu0 %vm1195_vm10, %v4065_v5  ;;  %4074 = vmatmul.mubr.msk.f32.gmra.mrb[18].mxu1 %vm1195_vm10, %v4066_v14  ;;  %v4587_v30 = vunpack.i.l.bf16 %v4586_v19  ;;  %v4588_v32 = vunpack.i.h.bf16 %v4586_v19 }
 0x211   : > { %v4596_v22 = vpop.permute.xlu0 %4595  ;;  %1278 = vmatprep.mubr.f32.mxu0 %v4808_v0  ;;  %1373 = vmatprep.mubr.f32.mxu1 %v4808_v0 }
 0x212   : > { %v4598_v28 = vunpack.i.h.bf16 %v4596_v22  ;;  %v4597_v29 = vunpack.i.l.bf16 %v4596_v22  ;;  %v1411_v8 = vsel %vm1410_vm12, %v4587_v30, %v4582_v21 }
 0x213   : > { %v4591_v31 = vpop.permute.xlu1 %4590 }
 0x214   : > { %v4593_v40 = vunpack.i.h.bf16 %v4591_v31  ;;  %v4592_v41 = vunpack.i.l.bf16 %v4591_v31  ;;  %4070 = vmatmul.mubr.msk.f32.gmra.mrb[18].mxu0 %vm1195_vm10, %v4066_v14  ;;  %4075 = vmatmul.mubr.msk.f32.gmra.mrb[20].mxu1 %vm1195_vm10, %v4067_v23  ;;  %v1416_v44 = vsel %vm1410_vm12, %v4597_v29, %v4598_v28 }
 0x215   : > { %v2427_v4 = vpop.permute.xlu0 %2426  ;;  %1284 = vmatprep.mubr.f32.mxu0 %v4808_v0  ;;  %1379 = vmatprep.mubr.f32.mxu1 %v4808_v0 }
 0x216   : > { %v1413_v48 = vsel %vm1410_vm12, %v4583_v20, %v4592_v41  ;;  %v1414_v49 = vsel %vm1410_vm12, %v4588_v32, %v4593_v40  ;;  %v4281_v50 = vpack.c.bf16 %v4598_v28, %v4592_v41  ;;  %v2432_v13 = vsel %vm2430_vm11, %v2425_v10, %v2427_v4 }
 0x217   : > { %v4283_v16 = vpack.c.bf16 %v1416_v44, %v1413_v48  ;;  %v2440_v52 = vmul.f32 %v2432_v13, %v5061_v26  ;;  %v2429_v53 = vpop.permute.xlu1 %2428  ;;  %v4279_v54 = vpack.c.bf16 %v1414_v49, %v1411_v8  ;;  %v1415_v56 = vsel %vm1410_vm12, %v4593_v40, %v4597_v29  ;;  %v1154_v48 = vld [vmem:[%s5892_s3 + $0x18] sm:$0xff] }
 0x218   : > { %v2433_v55 = vsel %vm2430_vm11, %v2427_v4, %v2429_v53  ;;  %4071 = vmatmul.mubr.msk.f32.gmra.mrb[20].mxu0 %vm1195_vm10, %v4067_v23  ;;  %4076 = vmatmul.mubr.msk.f32.gmra.mrb[22].mxu1 %vm1195_vm10, %v4068_v45  ;;  %v4277_v60 = vpack.c.bf16 %v1415_v56, %v1412_v46  ;;  %v2444_v61 = vmul.f32 %v2432_v13, %v5078_v36  ;;  %v1153_v23 = vld [vmem:[%s5892_s3 + $0x10] sm:$0xff] }
 0x219   : > { %v2441_v57 = vmul.f32 %v2433_v55, %v5070_v33  ;;  %v2445_v58 = vmul.f32 %v2433_v55, %v5072_v34  ;;  %4282 = vmatprep.subr.bf16.mxu1 %v4281_v50  ;;  %v4601_v59 = vpop.permute.xlu0 %4600  ;;  %v4659_v12 = vpack.i.bf16 %v2440_v52, %v2439_v43  ;;  %1290 = vmatprep.mubr.f32.mxu0 %v4808_v0 }
 0x21a   : > { %4284 = vmatpush1.bf16.msra.mxu1 %v4283_v16  ;;  %4278 = vmatprep.subr.bf16.mxu0 %v4277_v60  ;;  %v4603_v5 = vunpack.i.h.bf16 %v4601_v59  ;;  %v4602_v6 = vunpack.i.l.bf16 %v4601_v59  ;;  %v4674_v10 = vpack.i.bf16 %v2442_v63, %v2438_v62 }
 0x21b   : > { %4660 = vrot.lane.b32.xlu0 %v4659_v12, %s4823_s25  ;;  %v4606_v15 = vpop.permute.xlu1 %4605  ;;  %v4664_v18 = vpack.i.bf16 %v2443_v51, %v2441_v57  ;;  %4280 = vmatpush1.bf16.msra.mxu0 %v4279_v54  ;;  %v4669_v2 = vpack.i.bf16 %v2445_v58, %v2444_v61  ;;  %v4085_v57 = vld [vmem:[%s5892_s3 + $0x40] sm:$0xff] }
 0x21c   : > { %1590 = vmatprep.mubr.f32.mxu1 %v4808_v0  ;;  %4072 = vmatmul.mubr.msk.f32.gmra.mrb[22].mxu0 %vm1195_vm10, %v4068_v45  ;;  %v4607_v7 = vunpack.i.l.bf16 %v4606_v15  ;;  %v4608_v20 = vunpack.i.h.bf16 %v4606_v15  ;;  %v1687_v29 = vsel %vm1685_vm13, %v4602_v6, %v4603_v5 }
 0x21d   : > { %4081 = vmatmul.mubr.msk.f32.vlgmr.msra.gmra.mrb[16].mxu1 %vm1195_vm10, %v1151_v17  ;;  %v5196_v1 = vpop.permute.xlu0 %2696  ;;  %4665 = vrot.lane.b32.xlu1 %v4664_v18, %s4823_s25 }
 0x21e   : > { %1501 = vmatprep.mubr.f32.mxu0 %v4808_v0  ;;  %1596 = vmatprep.mubr.f32.mxu1 %v4808_v0  ;;  %v1688_v24 = vsel %vm1685_vm13, %v4603_v5, %v4607_v7  ;;  %v2712_v56 = vmul.f32 %v5196_v1, %v5094_v42  ;;  %v2716_v58 = vmul.f32 %v5196_v1, %v5089_v39 }
 0x21f   : > { %4670 = vrot.lane.b32.xlu0 %v4669_v2, %s4823_s25  ;;  %v4611_v9 = vpop.permute.xlu1 %4610  ;;  %v4086_v2 = vld [vmem:[%s5892_s3 + $0x48] sm:$0xff] }
 0x220   : > { %v4613_v11 = vunpack.i.h.bf16 %v4611_v9  ;;  %v4612_v14 = vunpack.i.l.bf16 %v4611_v9  ;;  %4077 = vmatmul.mubr.msk.f32.vlgmr.msra.gmra.mrb[16].mxu0 %vm1195_vm10, %v1151_v17 }
 0x221   : > { %4082 = vmatmul.mubr.msk.f32.gmra.mrb[18].mxu1 %vm1195_vm10, %v1152_v3  ;;  %v4616_v19 = vpop.permute.xlu0 %4615  ;;  %4675 = vrot.lane.b32.xlu1 %v4674_v10, %s4823_s25 }
 0x222   : > { %v4618_v21 = vunpack.i.h.bf16 %v4616_v19  ;;  %v4617_v22 = vunpack.i.l.bf16 %v4616_v19  ;;  %1507 = vmatprep.mubr.f32.mxu0 %v4808_v0  ;;  %1602 = vmatprep.mubr.f32.mxu1 %v4808_v0  ;;  %v1686_v41 = vsel %vm1685_vm13, %v4612_v14, %v4602_v6  ;;  %v1689_v43 = vsel %vm1685_vm13, %v4613_v11, %v4608_v20 }
 0x223   : > { %v2699_v28 = vpop.permute.xlu1 %2698  ;;  %v4287_v51 = vpack.c.bf16 %v1689_v43, %v1686_v41 }
 0x224   : > { %v1691_v30 = vsel %vm1685_vm13, %v4617_v22, %v4618_v21  ;;  %v4289_v31 = vpack.c.bf16 %v4618_v21, %v4607_v7  ;;  %v2705_v32 = vsel %vm2704_vm14, %v5196_v1, %v2699_v28  ;;  %v1690_v40 = vsel %vm1685_vm13, %v4608_v20, %v4617_v22  ;;  %4078 = vmatmul.mubr.msk.f32.gmra.mrb[18].mxu0 %vm1195_vm10, %v1152_v3 }
 0x225   : > { %v4291_v44 = vpack.c.bf16 %v1691_v30, %v1688_v24  ;;  %4083 = vmatmul.mubr.msk.f32.gmra.mrb[20].mxu1 %vm1195_vm10, %v1153_v23  ;;  %v2701_v4 = vpop.permute.xlu0 %2700  ;;  %1513 = vmatprep.mubr.f32.mxu0 %v4808_v0  ;;  %v4285_v46 = vpack.c.bf16 %v1690_v40, %v1687_v29  ;;  %v2713_v49 = vmul.f32 %v2705_v32, %v5058_v25 }
 0x226   : > { %v2706_v45 = vsel %vm2704_vm14, %v2699_v28, %v2701_v4  ;;  %4290 = vmatprep.subr.bf16.mxu1 %v4289_v31  ;;  %1608 = vmatprep.mubr.f32.mxu1 %v4808_v0  ;;  %v2717_v8 = vmul.f32 %v2705_v32, %v5075_v35  ;;  %v4694_v7 = vpack.i.bf16 %v2716_v58, %v2712_v56  ;;  %v4087_v31 = vld [vmem:[%s5892_s3 + $0x50] sm:$0xff] }
 0x227   : > { %v2714_v50 = vmul.f32 %v2706_v45, %v5061_v26  ;;  %v2703_v13 = vpop.permute.xlu1 %2702  ;;  %4292 = vmatpush1.bf16.msra.mxu1 %v4291_v44  ;;  %4286 = vmatprep.subr.bf16.mxu0 %v4285_v46  ;;  %v2718_v59 = vmul.f32 %v2706_v45, %v5078_v36  ;;  %v4088_v46 = vld [vmem:[%s5892_s3 + $0x58] sm:$0xff] }
 0x228   : > { %v2707_v16 = vsel %vm2704_vm14, %v2701_v4, %v2703_v13  ;;  %4079 = vmatmul.mubr.msk.f32.gmra.mrb[20].mxu0 %vm1195_vm10, %v1153_v23 }
 0x229   : > { %v2715_v52 = vmul.f32 %v2707_v16, %v5070_v33  ;;  %v2719_v53 = vmul.f32 %v2707_v16, %v5072_v34  ;;  %4084 = vmatmul.mubr.msk.f32.gmra.mrb[22].mxu1 %vm1195_vm10, %v1154_v48  ;;  %v4621_v54 = vpop.permute.xlu0 %4620  ;;  %v4679_v55 = vpack.i.bf16 %v2714_v50, %v2713_v49  ;;  %4288 = vmatpush1.bf16.msra.mxu0 %v4287_v51 }
 0x22a   : > { %1519 = vmatprep.mubr.f32.mxu0 %v4808_v0  ;;  %1865 = vmatprep.mubr.f32.mxu1 %v4808_v0  ;;  %v4623_v61 = vunpack.i.h.bf16 %v4621_v54  ;;  %v4622_v62 = vunpack.i.l.bf16 %v4621_v54  ;;  %v4097_v54 = vld [vmem:[%s5892_s3 + $0x60] sm:$0xff] }
 0x22b   : > { %4680 = vrot.lane.b32.xlu0 %v4679_v55, %s4824_s14  ;;  %v4626_v60 = vpop.permute.xlu1 %4625  ;;  %v4684_v12 = vpack.i.bf16 %v2717_v8, %v2715_v52  ;;  %v4689_v18 = vpack.i.bf16 %v2719_v53, %v2718_v59 }
 0x22c   : > { %v4627_v17 = vunpack.i.l.bf16 %v4626_v60  ;;  %4080 = vmatmul.mubr.msk.f32.gmra.mrb[22].mxu0 %vm1195_vm10, %v1154_v48  ;;  %v4628_v3 = vunpack.i.h.bf16 %v4626_v60  ;;  %v1961_v24 = vsel %vm1959_vm15, %v4622_v62, %v4623_v61 }
 0x22d   : > { %4093 = vmatmul.mubr.msk.f32.vlgmr.msra.gmra.mrb[16].mxu1 %vm1195_vm10, %v4085_v57  ;;  %v4631_v15 = vpop.permute.xlu0 %4630  ;;  %4685 = vrot.lane.b32.xlu1 %v4684_v12, %s4824_s14 }
 0x22e   : > { %v4633_v63 = vunpack.i.h.bf16 %v4631_v15  ;;  %v4632_v1 = vunpack.i.l.bf16 %v4631_v15  ;;  %1776 = vmatprep.mubr.f32.mxu0 %v4808_v0  ;;  %v1962_v5 = vsel %vm1959_vm15, %v4623_v61, %v4627_v17  ;;  %1871 = vmatprep.mubr.f32.mxu1 %v4808_v0 }
 0x22f   : > { %4690 = vrot.lane.b32.xlu0 %v4689_v18, %s4824_s14  ;;  %v4636_v6 = vpop.permute.xlu1 %4635 }
 0x230   : > { %v1965_v9 = vsel %vm1959_vm15, %v4632_v1, %v4633_v63  ;;  %v4297_v10 = vpack.c.bf16 %v4633_v63, %v4627_v17  ;;  %v4638_v11 = vunpack.i.h.bf16 %v4636_v6  ;;  %v4637_v14 = vunpack.i.l.bf16 %v4636_v6  ;;  %4089 = vmatmul.mubr.msk.f32.vlgmr.msra.gmra.mrb[16].mxu0 %vm1195_vm10, %v4085_v57  ;;  %v4098_v17 = vld [vmem:[%s5892_s3 + $0x68] sm:$0xff] }
 0x231   : > { %v4299_v19 = vpack.c.bf16 %v1965_v9, %v1962_v5  ;;  %4094 = vmatmul.mubr.msk.f32.gmra.mrb[18].mxu1 %vm1195_vm10, %v4086_v2  ;;  %v4641_v20 = vpop.permute.xlu0 %4640  ;;  %v1964_v21 = vsel %vm1959_vm15, %v4628_v3, %v4632_v1  ;;  %4695 = vrot.lane.b32.xlu1 %v4694_v7, %s4824_s14  ;;  %v3488_v5 = vld [vmem:[%s5893_s4 + $0x10] sm:$0xff]  ;;  %v4110_v6 = vld [vmem:[%s5892_s3 + $0x88] sm:$0xff]  ;;  %v4112_v9 = vld [vmem:[%s5892_s3 + $0x98] sm:$0xff] }
 0x232   : > { %v1960_v22 = vsel %vm1959_vm15, %v4637_v14, %v4622_v62  ;;  %v1963_v23 = vsel %vm1959_vm15, %v4638_v11, %v4628_v3  ;;  %4298 = vmatprep.subr.bf16.mxu1 %v4297_v10  ;;  %1782 = vmatprep.mubr.f32.mxu0 %v4808_v0  ;;  %v4293_v30 = vpack.c.bf16 %v1964_v21, %v1961_v24  ;;  %v4643_v32 = vunpack.i.h.bf16 %v4641_v20  ;;  %v4111_v7 = vld [vmem:[%s5892_s3 + $0x90] sm:$0xff]  ;;  %v3487_v10 = vld [vmem:[%s5893_s4 + $0x8] sm:$0xff]  ;;  %v3489_v11 = vld [vmem:[%s5893_s4 + $0x18] sm:$0xff] }
 0x233   : > { %v4295_v28 = vpack.c.bf16 %v1963_v23, %v1960_v22  ;;  %4700 = vrot.lane.b32.xlu0 %v5065_v27, %s4825_s17  ;;  %v4646_v29 = vpop.permute.xlu1 %4645  ;;  %1877 = vmatprep.mubr.f32.mxu1 %v4808_v0  ;;  %v4642_v41 = vunpack.i.l.bf16 %v4641_v20 }
 0x234   : > { %4300 = vmatpush1.bf16.msra.mxu1 %v4299_v19  ;;  %4294 = vmatprep.subr.bf16.mxu0 %v4293_v30  ;;  %v4647_v43 = vunpack.i.l.bf16 %v4646_v29  ;;  %v4648_v4 = vunpack.i.h.bf16 %v4646_v29 }
 0x235   : > { %4090 = vmatmul.mubr.msk.f32.gmra.mrb[18].mxu0 %vm1195_vm10, %v4086_v2  ;;  %v4651_v40 = vpop.permute.xlu0 %4650  ;;  %4095 = vmatmul.mubr.msk.f32.gmra.mrb[20].mxu1 %vm1195_vm10, %v4087_v31  ;;  %v2203_v8 = vsel %vm2201_vm0, %v4642_v41, %v4643_v32 }
 0x236   : > { %v4653_v27 = vunpack.i.h.bf16 %v4651_v40  ;;  %v4652_v44 = vunpack.i.l.bf16 %v4651_v40  ;;  %4705 = vrot.lane.b32.xlu1 %v5086_v38, %s4825_s17  ;;  %4296 = vmatpush1.bf16.msra.mxu0 %v4295_v28  ;;  %v2204_v51 = vsel %vm2201_vm0, %v4643_v32, %v4647_v43 }
 0x237   : > { %4710 = vrot.lane.b32.xlu0 %v5082_v37, %s4825_s17  ;;  %v4656_v45 = vpop.permute.xlu1 %4655  ;;  %1788 = vmatprep.mubr.f32.mxu0 %v4808_v0 }
 0x238   : > { %v2207_v48 = vsel %vm2201_vm0, %v4652_v44, %v4653_v27  ;;  %v4305_v49 = vpack.c.bf16 %v4653_v27, %v4647_v43  ;;  %1883 = vmatprep.mubr.f32.mxu1 %v4808_v0  ;;  %v4658_v50 = vunpack.i.h.bf16 %v4656_v45  ;;  %v4657_v38 = vunpack.i.l.bf16 %v4656_v45 }
 0x239   : > { %4091 = vmatmul.mubr.msk.f32.gmra.mrb[20].mxu0 %vm1195_vm10, %v4087_v31  ;;  %v3213_v13 = vpop.permute.xlu0 %3212  ;;  %v2206_v37 = vsel %vm2201_vm0, %v4648_v4, %v4652_v44  ;;  %4096 = vmatmul.mubr.msk.f32.gmra.mrb[22].mxu1 %vm1195_vm10, %v4088_v46  ;;  %v4307_v16 = vpack.c.bf16 %v2207_v48, %v2204_v51 }
 0x23a   : > { %4715 = vrot.lane.b32.xlu1 %v5100_v47, %s4825_s17  ;;  %4306 = vmatprep.subr.bf16.mxu1 %v4305_v49  ;;  %v4301_v53 = vpack.c.bf16 %v2206_v37, %v2203_v8  ;;  %v2202_v56 = vsel %vm2201_vm0, %v4657_v38, %v4642_v41  ;;  %v2205_v57 = vsel %vm2201_vm0, %v4658_v50, %v4648_v4  ;;  %v4121_v49 = vld [vmem:[%s5892_s3 + $0xa0] sm:$0xff]  ;;  %v4122_v38 = vld [vmem:[%s5892_s3 + $0xa8] sm:$0xff]  ;;  %v4123_v8 = vld [vmem:[%s5892_s3 + $0xb0] sm:$0xff] }
 0x23b   : > { %v3215_v52 = vpop.permute.xlu1 %3214  ;;  %1794 = vmatprep.mubr.f32.mxu0 %v4808_v0  ;;  %2139 = vmatprep.mubr.f32.mxu1 %v4808_v0  ;;  %v4303_v61 = vpack.c.bf16 %v2205_v57, %v2202_v56  ;;  %v3232_v1 = vmul.f32 %v3213_v13, %v5089_v39  ;;  %v3486_v39 = vld [vmem:[%s5893_s4] sm:$0xff]  ;;  %v4124_v57 = vld [vmem:[%s5892_s3 + $0xb8] sm:$0xff] }
 0x23c   : > { %v3221_v55 = vsel %vm3220_vm1, %v3213_v13, %v3215_v52  ;;  %4302 = vmatprep.subr.bf16.mxu0 %v4301_v53 }
 0x23d   : > { %4092 = vmatmul.mubr.msk.f32.gmra.mrb[22].mxu0 %vm1195_vm10, %v4088_v46  ;;  %v3217_v47 = vpop.permute.xlu0 %3216  ;;  %4105 = vmatmul.mubr.msk.f32.vlgmr.msra.gmra.mrb[16].mxu1 %vm1195_vm10, %v4097_v54  ;;  %v3229_v59 = vmul.f32 %v3221_v55, %v5058_v25  ;;  %v3233_v18 = vmul.f32 %v3221_v55, %v5075_v35 }
 0x23e   : > { %v3222_v58 = vsel %vm3220_vm1, %v3215_v52, %v3217_v47  ;;  %2050 = vmatprep.mubr.f32.mxu0 %v4808_v0  ;;  %4308 = vmatpush1.bf16.msra.mxu1 %v4307_v16 }
 0x23f   : > { %v3230_v60 = vmul.f32 %v3222_v58, %v5061_v26  ;;  %v3219_v12 = vpop.permute.xlu1 %3218  ;;  %2145 = vmatprep.mubr.f32.mxu1 %v4808_v0  ;;  %v3228_v26 = vmul.f32 %v3213_v13, %v5094_v42  ;;  %v3234_v2 = vmul.f32 %v3222_v58, %v5078_v36  ;;  %v4100_v36 = vld [vmem:[%s5892_s3 + $0x78] sm:$0xff]  ;;  %v4109_v42 = vld [vmem:[%s5892_s3 + $0x80] sm:$0xff] }
 0x240   : > { %v3223_v15 = vsel %vm3220_vm1, %v3217_v47, %v3219_v12 }
 0x241   : > { %v3231_v62 = vmul.f32 %v3223_v15, %v5070_v33  ;;  %v3235_v63 = vmul.f32 %v3223_v15, %v5072_v34  ;;  %4101 = vmatmul.mubr.msk.f32.vlgmr.msra.gmra.mrb[16].mxu0 %vm1195_vm10, %v4097_v54  ;;  %v4719_v25 = vpack.i.bf16 %v3230_v60, %v3229_v59  ;;  %4106 = vmatmul.mubr.msk.f32.gmra.mrb[18].mxu1 %vm1195_vm10, %v4098_v17  ;;  %v4099_v33 = vld [vmem:[%s5892_s3 + $0x70] sm:$0xff] }
 0x242   : > { %4304 = vmatpush1.bf16.msra.mxu0 %v4303_v61  ;;  %2056 = vmatprep.mubr.f32.mxu0 %v4808_v0  ;;  %v4734_v35 = vpack.i.bf16 %v3232_v1, %v3228_v26 }
 0x243   : > { %4720 = vrot.lane.b32.xlu0 %v4719_v25, %s4826_s26  ;;  %v4724_v3 = vpack.i.bf16 %v3233_v18, %v3231_v62  ;;  %2151 = vmatprep.mubr.f32.mxu1 %v4808_v0  ;;  %v4729_v34 = vpack.i.bf16 %v3235_v63, %v3234_v2 }
 0x245   : > { %4725 = vrot.lane.b32.xlu1 %v4724_v3, %s4826_s26  ;;  %4102 = vmatmul.mubr.msk.f32.gmra.mrb[18].mxu0 %vm1195_vm10, %v4098_v17 }
 0x246   : > { %4107 = vmatmul.mubr.msk.f32.gmra.mrb[20].mxu1 %vm1195_vm10, %v4099_v33  ;;  %2062 = vmatprep.mubr.f32.mxu0 %v4808_v0 }
 0x247   : > { %4730 = vrot.lane.b32.xlu0 %v4729_v34, %s4826_s26  ;;  %2157 = vmatprep.mubr.f32.mxu1 %v4808_v0  ;;  %v4133_v34 = vld [vmem:[%s5892_s3 + $0xc0] sm:$0xff] }
 0x249   : > { %4735 = vrot.lane.b32.xlu1 %v4734_v35, %s4826_s26  ;;  %4103 = vmatmul.mubr.msk.f32.gmra.mrb[20].mxu0 %vm1195_vm10, %v4099_v33 }
 0x24a   : > { %4108 = vmatmul.mubr.msk.f32.gmra.mrb[22].mxu1 %vm1195_vm10, %v4100_v36  ;;  %2068 = vmatprep.mubr.f32.mxu0 %v4808_v0 }
 0x24b   : > { %3492 = vperm.xlu0 %4558, %v3486_v39   ;;  %2381 = vmatprep.mubr.f32.mxu1 %v4808_v0 }
 0x24d   : > { %4104 = vmatmul.mubr.msk.f32.gmra.mrb[22].mxu0 %vm1195_vm10, %v4100_v36  ;;  %3497 = vperm.xlu1 %4739, %v3487_v10  }
 0x24e   : > { %4117 = vmatmul.mubr.msk.f32.vlgmr.msra.gmra.mrb[16].mxu1 %vm1195_vm10, %v4109_v42  ;;  %2292 = vmatprep.mubr.f32.mxu0 %v4808_v0 }
 0x24f   : > { %3502 = vperm.xlu0 %4558, %v3488_v5   ;;  %2387 = vmatprep.mubr.f32.mxu1 %v4808_v0 }
 0x251   : > { %4113 = vmatmul.mubr.msk.f32.vlgmr.msra.gmra.mrb[16].mxu0 %vm1195_vm10, %v4109_v42  ;;  %3507 = vperm.xlu1 %4739, %v3489_v11   ;;  %v4134_v11 = vld [vmem:[%s5892_s3 + $0xc8] sm:$0xff] }
 0x252   : > { %4118 = vmatmul.mubr.msk.f32.gmra.mrb[18].mxu1 %vm1195_vm10, %v4110_v6  ;;  %2298 = vmatprep.mubr.f32.mxu0 %v4808_v0 }
 0x253   : > { %2393 = vmatprep.mubr.f32.mxu1 %v4808_v0 }
 0x255   : > { %4114 = vmatmul.mubr.msk.f32.gmra.mrb[18].mxu0 %vm1195_vm10, %v4110_v6 }
 0x256   : > { %4119 = vmatmul.mubr.msk.f32.gmra.mrb[20].mxu1 %vm1195_vm10, %v4111_v7  ;;  %2304 = vmatprep.mubr.f32.mxu0 %v4808_v0 }
 0x257   : > { %2399 = vmatprep.mubr.f32.mxu1 %v4808_v0 }
 0x259   : > { %4115 = vmatmul.mubr.msk.f32.gmra.mrb[20].mxu0 %vm1195_vm10, %v4111_v7 }
 0x25a   : > { %4120 = vmatmul.mubr.msk.f32.gmra.mrb[22].mxu1 %vm1195_vm10, %v4112_v9  ;;  %2310 = vmatprep.mubr.f32.mxu0 %v4808_v0 }
 0x25b   : > { %2655 = vmatprep.mubr.f32.mxu1 %v4808_v0 }
 0x25d   : > { %4116 = vmatmul.mubr.msk.f32.gmra.mrb[22].mxu0 %vm1195_vm10, %v4112_v9 }
 0x25e   : > { %2566 = vmatprep.mubr.f32.mxu0 %v4808_v0 }
 0x28d   : > { %v4661_v14 = vpop.permute.xlu0 %4660 }
 0x28e   : > { %v4663_v19 = vunpack.i.h.bf16 %v4661_v14  ;;  %v4662_v20 = vunpack.i.l.bf16 %v4661_v14 }
 0x28f   : > { %v4666_v21 = vpop.permute.xlu1 %4665 }
 0x290   : > { %v4667_v22 = vunpack.i.l.bf16 %v4666_v21  ;;  %v4668_v24 = vunpack.i.h.bf16 %v4666_v21  ;;  %v2477_v30 = vsel %vm2475_vm2, %v4662_v20, %v4663_v19 }
 0x291   : > { %v4671_v23 = vpop.permute.xlu0 %4670 }
 0x292   : > { %v4673_v28 = vunpack.i.h.bf16 %v4671_v23  ;;  %v4672_v29 = vunpack.i.l.bf16 %v4671_v23  ;;  %v2478_v31 = vsel %vm2475_vm2, %v4663_v19, %v4667_v22 }
 0x293   : > { %v4676_v41 = vpop.permute.xlu1 %4675 }
 0x294   : > { %v2481_v32 = vsel %vm2475_vm2, %v4672_v29, %v4673_v28  ;;  %v4313_v40 = vpack.c.bf16 %v4673_v28, %v4667_v22  ;;  %v2480_v43 = vsel %vm2475_vm2, %v4668_v24, %v4672_v29  ;;  %v4678_v44 = vunpack.i.h.bf16 %v4676_v41  ;;  %v4135_v29 = vld [vmem:[%s5892_s3 + $0xd0] sm:$0xff] }
 0x295   : > { %v4315_v27 = vpack.c.bf16 %v2481_v32, %v2478_v31  ;;  %v4677_v4 = vunpack.i.l.bf16 %v4676_v41  ;;  %v4309_v45 = vpack.c.bf16 %v2480_v43, %v2477_v30  ;;  %v4136_v31 = vld [vmem:[%s5892_s3 + $0xd8] sm:$0xff]  ;;  %v4145_v43 = vld [vmem:[%s5892_s3 + $0xe0] sm:$0xff] }
 0x296   : > { %4314 = vmatprep.subr.bf16.mxu1 %v4313_v40  ;;  %v2479_v48 = vsel %vm2475_vm2, %v4678_v44, %v4668_v24 }
 0x297   : > { %v2476_v46 = vsel %vm2475_vm2, %v4677_v4, %v4662_v20  ;;  %4310 = vmatprep.subr.bf16.mxu0 %v4309_v45  ;;  %4316 = vmatpush1.bf16.msra.mxu1 %v4315_v27 }
 0x298   : > { %v4311_v50 = vpack.c.bf16 %v2479_v48, %v2476_v46 }
 0x29a   : > { %4312 = vmatpush1.bf16.msra.mxu0 %v4311_v50  ;;  %4129 = vmatmul.mubr.msk.f32.vlgmr.msra.gmra.mrb[16].mxu1 %vm1195_vm10, %v4121_v49 }
 0x29b   : > { %2661 = vmatprep.mubr.f32.mxu1 %v4808_v0 }
 0x29d   : > { %4125 = vmatmul.mubr.msk.f32.vlgmr.msra.gmra.mrb[16].mxu0 %vm1195_vm10, %v4121_v49  ;;  %v4681_v13 = vpop.permute.xlu0 %4680 }
 0x29e   : > { %4130 = vmatmul.mubr.msk.f32.gmra.mrb[18].mxu1 %vm1195_vm10, %v4122_v38  ;;  %2572 = vmatprep.mubr.f32.mxu0 %v4808_v0  ;;  %v4683_v37 = vunpack.i.h.bf16 %v4681_v13  ;;  %v4682_v51 = vunpack.i.l.bf16 %v4681_v13 }
 0x29f   : > { %2667 = vmatprep.mubr.f32.mxu1 %v4808_v0  ;;  %v4686_v16 = vpop.permute.xlu1 %4685 }
 0x2a0   : > { %v4687_v52 = vunpack.i.l.bf16 %v4686_v16  ;;  %v4688_v54 = vunpack.i.h.bf16 %v4686_v16  ;;  %v2751_v47 = vsel %vm2749_vm3, %v4682_v51, %v4683_v37 }
 0x2a1   : > { %4126 = vmatmul.mubr.msk.f32.gmra.mrb[18].mxu0 %vm1195_vm10, %v4122_v38  ;;  %v4691_v53 = vpop.permute.xlu0 %4690 }
 0x2a2   : > { %v4693_v55 = vunpack.i.h.bf16 %v4691_v53  ;;  %v4692_v56 = vunpack.i.l.bf16 %v4691_v53  ;;  %4131 = vmatmul.mubr.msk.f32.gmra.mrb[20].mxu1 %vm1195_vm10, %v4123_v8  ;;  %2578 = vmatprep.mubr.f32.mxu0 %v4808_v0  ;;  %v2752_v58 = vsel %vm2749_vm3, %v4683_v37, %v4687_v52 }
 0x2a3   : > { %2673 = vmatprep.mubr.f32.mxu1 %v4808_v0  ;;  %v4696_v12 = vpop.permute.xlu1 %4695 }
 0x2a4   : > { %v2755_v59 = vsel %vm2749_vm3, %v4692_v56, %v4693_v55  ;;  %v4321_v60 = vpack.c.bf16 %v4693_v55, %v4687_v52  ;;  %v2754_v17 = vsel %vm2749_vm3, %v4688_v54, %v4692_v56  ;;  %v4698_v15 = vunpack.i.h.bf16 %v4696_v12 }
 0x2a5   : > { %v4323_v61 = vpack.c.bf16 %v2755_v59, %v2752_v58  ;;  %v4697_v18 = vunpack.i.l.bf16 %v4696_v12  ;;  %4127 = vmatmul.mubr.msk.f32.gmra.mrb[20].mxu0 %vm1195_vm10, %v4123_v8  ;;  %v4701_v62 = vpop.permute.xlu0 %4700  ;;  %v4317_v63 = vpack.c.bf16 %v2754_v17, %v2751_v47  ;;  %v4146_v8 = vld [vmem:[%s5892_s3 + $0xe8] sm:$0xff]  ;;  %v4147_v47 = vld [vmem:[%s5892_s3 + $0xf0] sm:$0xff]  ;;  %v4148_v58 = vld [vmem:[%s5892_s3 + $0xf8] sm:$0xff] }
 0x2a6   : > { %4132 = vmatmul.mubr.msk.f32.gmra.mrb[22].mxu1 %vm1195_vm10, %v4124_v57  ;;  %4322 = vmatprep.subr.bf16.mxu1 %v4321_v60  ;;  %v2753_v26 = vsel %vm2749_vm3, %v4698_v15, %v4688_v54  ;;  %v4703_v1 = vunpack.i.h.bf16 %v4701_v62  ;;  %v4702_v2 = vunpack.i.l.bf16 %v4701_v62  ;;  %v4157_v59 = vld [vmem:[%s5892_s3 + $0x100] sm:$0xff]  ;;  %v4158_v60 = vld [vmem:[%s5892_s3 + $0x108] sm:$0xff]  ;;  %v4159_v12 = vld [vmem:[%s5892_s3 + $0x110] sm:$0xff] }
 0x2a7   : > { %v2750_v25 = vsel %vm2749_vm3, %v4697_v18, %v4682_v51  ;;  %2584 = vmatprep.mubr.f32.mxu0 %v4808_v0  ;;  %4318 = vmatprep.subr.bf16.mxu0 %v4317_v63  ;;  %v4160_v17 = vld [vmem:[%s5892_s3 + $0x118] sm:$0xff] }
 0x2a8   : > { %v4319_v3 = vpack.c.bf16 %v2753_v26, %v2750_v25  ;;  %v4706_v33 = vpop.permute.xlu1 %4705  ;;  %4324 = vmatpush1.bf16.msra.mxu1 %v4323_v61  ;;  %2929 = vmatprep.mubr.f32.mxu1 %v4808_v0  ;;  %v2993_v6 = vsel %vm2991_vm4, %v4702_v2, %v4703_v1 }
 0x2a9   : > { %v4707_v35 = vunpack.i.l.bf16 %v4706_v33  ;;  %4128 = vmatmul.mubr.msk.f32.gmra.mrb[22].mxu0 %vm1195_vm10, %v4124_v57  ;;  %v4711_v36 = vpop.permute.xlu0 %4710  ;;  %v4708_v39 = vunpack.i.h.bf16 %v4706_v33 }
 0x2aa   : > { %v4713_v42 = vunpack.i.h.bf16 %v4711_v36  ;;  %v4712_v5 = vunpack.i.l.bf16 %v4711_v36  ;;  %4320 = vmatpush1.bf16.msra.mxu0 %v4319_v3  ;;  %2840 = vmatprep.mubr.f32.mxu0 %v4808_v0 }
 0x2ab   : > { %4141 = vmatmul.mubr.msk.f32.vlgmr.msra.gmra.mrb[16].mxu1 %vm1195_vm10, %v4133_v34  ;;  %v2994_v7 = vsel %vm2991_vm4, %v4703_v1, %v4707_v35 }
 0x2ac   : > { %v2997_v9 = vsel %vm2991_vm4, %v4712_v5, %v4713_v42  ;;  %v4329_v10 = vpack.c.bf16 %v4713_v42, %v4707_v35  ;;  %2935 = vmatprep.mubr.f32.mxu1 %v4808_v0  ;;  %v2996_v14 = vsel %vm2991_vm4, %v4708_v39, %v4712_v5  ;;  %v4716_v20 = vpop.permute.xlu1 %4715 }
 0x2ad   : > { %v4331_v19 = vpack.c.bf16 %v2997_v9, %v2994_v7  ;;  %4137 = vmatmul.mubr.msk.f32.vlgmr.msra.gmra.mrb[16].mxu0 %vm1195_vm10, %v4133_v34  ;;  %v4325_v21 = vpack.c.bf16 %v2996_v14, %v2993_v6  ;;  %v4718_v22 = vunpack.i.h.bf16 %v4716_v20  ;;  %v4717_v23 = vunpack.i.l.bf16 %v4716_v20 }
 0x2ae   : > { %4330 = vmatprep.subr.bf16.mxu1 %v4329_v10  ;;  %2846 = vmatprep.mubr.f32.mxu0 %v4808_v0 }
 0x2af   : > { %4142 = vmatmul.mubr.msk.f32.gmra.mrb[18].mxu1 %vm1195_vm10, %v4134_v11  ;;  %4326 = vmatprep.subr.bf16.mxu0 %v4325_v21  ;;  %v2992_v24 = vsel %vm2991_vm4, %v4717_v23, %v4702_v2  ;;  %v2995_v28 = vsel %vm2991_vm4, %v4718_v22, %v4708_v39 }
 0x2b0   : > { %4332 = vmatpush1.bf16.msra.mxu1 %v4331_v19  ;;  %2941 = vmatprep.mubr.f32.mxu1 %v4808_v0  ;;  %v4327_v30 = vpack.c.bf16 %v2995_v28, %v2992_v24 }
 0x2b1   : > { %4138 = vmatmul.mubr.msk.f32.gmra.mrb[18].mxu0 %vm1195_vm10, %v4134_v11 }
 0x2b2   : > { %2852 = vmatprep.mubr.f32.mxu0 %v4808_v0  ;;  %4328 = vmatpush1.bf16.msra.mxu0 %v4327_v30 }
 0x2b3   : > { %4143 = vmatmul.mubr.msk.f32.gmra.mrb[20].mxu1 %vm1195_vm10, %v4135_v29 }
 0x2b4   : > { %2947 = vmatprep.mubr.f32.mxu1 %v4808_v0 }
 0x2b5   : > { %4139 = vmatmul.mubr.msk.f32.gmra.mrb[20].mxu0 %vm1195_vm10, %v4135_v29  ;;  %v4721_v32 = vpop.permute.xlu0 %4720 }
 0x2b6   : > { %2858 = vmatprep.mubr.f32.mxu0 %v4808_v0  ;;  %v4723_v27 = vunpack.i.h.bf16 %v4721_v32  ;;  %v4722_v44 = vunpack.i.l.bf16 %v4721_v32 }
 0x2b7   : > { %4144 = vmatmul.mubr.msk.f32.gmra.mrb[22].mxu1 %vm1195_vm10, %v4136_v31  ;;  %v4726_v40 = vpop.permute.xlu1 %4725 }
 0x2b8   : > { %v4727_v41 = vunpack.i.l.bf16 %v4726_v40  ;;  %3171 = vmatprep.mubr.f32.mxu1 %v4808_v0  ;;  %v4728_v48 = vunpack.i.h.bf16 %v4726_v40  ;;  %v3267_v52 = vsel %vm3265_vm5, %v4722_v44, %v4723_v27 }
 0x2b9   : > { %4140 = vmatmul.mubr.msk.f32.gmra.mrb[22].mxu0 %vm1195_vm10, %v4136_v31  ;;  %v4731_v4 = vpop.permute.xlu0 %4730 }
 0x2ba   : > { %v4733_v45 = vunpack.i.h.bf16 %v4731_v4  ;;  %v4732_v46 = vunpack.i.l.bf16 %v4731_v4  ;;  %3082 = vmatprep.mubr.f32.mxu0 %v4808_v0  ;;  %v3268_v49 = vsel %vm3265_vm5, %v4723_v27, %v4727_v41 }
 0x2bb   : > { %4153 = vmatmul.mubr.msk.f32.vlgmr.msra.gmra.mrb[16].mxu1 %vm1195_vm10, %v4145_v43  ;;  %v4736_v50 = vpop.permute.xlu1 %4735 }
 0x2bc   : > { %v3271_v38 = vsel %vm3265_vm5, %v4732_v46, %v4733_v45  ;;  %v4337_v13 = vpack.c.bf16 %v4733_v45, %v4727_v41  ;;  %v4738_v37 = vunpack.i.h.bf16 %v4736_v50  ;;  %v4737_v51 = vunpack.i.l.bf16 %v4736_v50  ;;  %3177 = vmatprep.mubr.f32.mxu1 %v4808_v0 }
 0x2bd   : > { %v4339_v16 = vpack.c.bf16 %v3271_v38, %v3268_v49  ;;  %4149 = vmatmul.mubr.msk.f32.vlgmr.msra.gmra.mrb[16].mxu0 %vm1195_vm10, %v4145_v43  ;;  %v3270_v53 = vsel %vm3265_vm5, %v4728_v48, %v4732_v46 }
 0x2be   : > { %v3266_v54 = vsel %vm3265_vm5, %v4737_v51, %v4722_v44  ;;  %v3269_v55 = vsel %vm3265_vm5, %v4738_v37, %v4728_v48  ;;  %4338 = vmatprep.subr.bf16.mxu1 %v4337_v13  ;;  %3088 = vmatprep.mubr.f32.mxu0 %v4808_v0  ;;  %v4333_v56 = vpack.c.bf16 %v3270_v53, %v3267_v52 }
 0x2bf   : > { %v4335_v57 = vpack.c.bf16 %v3269_v55, %v3266_v54  ;;  %4154 = vmatmul.mubr.msk.f32.gmra.mrb[18].mxu1 %vm1195_vm10, %v4146_v8 }
 0x2c0   : > { %4334 = vmatprep.subr.bf16.mxu0 %v4333_v56  ;;  %4340 = vmatpush1.bf16.msra.mxu1 %v4339_v16 }
 0x2c1   : > { %4150 = vmatmul.mubr.msk.f32.gmra.mrb[18].mxu0 %vm1195_vm10, %v4146_v8  ;;  %3183 = vmatprep.mubr.f32.mxu1 %v4808_v0 }
 0x2c2   : > { %4336 = vmatpush1.bf16.msra.mxu0 %v4335_v57  ;;  %3094 = vmatprep.mubr.f32.mxu0 %v4808_v0 }
 0x2c3   : > { %4155 = vmatmul.mubr.msk.f32.gmra.mrb[20].mxu1 %vm1195_vm10, %v4147_v47 }
 0x2c4   : > { %3189 = vmatprep.mubr.f32.mxu1 %v4808_v0 }
 0x2c5   : > { %4151 = vmatmul.mubr.msk.f32.gmra.mrb[20].mxu0 %vm1195_vm10, %v4147_v47 }
 0x2c6   : > { %3100 = vmatprep.mubr.f32.mxu0 %v4808_v0 }
 0x2c7   : > { %4156 = vmatmul.mubr.msk.f32.gmra.mrb[22].mxu1 %vm1195_vm10, %v4148_v58 }
 0x2c8   : > { %3445 = vmatprep.mubr.f32.mxu1 %v4808_v0 }
 0x2c9   : > { %4152 = vmatmul.mubr.msk.f32.gmra.mrb[22].mxu0 %vm1195_vm10, %v4148_v58 }
 0x2ca   : > { %3356 = vmatprep.mubr.f32.mxu0 %v4808_v0  ;;  %v3493_v15 = vpop.permute.xlu0 %3492 }
 0x2cb   : > { %4165 = vmatmul.mubr.msk.f32.vlgmr.msra.gmra.mrb[16].mxu1 %vm1195_vm10, %v4157_v59 }
 0x2cc   : > { %3451 = vmatprep.mubr.f32.mxu1 %v4808_v0  ;;  %v3498_v26 = vpop.permute.xlu1 %3497 }
 0x2cd   : > { %4161 = vmatmul.mubr.msk.f32.vlgmr.msra.gmra.mrb[16].mxu0 %vm1195_vm10, %v4157_v59 }
 0x2ce   : > { %3362 = vmatprep.mubr.f32.mxu0 %v4808_v0  ;;  %v3503_v14 = vpop.permute.xlu0 %3502 }
 0x2cf   : > { %4166 = vmatmul.mubr.msk.f32.gmra.mrb[18].mxu1 %vm1195_vm10, %v4158_v60 }
 0x2d0   : > { %3457 = vmatprep.mubr.f32.mxu1 %v4808_v0  ;;  %v3508_v49 = vpop.permute.xlu1 %3507 }
 0x2d1   : > { %4162 = vmatmul.mubr.msk.f32.gmra.mrb[18].mxu0 %vm1195_vm10, %v4158_v60  ;;  %v3764_v60 = vld [vmem:[%s5896_s7 + $0x100] sm:$0xff] }
 0x2d2   : > { %3368 = vmatprep.mubr.f32.mxu0 %v4808_v0 }
 0x2d3   : > { %4167 = vmatmul.mubr.msk.f32.gmra.mrb[20].mxu1 %vm1195_vm10, %v4159_v12 }
 0x2d4   : > { %3463 = vmatprep.mubr.f32.mxu1 %v4808_v0 }
 0x2d5   : > { %4163 = vmatmul.mubr.msk.f32.gmra.mrb[20].mxu0 %vm1195_vm10, %v4159_v12  ;;  %v3765_v12 = vld [vmem:[%s5896_s7 + $0x108] sm:$0xff] }
 0x2d6   : > { %3374 = vmatprep.mubr.f32.mxu0 %v4808_v0 }
 0x2d7   : > { %4168 = vmatmul.mubr.msk.f32.gmra.mrb[22].mxu1 %vm1195_vm10, %v4160_v17 }
 0x2d9   : > { %4164 = vmatmul.mubr.msk.f32.gmra.mrb[22].mxu0 %vm1195_vm10, %v4160_v17  ;;  %v3766_v17 = vld [vmem:[%s5896_s7 + $0x110] sm:$0xff] }
 0x39e   : > { %v3447_v61 = vpop.f32.mrb[16].mxu1 }
 0x39f   : > { %v3449_v18 = vpop.f32.mrb[17].mxu1  ;;  %v5511_v62 = vadd.f32 %v3493_v15, %v3447_v61 }
 0x3a0   : > { %v3513_v63 = vadd.f32 %v3493_v15, %v3449_v18  ;;  %v3358_v25 = vpop.f32.mrb[16].mxu0  ;;  %v4374_v18 = vpack.c.bf16 %v3765_v12, %v3764_v60  ;;  %v3772_v60 = vld [vmem:[%s5896_s7 + $0x140] sm:$0xff]  ;;  %v3773_v12 = vld [vmem:[%s5896_s7 + $0x148] sm:$0xff] }
 0x3a1   : > { %v3360_v1 = vpop.f32.mrb[17].mxu0  ;;  %v3528_v35 = vmax.f32 %v5511_v62, 0.0  ;;  %v5518_v36 = vadd.f32 %v3493_v15, %v3358_v25  ;;  %v3748_v25 = vld [vmem:[%s5896_s7 + $0x80] sm:$0xff] }
 0x3a2   : > { %v3529_v2 = vmax.f32 %v3513_v63, 0.0  ;;  %v5513_v3 = vadd.f32 %v3493_v15, %v3360_v1  ;;  %v3453_v33 = vpop.f32.mrb[18].mxu1  ;;  %v4828_v15 = vmov 0.0|0.0   ;;  %v3767_v63 = vld [vmem:[%s5896_s7 + $0x118] sm:$0xff] }
 0x3a3   : > { %v5515_v34 = vadd.f32 %v3498_v26, %v3453_v33  ;;  %v3455_v0 = vpop.f32.mrb[19].mxu1  ;;  %v3526_v23 = vmax.f32 %v5518_v36, 0.0  ;;  %4373 = vmatprep.subr.bf16.mxu1 %v4828_v15  ;;  %v3733_v33 = vld [vmem:[%s5896_s7 + $0x8] sm:$0xff] }
 0x3a4   : > { %v3527_v39 = vmax.f32 %v5513_v3, 0.0  ;;  %v3364_v42 = vpop.f32.mrb[18].mxu0  ;;  %v5522_v5 = vsel %vm1195_vm10, %v3529_v2, 0.0  ;;  %v3517_v20 = vadd.f32 %v3498_v26, %v3455_v0  ;;  %v3732_v2 = vld [vmem:[%s5896_s7] sm:$0xff]  ;;  %4375 = vmatpush1.bf16.msra.mxu1 %v4374_v18  ;;  %v4377_v0 = vpack.c.bf16 %v3767_v63, %v3766_v17  ;;  %v3774_v63 = vld [vmem:[%s5896_s7 + $0x150] sm:$0xff] }
 0x3a5   : > { %v5524_v6 = vadd.f32 %v3498_v26, %v3364_v42  ;;  %v3366_v7 = vpop.f32.mrb[19].mxu0  ;;  %3568 = vrot.lane.b32.xlu1 %v5522_v5, %s4827_s19  ;;  %v3532_v19 = vmax.f32 %v5515_v34, 0.0  ;;  %v4343_v42 = vpack.c.bf16 %v3733_v33, %v3732_v2  ;;  %4376 = vmatprep.subr.bf16.mxu1 %v4828_v15  ;;  %v4386_v18 = vpack.c.bf16 %v3773_v12, %v3772_v60  ;;  %v3757_v2 = vld [vmem:[%s5896_s7 + $0xc8] sm:$0xff]  ;;  %v3740_v33 = vld [vmem:[%s5896_s7 + $0x40] sm:$0xff]  ;;  %v3762_v60 = vld [vmem:[%s5896_s7 + $0xf0] sm:$0xff] }
 0x3a6   : > { %v4740_v9 = vpack.i.bf16 %v3528_v35, %v3527_v39  ;;  %v5532_v10 = vadd.f32 %v3498_v26, %v3366_v7  ;;  %v3459_v11 = vpop.f32.mrb[20].mxu1  ;;  %v3533_v43 = vmax.f32 %v3517_v20, 0.0  ;;  %v3749_v26 = vld [vmem:[%s5896_s7 + $0x88] sm:$0xff]  ;;  %v3768_v7 = vld [vmem:[%s5896_s7 + $0x120] sm:$0xff]  ;;  %v3734_v20 = vld [vmem:[%s5896_s7 + $0x10] sm:$0xff] }
 0x3a7   : > { %v3530_v21 = vmax.f32 %v5524_v6, 0.0  ;;  %v3461_v22 = vpop.f32.mrb[21].mxu1  ;;  %v5538_v28 = vadd.f32 %v3503_v14, %v3459_v11  ;;  %v4341_v1 = vpack.c.bf16 %v3749_v26, %v3748_v25  ;;  %v3750_v11 = vld [vmem:[%s5896_s7 + $0x90] sm:$0xff]  ;;  %v3775_v25 = vld [vmem:[%s5896_s7 + $0x158] sm:$0xff] }
 0x3a8   : > { %v3531_v24 = vmax.f32 %v5532_v10, 0.0  ;;  %v3370_v29 = vpop.f32.mrb[20].mxu0  ;;  %4741 = vrot.lane.b32.xlu0 %v4740_v9, %s4827_s19  ;;  %v3521_v27 = vadd.f32 %v3503_v14, %v3461_v22  ;;  %v5566_v16 = vsel %vm1195_vm10, %v3533_v43, 0.0  ;;  %v3769_v9 = vld [vmem:[%s5896_s7 + $0x128] sm:$0xff]  ;;  %v3735_v22 = vld [vmem:[%s5896_s7 + $0x18] sm:$0xff]  ;;  %4378 = vmatpush1.bf16.msra.mxu1 %v4377_v0  ;;  %v4389_v26 = vpack.c.bf16 %v3775_v25, %v3774_v63 }
 0x3a9   : > { %v4745_v30 = vpack.i.bf16 %v3530_v21, %v3532_v19  ;;  %v3372_v31 = vpop.f32.mrb[21].mxu0  ;;  %v3536_v4 = vmax.f32 %v5538_v28, 0.0  ;;  %v5553_v45 = vadd.f32 %v3503_v14, %v3370_v29  ;;  %4342 = vmatprep.subr.bf16.mxu0 %v4341_v1  ;;  %v3737_v43 = vld [vmem:[%s5896_s7 + $0x28] sm:$0xff]  ;;  %4379 = vmatprep.subr.bf16.mxu1 %v4828_v15  ;;  %v3756_v1 = vld [vmem:[%s5896_s7 + $0xc0] sm:$0xff]  ;;  %v3763_v12 = vld [vmem:[%s5896_s7 + $0xf8] sm:$0xff] }
 0x3aa   : > { %v4750_v32 = vpack.i.bf16 %v3531_v24, %v3526_v23  ;;  %v5549_v40 = vadd.f32 %v3503_v14, %v3372_v31  ;;  %v3465_v41 = vpop.f32.mrb[22].mxu1  ;;  %v3537_v51 = vmax.f32 %v3521_v27, 0.0  ;;  %v3751_v14 = vld [vmem:[%s5896_s7 + $0x98] sm:$0xff]  ;;  %4344 = vmatpush3.bf16.msra.mxu0 %v4343_v42  ;;  %v3752_v31 = vld [vmem:[%s5896_s7 + $0xa0] sm:$0xff]  ;;  %v4380_v27 = vpack.c.bf16 %v3769_v9, %v3768_v7  ;;  %v3741_v42 = vld [vmem:[%s5896_s7 + $0x48] sm:$0xff] }
 0x3ab   : > { %4746 = vrot.lane.b32.xlu1 %v4745_v30, %s4827_s19  ;;  %v3467_v44 = vpop.f32.mrb[23].mxu1  ;;  %v3534_v52 = vmax.f32 %v5553_v45, 0.0  ;;  %v5569_v53 = vadd.f32 %v3508_v49, %v3465_v41  ;;  %v4345_v29 = vpack.c.bf16 %v3751_v14, %v3750_v11  ;;  %v4347_v30 = vpack.c.bf16 %v3735_v22, %v3734_v20  ;;  %v3736_v41 = vld [vmem:[%s5896_s7 + $0x20] sm:$0xff]  ;;  %v3777_v9 = vld [vmem:[%s5896_s7 + $0x168] sm:$0xff]  ;;  %v3758_v20 = vld [vmem:[%s5896_s7 + $0xd0] sm:$0xff] }
 0x3ac   : > { %v3535_v46 = vmax.f32 %v5549_v40, 0.0  ;;  %v3376_v48 = vpop.f32.mrb[22].mxu0  ;;  %4751 = vrot.lane.b32.xlu0 %v4750_v32, %s4827_s19  ;;  %v3525_v8 = vadd.f32 %v3508_v49, %v3467_v44  ;;  %v5581_v47 = vsel %vm1195_vm10, %v3537_v51, 0.0  ;;  %v3753_v32 = vld [vmem:[%s5896_s7 + $0xa8] sm:$0xff]  ;;  %v4351_v51 = vpack.c.bf16 %v3737_v43, %v3736_v41  ;;  %4381 = vmatpush1.bf16.msra.mxu1 %v4380_v27  ;;  %v3776_v7 = vld [vmem:[%s5896_s7 + $0x160] sm:$0xff]  ;;  %v3759_v22 = vld [vmem:[%s5896_s7 + $0xd8] sm:$0xff] }
 0x3ad   : > { %v3378_v50 = vpop.f32.mrb[23].mxu0  ;;  %v5561_v13 = vadd.f32 %v3508_v49, %v3376_v48  ;;  %v3540_v58 = vmax.f32 %v5569_v53, 0.0  ;;  %4346 = vmatprep.subr.bf16.mxu0 %v4345_v29  ;;  %v4349_v44 = vpack.c.bf16 %v3753_v32, %v3752_v31  ;;  %v3754_v48 = vld [vmem:[%s5896_s7 + $0xb0] sm:$0xff]  ;;  %4382 = vmatprep.subr.bf16.mxu1 %v4828_v15  ;;  %v4357_v0 = vpack.c.bf16 %v3757_v2, %v3756_v1  ;;  %v3743_v31 = vld [vmem:[%s5896_s7 + $0x58] sm:$0xff] }
 0x3ae   : > { %v4755_v38 = vpack.i.bf16 %v3536_v4, %v3535_v46  ;;  %v5563_v37 = vadd.f32 %v3508_v49, %v3378_v50  ;;  %v3541_v57 = vmax.f32 %v3525_v8, 0.0  ;;  %v3770_v49 = vld [vmem:[%s5896_s7 + $0x130] sm:$0xff]  ;;  %v3771_v50 = vld [vmem:[%s5896_s7 + $0x138] sm:$0xff]  ;;  %4348 = vmatpush3.bf16.msra.mxu0 %v4347_v30  ;;  %v4359_v11 = vpack.c.bf16 %v3741_v42, %v3740_v33 }
 0x3af   : > { %v3538_v55 = vmax.f32 %v5561_v13, 0.0  ;;  %4350 = vmatprep.subr.bf16.mxu0 %v4349_v44  ;;  %v4392_v14 = vpack.c.bf16 %v3777_v9, %v3776_v7  ;;  %v3742_v29 = vld [vmem:[%s5896_s7 + $0x50] sm:$0xff]  ;;  %v4361_v30 = vpack.c.bf16 %v3759_v22, %v3758_v20  ;;  %v3779_v41 = vld [vmem:[%s5896_s7 + $0x178] sm:$0xff]  ;;  %v3760_v44 = vld [vmem:[%s5896_s7 + $0xe0] sm:$0xff] }
 0x3b0   : > { %v3539_v54 = vmax.f32 %v5563_v37, 0.0  ;;  %3576 = vrot.lane.b32.xlu0 %v5566_v16, %s4827_s19  ;;  %4756 = vrot.lane.b32.xlu1 %v4755_v38, %s4827_s19  ;;  %v5601_v61 = vsel %vm1195_vm10, %v3541_v57, 0.0  ;;  %v3755_v38 = vld [vmem:[%s5896_s7 + $0xb8] sm:$0xff]  ;;  %v3778_v32 = vld [vmem:[%s5896_s7 + $0x170] sm:$0xff]  ;;  %v4363_v43 = vpack.c.bf16 %v3743_v31, %v3742_v29 }
 0x3b1   : > { %v4760_v59 = vpack.i.bf16 %v3538_v55, %v3540_v58  ;;  %v4353_v8 = vpack.c.bf16 %v3755_v38, %v3754_v48  ;;  %v3739_v57 = vld [vmem:[%s5896_s7 + $0x38] sm:$0xff]  ;;  %v4395_v27 = vpack.c.bf16 %v3779_v41, %v3778_v32  ;;  %v3761_v48 = vld [vmem:[%s5896_s7 + $0xe8] sm:$0xff] }
 0x3b2   : > { %v4765_v56 = vpack.i.bf16 %v3539_v54, %v3534_v52  ;;  %4352 = vmatpush3.bf16.msra.mxu0 %v4351_v51  ;;  %v3745_v38 = vld [vmem:[%s5896_s7 + $0x68] sm:$0xff]  ;;  %v3780_v51 = vld [vmem:[%s5896_s7 + $0x180] sm:$0xff]  ;;  %v3747_v63 = vld [vmem:[%s5896_s7 + $0x78] sm:$0xff] }
 0x3b3   : > { %4354 = vmatprep.subr.bf16.mxu0 %v4353_v8 }
 0x3b4   : > { %4766 = vrot.lane.b32.xlu1 %v4765_v56, %s4827_s19  ;;  %3584 = vrot.lane.b32.xlu0 %v5581_v47, %s4827_s19  ;;  %v3738_v56 = vld [vmem:[%s5896_s7 + $0x30] sm:$0xff] }
 0x3b5   : > { %v4355_v17 = vpack.c.bf16 %v3739_v57, %v3738_v56  ;;  %v3781_v57 = vld [vmem:[%s5896_s7 + $0x188] sm:$0xff] }
 0x3b7   : > { %4356 = vmatpush3.bf16.msra.mxu0 %v4355_v17 }
 0x3b8   : > { %4761 = vrot.lane.b32.xlu0 %v4760_v59, %s4827_s19  ;;  %3592 = vrot.lane.b32.xlu1 %v5601_v61, %s4827_s19  ;;  %v4383_v59 = vpack.c.bf16 %v3771_v50, %v3770_v49  ;;  %v4365_v49 = vpack.c.bf16 %v3761_v48, %v3760_v44  ;;  %v3744_v50 = vld [vmem:[%s5896_s7 + $0x60] sm:$0xff] }
 0x3b9   : > { %4358 = vmatprep.subr.bf16.mxu0 %v4357_v0  ;;  %v4367_v56 = vpack.c.bf16 %v3745_v38, %v3744_v50 }
 0x3ba   : > { %4384 = vmatpush1.bf16.msra.mxu1 %v4383_v59  ;;  %v4398_v59 = vpack.c.bf16 %v3781_v57, %v3780_v51 }
 0x3bb   : > { %4385 = vmatprep.subr.bf16.mxu1 %v4828_v15  ;;  %4360 = vmatpush3.bf16.msra.mxu0 %v4359_v11 }
 0x3bc   : > { %4362 = vmatprep.subr.bf16.mxu0 %v4361_v30 }
 0x3be   : > { %4387 = vmatpush1.bf16.msra.mxu1 %v4386_v18  ;;  %v3746_v18 = vld [vmem:[%s5896_s7 + $0x70] sm:$0xff] }
 0x3bf   : > { %4388 = vmatprep.subr.bf16.mxu1 %v4828_v15  ;;  %4364 = vmatpush3.bf16.msra.mxu0 %v4363_v43  ;;  %v4371_v1 = vpack.c.bf16 %v3747_v63, %v3746_v18 }
 0x3c0   : > { %4366 = vmatprep.subr.bf16.mxu0 %v4365_v49 }
 0x3c2   : > { %4390 = vmatpush1.bf16.msra.mxu1 %v4389_v26 }
 0x3c3   : > { %4391 = vmatprep.subr.bf16.mxu1 %v4828_v15  ;;  %4368 = vmatpush3.bf16.msra.mxu0 %v4367_v56 }
 0x3c6   : > { %4393 = vmatpush1.bf16.msra.mxu1 %v4392_v14 }
 0x3c7   : > { %4394 = vmatprep.subr.bf16.mxu1 %v4828_v15 }
 0x3ca   : > { %4396 = vmatpush1.bf16.msra.mxu1 %v4395_v27 }
 0x3cb   : > { %4397 = vmatprep.subr.bf16.mxu1 %v4828_v15 }
 0x3ce   : > { %4399 = vmatpush1.bf16.msra.mxu1 %v4398_v59 }
 0x417   : > { %v3569_v8 = vpop.permute.xlu1 %3568 }
 0x418   : > { %v5745_v15 = vmax.f32 %v5522_v5, %v3569_v8  ;;  %v4369_v5 = vpack.c.bf16 %v3763_v12, %v3762_v60 }
 0x41a   : > { %v4742_v17 = vpop.permute.xlu0 %4741  ;;  %3661 = vrot.lane.b32.xlu0 %v5745_v15, %s4829_s16  ;;  %4370 = vmatprep.subr.bf16.mxu0 %v4369_v5 }
 0x41b   : > { %v4744_v25 = vunpack.i.h.bf16 %v4742_v17  ;;  %v4743_v26 = vunpack.i.l.bf16 %v4742_v17  ;;  %4372 = vmatpush3.bf16.msra.mxu0 %v4371_v1 }
 0x41d   : > { %v3596_v2 = vsel %vm3594_vm6, %v4743_v26, %v4744_v25  ;;  %v3597_v33 = vsel %vm3594_vm6, %v4744_v25, %v3569_v8  ;;  %v4747_v0 = vpop.permute.xlu1 %4746 }
 0x41e   : > { %v4749_v42 = vunpack.i.h.bf16 %v4747_v0  ;;  %v4748_v7 = vunpack.i.l.bf16 %v4747_v0  ;;  %v4752_v9 = vpop.permute.xlu0 %4751  ;;  %v5765_v11 = vmax.f32 %v3527_v39, %v3596_v2  ;;  %v5769_v14 = vmax.f32 %v3528_v35, %v3597_v33 }
 0x41f   : > { %v4754_v20 = vunpack.i.h.bf16 %v4752_v9  ;;  %v4753_v22 = vunpack.i.l.bf16 %v4752_v9 }
 0x420   : > { %v4770_v29 = vpack.i.bf16 %v5769_v14, %v5765_v11 }
 0x421   : > { %v3595_v30 = vsel %vm3594_vm6, %v4753_v22, %v4743_v26  ;;  %v3599_v31 = vsel %vm3594_vm6, %v4754_v20, %v4748_v7  ;;  %v3598_v32 = vsel %vm3594_vm6, %v4749_v42, %v4754_v20 }
 0x422   : > { %v3577_v41 = vpop.permute.xlu0 %3576  ;;  %v4757_v43 = vpop.permute.xlu1 %4756  ;;  %4771 = vrot.lane.b32.xlu0 %v4770_v29, %s4829_s16  ;;  %v5779_v62 = vmax.f32 %v3526_v23, %v3595_v30  ;;  %v5783_v3 = vmax.f32 %v3531_v24, %v3599_v31  ;;  %v5797_v10 = vmax.f32 %v3530_v21, %v3598_v32 }
 0x423   : > { %v3600_v35 = vsel %vm3594_vm6, %v4748_v7, %v3577_v41  ;;  %v3630_v39 = vmax.f32 %v5566_v16, %v3577_v41  ;;  %v4759_v27 = vunpack.i.h.bf16 %v4757_v43  ;;  %v4758_v44 = vunpack.i.l.bf16 %v4757_v43 }
 0x424   : > { %v5789_v48 = vmax.f32 %v3532_v19, %v3600_v35  ;;  %v4775_v49 = vpack.i.bf16 %v5783_v3, %v5779_v62 }
 0x425   : > { %v3602_v24 = vsel %vm3594_vm6, %v4758_v44, %v4759_v27 }
 0x426   : > { %v4767_v36 = vpop.permute.xlu1 %4766  ;;  %v3585_v23 = vpop.permute.xlu0 %3584  ;;  %3669 = vrot.lane.b32.xlu0 %v3630_v39, %s4829_s16  ;;  %4776 = vrot.lane.b32.xlu1 %v4775_v49, %s4829_s16  ;;  %v4780_v50 = vpack.i.bf16 %v5797_v10, %v5789_v48  ;;  %v5810_v6 = vmax.f32 %v3535_v46, %v3602_v24 }
 0x427   : > { %v4768_v16 = vunpack.i.l.bf16 %v4767_v36  ;;  %v3603_v34 = vsel %vm3594_vm6, %v4759_v27, %v3585_v23  ;;  %v4769_v21 = vunpack.i.h.bf16 %v4767_v36  ;;  %v3634_v12 = vmax.f32 %v5581_v47, %v3585_v23 }
 0x428   : > { %v5803_v19 = vmax.f32 %v3536_v4, %v3603_v34 }
 0x429   : > { %v3601_v51 = vsel %vm3594_vm6, %v4768_v16, %v4758_v44 }
 0x42a   : > { %v4762_v38 = vpop.permute.xlu0 %4761  ;;  %4781 = vrot.lane.b32.xlu1 %v4780_v50, %s4829_s16  ;;  %v3593_v57 = vpop.permute.xlu1 %3592  ;;  %v4785_v28 = vpack.i.bf16 %v5803_v19, %v5810_v6  ;;  %v5821_v40 = vmax.f32 %v3534_v52, %v3601_v51 }
 0x42b   : > { %v4764_v8 = vunpack.i.h.bf16 %v4762_v38  ;;  %v4763_v56 = vunpack.i.l.bf16 %v4762_v38  ;;  %v5841_v45 = vmax.f32 %v5601_v61, %v3593_v57 }
 0x42d   : > { %v3604_v4 = vsel %vm3594_vm6, %v4764_v8, %v4769_v21  ;;  %v3605_v59 = vsel %vm3594_vm6, %v4769_v21, %v4763_v56  ;;  %v3606_v60 = vsel %vm3594_vm6, %v4763_v56, %v3593_v57 }
 0x42e   : > { %4786 = vrot.lane.b32.xlu1 %v4785_v28, %s4829_s16  ;;  %v5825_v46 = vmax.f32 %v3539_v54, %v3605_v59  ;;  %v5830_v17 = vmax.f32 %v3540_v58, %v3606_v60  ;;  %v5836_v18 = vmax.f32 %v3538_v55, %v3604_v4 }
 0x430   : > { %v4790_v5 = vpack.i.bf16 %v5825_v46, %v5821_v40  ;;  %v4795_v37 = vpack.i.bf16 %v5836_v18, %v5830_v17 }
 0x432   : > { %4791 = vrot.lane.b32.xlu0 %v4790_v5, %s4829_s16  ;;  %3677 = vrot.lane.b32.xlu1 %v3634_v12, %s4829_s16 }
 0x436   : > { %3685 = vrot.lane.b32.xlu1 %v5841_v45, %s4829_s16  ;;  %4796 = vrot.lane.b32.xlu0 %v4795_v37, %s4829_s16 }
 0x48c   : > { %v3662_v52 = vpop.permute.xlu0 %3661 }
 0x48d   : > { %v3719_v13 = vmax.f32 %v5745_v15, %v3662_v52 }
 0x48f   : > { %4169 = vmatprep.mubr.msk.f32.mxu1 %vm1195_vm10, %v3719_v13 }
 0x494   : > { %v4772_v53 = vpop.permute.xlu0 %4771 }
 0x495   : > { %v4774_v54 = vunpack.i.h.bf16 %v4772_v53  ;;  %v4773_v55 = vunpack.i.l.bf16 %v4772_v53 }
 0x497   : > { %v3690_v47 = vsel %vm3687_vm7, %v4774_v54, %v3662_v52  ;;  %v3689_v58 = vsel %vm3687_vm7, %v4773_v55, %v4774_v54 }
 0x498   : > { %v3718_v61 = vmax.f32 %v5769_v14, %v3690_v47  ;;  %v3670_v63 = vpop.permute.xlu0 %3669  ;;  %v4777_v25 = vpop.permute.xlu1 %4776  ;;  %v3717_v26 = vmax.f32 %v5765_v11, %v3689_v58 }
 0x499   : > { %v3723_v1 = vmax.f32 %v3630_v39, %v3670_v63  ;;  %v4778_v2 = vunpack.i.l.bf16 %v4777_v25  ;;  %v4779_v42 = vunpack.i.h.bf16 %v4777_v25 }
 0x49a   : > { %3858 = vmatprep.mubr.f32.mxu0 %v3717_v26  ;;  %3944 = vmatmul.mubr.f32.vlgmr.msra.gmra.mrb[24].mxu1 %v3718_v61 }
 0x49b   : > { %v3688_v15 = vsel %vm3687_vm7, %v4778_v2, %v4773_v55  ;;  %4170 = vmatprep.mubr.msk.f32.mxu1 %vm1195_vm10, %v3723_v1 }
 0x49c   : > { %v3716_v33 = vmax.f32 %v5779_v62, %v3688_v15  ;;  %v4782_v0 = vpop.permute.xlu1 %4781 }
 0x49d   : > { %v4784_v7 = vunpack.i.h.bf16 %v4782_v0  ;;  %v4783_v9 = vunpack.i.l.bf16 %v4782_v0 }
 0x49e   : > { %3859 = vmatmul.mubr.f32.vlgmr.msra.gmra.mrb[24].mxu0 %v3716_v33 }
 0x49f   : > { %v3692_v14 = vsel %vm3687_vm7, %v4779_v42, %v4783_v9  ;;  %v3693_v20 = vsel %vm3687_vm7, %v4783_v9, %v3670_v63  ;;  %v3691_v11 = vsel %vm3687_vm7, %v4784_v7, %v4779_v42 }
 0x4a0   : > { %v4787_v22 = vpop.permute.xlu1 %4786  ;;  %v3721_v29 = vmax.f32 %v5783_v3, %v3692_v14  ;;  %v3722_v30 = vmax.f32 %v5789_v48, %v3693_v20  ;;  %v3720_v31 = vmax.f32 %v5797_v10, %v3691_v11 }
 0x4a1   : > { %v4789_v32 = vunpack.i.h.bf16 %v4787_v22  ;;  %v4788_v41 = vunpack.i.l.bf16 %v4787_v22 }
 0x4a2   : > { %3863 = vmatprep.mubr.f32.mxu0 %v3721_v29  ;;  %3949 = vmatmul.mubr.f32.gmra.mrb[26].mxu1 %v3722_v30 }
 0x4a3   : > { %3864 = vmatmul.mubr.f32.gmra.mrb[26].mxu0 %v3720_v31  ;;  %v3695_v43 = vsel %vm3687_vm7, %v4788_v41, %v4789_v32 }
 0x4a4   : > { %v4792_v62 = vpop.permute.xlu0 %4791  ;;  %v3678_v35 = vpop.permute.xlu1 %3677  ;;  %v3725_v39 = vmax.f32 %v5810_v6, %v3695_v43 }
 0x4a5   : > { %v4793_v27 = vunpack.i.l.bf16 %v4792_v62  ;;  %v3696_v44 = vsel %vm3687_vm7, %v4789_v32, %v3678_v35  ;;  %v3727_v49 = vmax.f32 %v3634_v12, %v3678_v35  ;;  %v4794_v24 = vunpack.i.h.bf16 %v4792_v62 }
 0x4a6   : > { %v3726_v3 = vmax.f32 %v5803_v19, %v3696_v44  ;;  %3868 = vmatprep.mubr.f32.mxu0 %v3725_v39 }
 0x4a7   : > { %4171 = vmatprep.mubr.msk.f32.mxu1 %vm1195_vm10, %v3727_v49  ;;  %v3694_v48 = vsel %vm3687_vm7, %v4793_v27, %v4788_v41 }
 0x4a8   : > { %v4797_v36 = vpop.permute.xlu0 %4796  ;;  %v3686_v23 = vpop.permute.xlu1 %3685  ;;  %3954 = vmatmul.mubr.f32.gmra.mrb[28].mxu1 %v3726_v3  ;;  %v3724_v10 = vmax.f32 %v5821_v40, %v3694_v48 }
 0x4a9   : > { %v4799_v16 = vunpack.i.h.bf16 %v4797_v36  ;;  %v4798_v34 = vunpack.i.l.bf16 %v4797_v36  ;;  %v3731_v50 = vmax.f32 %v5841_v45, %v3686_v23 }
 0x4aa   : > { %3869 = vmatmul.mubr.f32.gmra.mrb[28].mxu0 %v3724_v10 }
 0x4ab   : > { %v3699_v38 = vsel %vm3687_vm7, %v4798_v34, %v3686_v23  ;;  %4172 = vmatprep.mubr.msk.f32.mxu1 %vm1195_vm10, %v3731_v50  ;;  %v3698_v19 = vsel %vm3687_vm7, %v4794_v24, %v4798_v34  ;;  %v3697_v6 = vsel %vm3687_vm7, %v4799_v16, %v4794_v24 }
 0x4ac   : > { %v3730_v21 = vmax.f32 %v5830_v17, %v3699_v38  ;;  %v3729_v51 = vmax.f32 %v5825_v46, %v3698_v19  ;;  %v3728_v8 = vmax.f32 %v5836_v18, %v3697_v6 }
 0x4ae   : > { %3873 = vmatprep.mubr.f32.mxu0 %v3729_v51  ;;  %3959 = vmatmul.mubr.f32.gmra.mrb[30].mxu1 %v3730_v21 }
 0x4af   : > { %3874 = vmatmul.mubr.f32.gmra.mrb[30].mxu0 %v3728_v8 }
 0x56d   : > { %v3945_v56 = vpop.f32.mrb[24].mxu1 }
 0x56e   : > { %v3947_v57 = vpop.f32.mrb[25].mxu1 }
 0x571   : > { %v4209_v28 = vpop.f32.mrb[24].mxu0 }
 0x572   : > { %v4210_v4 = vpop.f32.mrb[25].mxu0 }
 0x573   : > { %v4211_v59 = vadd.f32 %v4210_v4, %v4209_v28 }
 0x575   : > { %v3946_v60 = vadd.f32 %v4211_v59, %v3945_v56  ;;  %v3950_v40 = vpop.f32.mrb[26].mxu1 }
 0x576   : > { %v4212_v12 = vpop.f32.mrb[26].mxu0  ;;  %v3952_v46 = vpop.f32.mrb[27].mxu1 }
 0x577   : > { %3965 = vst.msk [vmem:[%s305_s24] sm:$0xff] %vm3964_vm8, %v3946_v60  ;;  %v4213_v17 = vpop.f32.mrb[27].mxu0 }
 0x578   : > { %v4214_v5 = vadd.f32 %v4213_v17, %v4212_v12 }
 0x57a   : > { %v3951_v18 = vadd.f32 %v4214_v5, %v3950_v40 }
 0x57b   : > { %v3955_v45 = vpop.f32.mrb[28].mxu1 }
 0x57c   : > { %3966 = vst.msk [vmem:[%s305_s24 + $0x8] sm:$0xff] %vm3964_vm8, %v3951_v18  ;;  %v3957_v37 = vpop.f32.mrb[29].mxu1 }
 0x57d   : > { %v4215_v52 = vpop.f32.mrb[28].mxu0 }
 0x57e   : > { %v4216_v13 = vpop.f32.mrb[29].mxu0 }
 0x57f   : > { %v4217_v53 = vadd.f32 %v4216_v13, %v4215_v52 }
 0x581   : > { %v3956_v54 = vadd.f32 %v4217_v53, %v3955_v45  ;;  %v3960_v55 = vpop.f32.mrb[30].mxu1 }
 0x582   : > { %v4218_v47 = vpop.f32.mrb[30].mxu0  ;;  %v3962_v58 = vpop.f32.mrb[31].mxu1 }
 0x583   : > { %3967 = vst.msk [vmem:[%s305_s24 + $0x10] sm:$0xff] %vm3964_vm8, %v3956_v54  ;;  %v4219_v61 = vpop.f32.mrb[31].mxu0 }
 0x584   : > { %v4220_v63 = vadd.f32 %v4219_v61, %v4218_v47 }
 0x586   : > { %v3961_v25 = vadd.f32 %v4220_v63, %v3960_v55 }
 0x588   : > { %3968 = vst.msk [vmem:[%s305_s24 + $0x18] sm:$0xff] %vm3964_vm8, %v3961_v25 }
 0x589 PF: > { %s18_s27 = sadd.s32 1, %s4806_s27  }
 0x58a   : > { %p15_p4 = scmp.ge.s32.totalorder %s18_s27, 4  }
 0x58c   :  { %17 = sbr.rel (!%p15_p4) target bundleno = 1 (0x1), region = 90 }

// kernel: cnn160_forward.3
= control target key start
LH: loop header
LB: loop body
LE: loop exit
PB: predicated region body
PF: predicated region fallthrough
CT: control target
= control target key end

     0   :  { %v2565_v43 = vmov 1983009808   ;;  %v446_v45 = vlaneseq  ;;  %s3941_s0 = inlined_call_operand.vmem [shape: f32[2,3200], index: 0, kind: input, shape index: {}]   ;;  %s3942_s1 = inlined_call_operand.vmem [shape: f32[3200,50], index: 1, kind: input, shape index: {}]   ;;  %s3943_s2 = inlined_call_operand.vmem [shape: f32[1,50], index: 2, kind: input, shape index: {}]   ;;  %s3944_s3 = inlined_call_operand.vmem [shape: f32[50,12], index: 3, kind: input, shape index: {}]   ;;  %s3945_s4 = inlined_call_operand.vmem [shape: f32[1,12], index: 4, kind: input, shape index: {}]   ;;  %s3946_s5 = inlined_call_operand.hbm [shape: f32[2,12], index: 5, kind: output, shape index: {}]  }
   0x1   :  { %v44_v0 = vld [vmem:[%s3942_s1 + $0x80] sm:$0xff]  ;;  %v45_v1 = vld [vmem:[%s3942_s1 + $0x88] sm:$0xff]  ;;  %v46_v11 = vld [vmem:[%s3942_s1 + $0x90] sm:$0xff]  ;;  %v444_v44 = vunpack.c.l.s4 %v2565_v43 }
   0x2   :  { %v28_v2 = vld [vmem:[%s3942_s1] sm:$0xff]  ;;  %v2109_v3 = vpack.c.bf16 %v45_v1, %v44_v0  ;;  %v29_v4 = vld [vmem:[%s3942_s1 + $0x8] sm:$0xff]  ;;  %v47_v13 = vld [vmem:[%s3942_s1 + $0x98] sm:$0xff]  ;;  %v447_v60 = vshrl.u32 %v446_v45, 7 }
   0x3   :  { %v76_v5 = vld [vmem:[%s3942_s1 + $0x180] sm:$0xff]  ;;  %v77_v6 = vld [vmem:[%s3942_s1 + $0x188] sm:$0xff]  ;;  %v2111_v7 = vpack.c.bf16 %v29_v4, %v28_v2  ;;  %v30_v14 = vld [vmem:[%s3942_s1 + $0x10] sm:$0xff]  ;;  %v2113_v16 = vpack.c.bf16 %v47_v13, %v46_v11  ;;  %v445_v59 = vunpack.c.0.s8 %v444_v44 }
   0x4   :  { %v2141_v8 = vpack.c.bf16 %v77_v6, %v76_v5  ;;  %v60_v9 = vld [vmem:[%s3942_s1 + $0x100] sm:$0xff]  ;;  %v61_v10 = vld [vmem:[%s3942_s1 + $0x108] sm:$0xff]  ;;  %2110 = vmatprep.subr.bf16.mxu0 %v2109_v3  ;;  %v31_v15 = vld [vmem:[%s3942_s1 + $0x18] sm:$0xff] }
   0x5   :  { %v2143_v12 = vpack.c.bf16 %v61_v10, %v60_v9  ;;  %2112 = vmatpush3.bf16.msra.mxu0 %v2111_v7  ;;  %v2115_v17 = vpack.c.bf16 %v31_v15, %v30_v14  ;;  %v78_v18 = vld [vmem:[%s3942_s1 + $0x190] sm:$0xff]  ;;  %v79_v19 = vld [vmem:[%s3942_s1 + $0x198] sm:$0xff]  ;;  %v48_v23 = vld [vmem:[%s3942_s1 + $0xa0] sm:$0xff]  ;;  %v2744_v10 = vsub.s32 %v445_v59, %v447_v60 }
   0x6   :  { %2142 = vmatprep.subr.bf16.mxu1 %v2141_v8  ;;  %v62_v20 = vld [vmem:[%s3942_s1 + $0x110] sm:$0xff]  ;;  %v2145_v21 = vpack.c.bf16 %v79_v19, %v78_v18  ;;  %v63_v22 = vld [vmem:[%s3942_s1 + $0x118] sm:$0xff]  ;;  %v49_v24 = vld [vmem:[%s3942_s1 + $0xa8] sm:$0xff]  ;;  %2114 = vmatprep.subr.bf16.mxu0 %v2113_v16 }
   0x7   :  { %2144 = vmatpush3.bf16.msra.mxu1 %v2143_v12  ;;  %v2147_v25 = vpack.c.bf16 %v63_v22, %v62_v20  ;;  %v2117_v26 = vpack.c.bf16 %v49_v24, %v48_v23  ;;  %v32_v27 = vld [vmem:[%s3942_s1 + $0x20] sm:$0xff]  ;;  %v33_v28 = vld [vmem:[%s3942_s1 + $0x28] sm:$0xff]  ;;  %v50_v35 = vld [vmem:[%s3942_s1 + $0xb0] sm:$0xff] }
   0x8   :  { %v80_v29 = vld [vmem:[%s3942_s1 + $0x1a0] sm:$0xff]  ;;  %2146 = vmatprep.subr.bf16.mxu1 %v2145_v21  ;;  %v81_v30 = vld [vmem:[%s3942_s1 + $0x1a8] sm:$0xff]  ;;  %v2119_v33 = vpack.c.bf16 %v33_v28, %v32_v27  ;;  %v51_v36 = vld [vmem:[%s3942_s1 + $0xb8] sm:$0xff] }
   0x9   :  { %v64_v31 = vld [vmem:[%s3942_s1 + $0x120] sm:$0xff]  ;;  %v65_v32 = vld [vmem:[%s3942_s1 + $0x128] sm:$0xff]  ;;  %2116 = vmatpush3.bf16.msra.mxu0 %v2115_v17  ;;  %v2149_v34 = vpack.c.bf16 %v81_v30, %v80_v29  ;;  %v34_v37 = vld [vmem:[%s3942_s1 + $0x30] sm:$0xff]  ;;  %v2121_v39 = vpack.c.bf16 %v51_v36, %v50_v35 }
   0xa   :  { %2118 = vmatprep.subr.bf16.mxu0 %v2117_v26  ;;  %v2151_v38 = vpack.c.bf16 %v65_v32, %v64_v31  ;;  %v35_v40 = vld [vmem:[%s3942_s1 + $0x38] sm:$0xff]  ;;  %v82_v41 = vld [vmem:[%s3942_s1 + $0x1b0] sm:$0xff]  ;;  %v52_v49 = vld [vmem:[%s3942_s1 + $0xc0] sm:$0xff] }
   0xb   :  { %2148 = vmatpush3.bf16.msra.mxu1 %v2147_v25  ;;  %v83_v42 = vld [vmem:[%s3942_s1 + $0x1b8] sm:$0xff]  ;;  %v66_v47 = vld [vmem:[%s3942_s1 + $0x130] sm:$0xff]  ;;  %v53_v50 = vld [vmem:[%s3942_s1 + $0xc8] sm:$0xff]  ;;  %v2123_v51 = vpack.c.bf16 %v35_v40, %v34_v37 }
   0xc   :  { %2150 = vmatprep.subr.bf16.mxu1 %v2149_v34  ;;  %v2153_v46 = vpack.c.bf16 %v83_v42, %v82_v41  ;;  %v67_v48 = vld [vmem:[%s3942_s1 + $0x138] sm:$0xff]  ;;  %v84_v52 = vld [vmem:[%s3942_s1 + $0x1c0] sm:$0xff]  ;;  %v85_v53 = vld [vmem:[%s3942_s1 + $0x1c8] sm:$0xff]  ;;  %v2125_v55 = vpack.c.bf16 %v53_v50, %v52_v49 }
   0xd   :  { %2120 = vmatpush3.bf16.msra.mxu0 %v2119_v33  ;;  %v2155_v54 = vpack.c.bf16 %v67_v48, %v66_v47  ;;  %v36_v56 = vld [vmem:[%s3942_s1 + $0x40] sm:$0xff]  ;;  %v37_v57 = vld [vmem:[%s3942_s1 + $0x48] sm:$0xff]  ;;  %v2157_v61 = vpack.c.bf16 %v85_v53, %v84_v52  ;;  %v54_v63 = vld [vmem:[%s3942_s1 + $0xd0] sm:$0xff] }
   0xe   :  { %2122 = vmatprep.subr.bf16.mxu0 %v2121_v39  ;;  %v68_v58 = vld [vmem:[%s3942_s1 + $0x140] sm:$0xff]  ;;  %v69_v62 = vld [vmem:[%s3942_s1 + $0x148] sm:$0xff]  ;;  %v55_v0 = vld [vmem:[%s3942_s1 + $0xd8] sm:$0xff]  ;;  %v2127_v3 = vpack.c.bf16 %v37_v57, %v36_v56 }
   0xf   :  { %2152 = vmatpush3.bf16.msra.mxu1 %v2151_v38  ;;  %v86_v1 = vld [vmem:[%s3942_s1 + $0x1d0] sm:$0xff]  ;;  %v87_v2 = vld [vmem:[%s3942_s1 + $0x1d8] sm:$0xff]  ;;  %v2159_v5 = vpack.c.bf16 %v69_v62, %v68_v58  ;;  %v2129_v6 = vpack.c.bf16 %v55_v0, %v54_v63  ;;  %v56_v12 = vld [vmem:[%s3942_s1 + $0xe0] sm:$0xff] }
  0x10   :  { %2154 = vmatprep.subr.bf16.mxu1 %v2153_v46  ;;  %v38_v4 = vld [vmem:[%s3942_s1 + $0x50] sm:$0xff]  ;;  %v39_v7 = vld [vmem:[%s3942_s1 + $0x58] sm:$0xff]  ;;  %v2161_v11 = vpack.c.bf16 %v87_v2, %v86_v1  ;;  %v57_v13 = vld [vmem:[%s3942_s1 + $0xe8] sm:$0xff] }
  0x11   :  { %2124 = vmatpush3.bf16.msra.mxu0 %v2123_v51  ;;  %v70_v8 = vld [vmem:[%s3942_s1 + $0x150] sm:$0xff]  ;;  %v71_v9 = vld [vmem:[%s3942_s1 + $0x158] sm:$0xff]  ;;  %v88_v14 = vld [vmem:[%s3942_s1 + $0x1e0] sm:$0xff]  ;;  %v2131_v16 = vpack.c.bf16 %v39_v7, %v38_v4  ;;  %v2133_v19 = vpack.c.bf16 %v57_v13, %v56_v12 }
  0x12   :  { %2126 = vmatprep.subr.bf16.mxu0 %v2125_v55  ;;  %v89_v15 = vld [vmem:[%s3942_s1 + $0x1e8] sm:$0xff]  ;;  %v2163_v17 = vpack.c.bf16 %v71_v9, %v70_v8  ;;  %v21_v18 = vld [vmem:[%s3941_s0] sm:$0xff]  ;;  %v58_v27 = vld [vmem:[%s3942_s1 + $0xf0] sm:$0xff] }
  0x13   :  { %2156 = vmatpush3.bf16.msra.mxu1 %v2155_v54  ;;  %v40_v20 = vld [vmem:[%s3942_s1 + $0x60] sm:$0xff]  ;;  %v41_v21 = vld [vmem:[%s3942_s1 + $0x68] sm:$0xff]  ;;  %v449_v23 = vrot.slane %v21_v18, %v2744_v10  ;;  %v442_v24 = vcombine.high %v21_v18, %v21_v18  ;;  %v2165_v25 = vpack.c.bf16 %v89_v15, %v88_v14  ;;  %v59_v28 = vld [vmem:[%s3942_s1 + $0xf8] sm:$0xff] }
  0x14   :  { %2158 = vmatprep.subr.bf16.mxu1 %v2157_v61  ;;  %v72_v22 = vld [vmem:[%s3942_s1 + $0x160] sm:$0xff]  ;;  %v73_v26 = vld [vmem:[%s3942_s1 + $0x168] sm:$0xff]  ;;  %v90_v29 = vld [vmem:[%s3942_s1 + $0x1f0] sm:$0xff]  ;;  %v2135_v33 = vpack.c.bf16 %v41_v21, %v40_v20  ;;  %v2137_v35 = vpack.c.bf16 %v59_v28, %v58_v27 }
  0x15   :  { %2128 = vmatpush3.bf16.msra.mxu0 %v2127_v3  ;;  %v91_v30 = vld [vmem:[%s3942_s1 + $0x1f8] sm:$0xff]  ;;  %v457_v31 = vcombine.high %v449_v23, %v449_v23  ;;  %v456_v32 = vrot.slane %v442_v24, %v2744_v10  ;;  %v2167_v34 = vpack.c.bf16 %v73_v26, %v72_v22  ;;  %v42_v36 = vld [vmem:[%s3942_s1 + $0x70] sm:$0xff]  ;;  %v108_v42 = vld [vmem:[%s3942_s1 + $0x280] sm:$0xff] }
  0x16   :  { %2130 = vmatprep.subr.bf16.mxu0 %v2129_v6  ;;  %v43_v37 = vld [vmem:[%s3942_s1 + $0x78] sm:$0xff]  ;;  %v74_v38 = vld [vmem:[%s3942_s1 + $0x170] sm:$0xff]  ;;  %v2169_v40 = vpack.c.bf16 %v91_v30, %v90_v29  ;;  %v109_v43 = vld [vmem:[%s3942_s1 + $0x288] sm:$0xff] }
  0x17   :  { %2160 = vmatpush3.bf16.msra.mxu1 %v2159_v5  ;;  %v458_v39 = vcombine.high %v456_v32, %v456_v32  ;;  %640 = vmatprep.mubr.f32.mxu0 %v457_v31  ;;  %v75_v41 = vld [vmem:[%s3942_s1 + $0x178] sm:$0xff]  ;;  %v140_v44 = vld [vmem:[%s3942_s1 + $0x380] sm:$0xff]  ;;  %v141_v45 = vld [vmem:[%s3942_s1 + $0x388] sm:$0xff]  ;;  %v2139_v46 = vpack.c.bf16 %v43_v37, %v42_v36  ;;  %v2173_v48 = vpack.c.bf16 %v109_v43, %v108_v42 }
  0x18   :  { %2162 = vmatprep.subr.bf16.mxu1 %v2161_v11  ;;  %v2171_v47 = vpack.c.bf16 %v75_v41, %v74_v38  ;;  %v92_v49 = vld [vmem:[%s3942_s1 + $0x200] sm:$0xff]  ;;  %v93_v50 = vld [vmem:[%s3942_s1 + $0x208] sm:$0xff]  ;;  %v2205_v52 = vpack.c.bf16 %v141_v45, %v140_v44  ;;  %v110_v54 = vld [vmem:[%s3942_s1 + $0x290] sm:$0xff] }
  0x19   :  { %2132 = vmatpush3.bf16.msra.mxu0 %v2131_v16  ;;  %710 = vmatprep.mubr.f32.mxu1 %v458_v39  ;;  %v124_v51 = vld [vmem:[%s3942_s1 + $0x300] sm:$0xff]  ;;  %v125_v53 = vld [vmem:[%s3942_s1 + $0x308] sm:$0xff]  ;;  %v111_v55 = vld [vmem:[%s3942_s1 + $0x298] sm:$0xff]  ;;  %v2175_v58 = vpack.c.bf16 %v93_v50, %v92_v49 }
  0x1a   :  { %2134 = vmatprep.subr.bf16.mxu0 %v2133_v19  ;;  %v142_v56 = vld [vmem:[%s3942_s1 + $0x390] sm:$0xff]  ;;  %v143_v57 = vld [vmem:[%s3942_s1 + $0x398] sm:$0xff]  ;;  %v2207_v59 = vpack.c.bf16 %v125_v53, %v124_v51  ;;  %v2177_v60 = vpack.c.bf16 %v111_v55, %v110_v54  ;;  %v112_v2 = vld [vmem:[%s3942_s1 + $0x2a0] sm:$0xff] }
  0x1b   :  { %2164 = vmatpush3.bf16.msra.mxu1 %v2163_v17  ;;  %v94_v61 = vld [vmem:[%s3942_s1 + $0x210] sm:$0xff]  ;;  %v95_v62 = vld [vmem:[%s3942_s1 + $0x218] sm:$0xff]  ;;  %v2209_v0 = vpack.c.bf16 %v143_v57, %v142_v56  ;;  %v113_v3 = vld [vmem:[%s3942_s1 + $0x2a8] sm:$0xff] }
  0x1c   :  { %2166 = vmatprep.subr.bf16.mxu1 %v2165_v25  ;;  %v126_v63 = vld [vmem:[%s3942_s1 + $0x310] sm:$0xff]  ;;  %v127_v1 = vld [vmem:[%s3942_s1 + $0x318] sm:$0xff]  ;;  %v144_v4 = vld [vmem:[%s3942_s1 + $0x3a0] sm:$0xff]  ;;  %v2179_v6 = vpack.c.bf16 %v95_v62, %v94_v61  ;;  %v2181_v8 = vpack.c.bf16 %v113_v3, %v112_v2 }
  0x1d   :  { %2136 = vmatpush3.bf16.msra.mxu0 %v2135_v33  ;;  %v145_v5 = vld [vmem:[%s3942_s1 + $0x3a8] sm:$0xff]  ;;  %v2211_v7 = vpack.c.bf16 %v127_v1, %v126_v63  ;;  %v96_v9 = vld [vmem:[%s3942_s1 + $0x220] sm:$0xff]  ;;  %v114_v15 = vld [vmem:[%s3942_s1 + $0x2b0] sm:$0xff] }
  0x1e   :  { %2138 = vmatprep.subr.bf16.mxu0 %v2137_v35  ;;  %v97_v11 = vld [vmem:[%s3942_s1 + $0x228] sm:$0xff]  ;;  %v128_v12 = vld [vmem:[%s3942_s1 + $0x320] sm:$0xff]  ;;  %v2213_v13 = vpack.c.bf16 %v145_v5, %v144_v4  ;;  %v115_v16 = vld [vmem:[%s3942_s1 + $0x2b8] sm:$0xff] }
  0x1f   :  { %2168 = vmatpush3.bf16.msra.mxu1 %v2167_v34  ;;  %v129_v14 = vld [vmem:[%s3942_s1 + $0x328] sm:$0xff]  ;;  %v146_v17 = vld [vmem:[%s3942_s1 + $0x3b0] sm:$0xff]  ;;  %v147_v18 = vld [vmem:[%s3942_s1 + $0x3b8] sm:$0xff]  ;;  %v2183_v19 = vpack.c.bf16 %v97_v11, %v96_v9  ;;  %v2185_v22 = vpack.c.bf16 %v115_v16, %v114_v15 }
  0x20   :  { %2170 = vmatprep.subr.bf16.mxu1 %v2169_v40  ;;  %v98_v20 = vld [vmem:[%s3942_s1 + $0x230] sm:$0xff]  ;;  %v2215_v21 = vpack.c.bf16 %v129_v14, %v128_v12  ;;  %v131_v25 = vld [vmem:[%s3942_s1 + $0x338] sm:$0xff]  ;;  %v2217_v26 = vpack.c.bf16 %v147_v18, %v146_v17  ;;  %v116_v27 = vld [vmem:[%s3942_s1 + $0x2c0] sm:$0xff] }
  0x21   :  { %2140 = vmatpush3.bf16.msra.mxu0 %v2139_v46  ;;  %v130_v24 = vld [vmem:[%s3942_s1 + $0x330] sm:$0xff]  ;;  %v117_v28 = vld [vmem:[%s3942_s1 + $0x2c8] sm:$0xff]  ;;  %v148_v30 = vld [vmem:[%s3942_s1 + $0x3c0] sm:$0xff] }
  0x22   :  { %2174 = vmatprep.subr.bf16.mxu0 %v2173_v48  ;;  %v22_v29 = vld [vmem:[%s3941_s0 + $0x8] sm:$0xff]  ;;  %v2219_v35 = vpack.c.bf16 %v131_v25, %v130_v24  ;;  %v2189_v36 = vpack.c.bf16 %v117_v28, %v116_v27  ;;  %v100_v37 = vld [vmem:[%s3942_s1 + $0x240] sm:$0xff]  ;;  %v118_v44 = vld [vmem:[%s3942_s1 + $0x2d0] sm:$0xff] }
  0x23   :  { %2172 = vmatpush3.bf16.msra.mxu1 %v2171_v47  ;;  %v149_v31 = vld [vmem:[%s3942_s1 + $0x3c8] sm:$0xff]  ;;  %v459_v33 = vcombine.high %v22_v29, %v22_v29  ;;  %v132_v39 = vld [vmem:[%s3942_s1 + $0x340] sm:$0xff]  ;;  %v119_v45 = vld [vmem:[%s3942_s1 + $0x2d8] sm:$0xff] }
  0x24   :  { %2206 = vmatprep.subr.bf16.mxu1 %v2205_v52  ;;  %641 = vmatmul.mubr.f32.vlgmr.msra.gmra.mrb[0].mxu0 %v449_v23  ;;  %v99_v23 = vld [vmem:[%s3942_s1 + $0x238] sm:$0xff]  ;;  %v101_v38 = vld [vmem:[%s3942_s1 + $0x248] sm:$0xff]  ;;  %v2221_v42 = vpack.c.bf16 %v149_v31, %v148_v30  ;;  %v150_v46 = vld [vmem:[%s3942_s1 + $0x3d0] sm:$0xff]  ;;  %v2193_v51 = vpack.c.bf16 %v119_v45, %v118_v44 }
  0x25   :  { %2176 = vmatpush3.bf16.msra.mxu0 %v2175_v58  ;;  %v2187_v34 = vpack.c.bf16 %v99_v23, %v98_v20  ;;  %v2925_v41 = vrot.slane %v459_v33, %v2744_v10  ;;  %v133_v43 = vld [vmem:[%s3942_s1 + $0x348] sm:$0xff]  ;;  %v151_v47 = vld [vmem:[%s3942_s1 + $0x3d8] sm:$0xff]  ;;  %v2191_v49 = vpack.c.bf16 %v101_v38, %v100_v37  ;;  %v102_v52 = vld [vmem:[%s3942_s1 + $0x250] sm:$0xff] }
  0x26   :  { %711 = vmatmul.mubr.f32.vlgmr.msra.gmra.mrb[0].mxu1 %v456_v32  ;;  %2178 = vmatprep.subr.bf16.mxu0 %v2177_v60  ;;  %v2911_v32 = vrot.slane %v22_v29, %v2744_v10  ;;  %v2223_v50 = vpack.c.bf16 %v133_v43, %v132_v39  ;;  %v103_v53 = vld [vmem:[%s3942_s1 + $0x258] sm:$0xff]  ;;  %v134_v54 = vld [vmem:[%s3942_s1 + $0x350] sm:$0xff]  ;;  %v2225_v55 = vpack.c.bf16 %v151_v47, %v150_v46  ;;  %v120_v57 = vld [vmem:[%s3942_s1 + $0x2e0] sm:$0xff] }
  0x27   :  { %2208 = vmatpush3.bf16.msra.mxu1 %v2207_v59  ;;  %v475_v48 = vcombine.high %v2925_v41, %v2925_v41  ;;  %v135_v56 = vld [vmem:[%s3942_s1 + $0x358] sm:$0xff]  ;;  %v121_v58 = vld [vmem:[%s3942_s1 + $0x2e8] sm:$0xff]  ;;  %v152_v59 = vld [vmem:[%s3942_s1 + $0x3e0] sm:$0xff]  ;;  %v2195_v61 = vpack.c.bf16 %v103_v53, %v102_v52 }
  0x28   :  { %2210 = vmatprep.subr.bf16.mxu1 %v2209_v0  ;;  %v474_v40 = vcombine.high %v2911_v32, %v2911_v32  ;;  %v153_v60 = vld [vmem:[%s3942_s1 + $0x3e8] sm:$0xff]  ;;  %v2227_v62 = vpack.c.bf16 %v135_v56, %v134_v54  ;;  %v2197_v63 = vpack.c.bf16 %v121_v58, %v120_v57  ;;  %v104_v0 = vld [vmem:[%s3942_s1 + $0x260] sm:$0xff]  ;;  %v122_v5 = vld [vmem:[%s3942_s1 + $0x2f0] sm:$0xff] }
  0x29   :  { %2180 = vmatpush3.bf16.msra.mxu0 %v2179_v6  ;;  %850 = vmatprep.mubr.f32.mxu1 %v475_v48  ;;  %v105_v1 = vld [vmem:[%s3942_s1 + $0x268] sm:$0xff]  ;;  %v136_v2 = vld [vmem:[%s3942_s1 + $0x360] sm:$0xff]  ;;  %v2229_v3 = vpack.c.bf16 %v153_v60, %v152_v59  ;;  %v123_v6 = vld [vmem:[%s3942_s1 + $0x2f8] sm:$0xff] }
  0x2a   :  { %2182 = vmatprep.subr.bf16.mxu0 %v2181_v8  ;;  %780 = vmatprep.mubr.f32.mxu0 %v474_v40  ;;  %v137_v4 = vld [vmem:[%s3942_s1 + $0x368] sm:$0xff]  ;;  %v155_v8 = vld [vmem:[%s3942_s1 + $0x3f8] sm:$0xff]  ;;  %v2199_v9 = vpack.c.bf16 %v105_v1, %v104_v0  ;;  %v2201_v12 = vpack.c.bf16 %v123_v6, %v122_v5  ;;  %v138_v15 = vld [vmem:[%s3942_s1 + $0x370] sm:$0xff] }
  0x2b   :  { %2212 = vmatpush3.bf16.msra.mxu1 %v2211_v7  ;;  %v154_v7 = vld [vmem:[%s3942_s1 + $0x3f0] sm:$0xff]  ;;  %v2231_v11 = vpack.c.bf16 %v137_v4, %v136_v2  ;;  %v107_v14 = vld [vmem:[%s3942_s1 + $0x278] sm:$0xff]  ;;  %v172_v18 = vld [vmem:[%s3942_s1 + $0x480] sm:$0xff] }
  0x2c   :  { %2214 = vmatprep.subr.bf16.mxu1 %v2213_v13  ;;  %v106_v13 = vld [vmem:[%s3942_s1 + $0x270] sm:$0xff]  ;;  %v2233_v16 = vpack.c.bf16 %v155_v8, %v154_v7  ;;  %v139_v17 = vld [vmem:[%s3942_s1 + $0x378] sm:$0xff]  ;;  %v204_v20 = vld [vmem:[%s3942_s1 + $0x580] sm:$0xff] }
  0x2d   :  { %2184 = vmatpush3.bf16.msra.mxu0 %v2183_v19  ;;  %v173_v19 = vld [vmem:[%s3942_s1 + $0x488] sm:$0xff]  ;;  %v156_v23 = vld [vmem:[%s3942_s1 + $0x400] sm:$0xff]  ;;  %v2235_v24 = vpack.c.bf16 %v139_v17, %v138_v15  ;;  %v174_v30 = vld [vmem:[%s3942_s1 + $0x490] sm:$0xff] }
  0x2e   :  { %2186 = vmatprep.subr.bf16.mxu0 %v2185_v22  ;;  %v2203_v22 = vpack.c.bf16 %v107_v14, %v106_v13  ;;  %v2237_v25 = vpack.c.bf16 %v173_v19, %v172_v18  ;;  %v188_v27 = vld [vmem:[%s3942_s1 + $0x500] sm:$0xff]  ;;  %v189_v28 = vld [vmem:[%s3942_s1 + $0x508] sm:$0xff]  ;;  %v175_v31 = vld [vmem:[%s3942_s1 + $0x498] sm:$0xff] }
  0x2f   :  { %2216 = vmatpush3.bf16.msra.mxu1 %v2215_v21  ;;  %v205_v21 = vld [vmem:[%s3942_s1 + $0x588] sm:$0xff]  ;;  %v206_v33 = vld [vmem:[%s3942_s1 + $0x590] sm:$0xff]  ;;  %v2241_v38 = vpack.c.bf16 %v175_v31, %v174_v30  ;;  %v159_v40 = vld [vmem:[%s3942_s1 + $0x418] sm:$0xff] }
  0x30   :  { %2218 = vmatprep.subr.bf16.mxu1 %v2217_v26  ;;  %v157_v26 = vld [vmem:[%s3942_s1 + $0x408] sm:$0xff]  ;;  %v2269_v29 = vpack.c.bf16 %v205_v21, %v204_v20  ;;  %v23_v37 = vld [vmem:[%s3941_s0 + $0x10] sm:$0xff]  ;;  %v191_v46 = vld [vmem:[%s3942_s1 + $0x518] sm:$0xff] }
  0x31   :  { %2188 = vmatpush3.bf16.msra.mxu0 %v2187_v34  ;;  %v207_v34 = vld [vmem:[%s3942_s1 + $0x598] sm:$0xff]  ;;  %v158_v39 = vld [vmem:[%s3942_s1 + $0x410] sm:$0xff]  ;;  %v3053_v43 = vrot.slane %v23_v37, %v2744_v10  ;;  %v476_v44 = vcombine.high %v23_v37, %v23_v37  ;;  %v176_v47 = vld [vmem:[%s3942_s1 + $0x4a0] sm:$0xff] }
  0x32   :  { %2190 = vmatprep.subr.bf16.mxu0 %v2189_v36  ;;  %v2271_v36 = vpack.c.bf16 %v189_v28, %v188_v27  ;;  %v2273_v45 = vpack.c.bf16 %v207_v34, %v206_v33  ;;  %v177_v48 = vld [vmem:[%s3942_s1 + $0x4a8] sm:$0xff]  ;;  %v2243_v53 = vpack.c.bf16 %v159_v40, %v158_v39  ;;  %v192_v57 = vld [vmem:[%s3942_s1 + $0x520] sm:$0xff]  ;;  %v178_v60 = vld [vmem:[%s3942_s1 + $0x4b0] sm:$0xff] }
  0x33   :  { %2220 = vmatpush3.bf16.msra.mxu1 %v2219_v35  ;;  %v2239_v35 = vpack.c.bf16 %v157_v26, %v156_v23  ;;  %v3074_v52 = vrot.slane %v476_v44, %v2744_v10  ;;  %v2245_v54 = vpack.c.bf16 %v177_v48, %v176_v47  ;;  %v161_v56 = vld [vmem:[%s3942_s1 + $0x428] sm:$0xff]  ;;  %v163_v4 = vld [vmem:[%s3942_s1 + $0x438] sm:$0xff]  ;;  %v194_v5 = vld [vmem:[%s3942_s1 + $0x530] sm:$0xff] }
  0x34   :  { %2222 = vmatprep.subr.bf16.mxu1 %v2221_v42  ;;  %v190_v42 = vld [vmem:[%s3942_s1 + $0x510] sm:$0xff]  ;;  %v193_v59 = vld [vmem:[%s3942_s1 + $0x528] sm:$0xff]  ;;  %v195_v7 = vld [vmem:[%s3942_s1 + $0x538] sm:$0xff] }
  0x35   :  { %2192 = vmatpush3.bf16.msra.mxu0 %v2191_v49  ;;  %v208_v49 = vld [vmem:[%s3942_s1 + $0x5a0] sm:$0xff]  ;;  %v2279_v1 = vpack.c.bf16 %v193_v59, %v192_v57  ;;  %v2283_v14 = vpack.c.bf16 %v195_v7, %v194_v5  ;;  %v165_v17 = vld [vmem:[%s3942_s1 + $0x448] sm:$0xff]  ;;  %v182_v21 = vld [vmem:[%s3942_s1 + $0x4d0] sm:$0xff] }
  0x36   :  { %2194 = vmatprep.subr.bf16.mxu0 %v2193_v51  ;;  %v491_v51 = vcombine.high %v3053_v43, %v3053_v43  ;;  %v180_v8 = vld [vmem:[%s3942_s1 + $0x4c0] sm:$0xff]  ;;  %v197_v20 = vld [vmem:[%s3942_s1 + $0x548] sm:$0xff]  ;;  %v214_v23 = vld [vmem:[%s3942_s1 + $0x5d0] sm:$0xff] }
  0x37   :  { %2224 = vmatpush3.bf16.msra.mxu1 %v2223_v50  ;;  %v209_v50 = vld [vmem:[%s3942_s1 + $0x5a8] sm:$0xff]  ;;  %v196_v18 = vld [vmem:[%s3942_s1 + $0x540] sm:$0xff]  ;;  %v166_v28 = vld [vmem:[%s3942_s1 + $0x450] sm:$0xff] }
  0x38   :  { %2226 = vmatprep.subr.bf16.mxu1 %v2225_v55  ;;  %v160_v55 = vld [vmem:[%s3942_s1 + $0x420] sm:$0xff]  ;;  %v2277_v58 = vpack.c.bf16 %v209_v50, %v208_v49  ;;  %v2287_v26 = vpack.c.bf16 %v197_v20, %v196_v18  ;;  %v198_v30 = vld [vmem:[%s3942_s1 + $0x550] sm:$0xff]  ;;  %v199_v33 = vld [vmem:[%s3942_s1 + $0x558] sm:$0xff] }
  0x39   :  { %2196 = vmatpush3.bf16.msra.mxu0 %v2195_v61  ;;  %v179_v61 = vld [vmem:[%s3942_s1 + $0x4b8] sm:$0xff]  ;;  %v2247_v0 = vpack.c.bf16 %v161_v56, %v160_v55  ;;  %v184_v34 = vld [vmem:[%s3942_s1 + $0x4e0] sm:$0xff]  ;;  %v217_v37 = vld [vmem:[%s3942_s1 + $0x5e8] sm:$0xff]  ;;  %v2291_v39 = vpack.c.bf16 %v199_v33, %v198_v30 }
  0x3a   :  { %2198 = vmatprep.subr.bf16.mxu0 %v2197_v63  ;;  %v211_v63 = vld [vmem:[%s3942_s1 + $0x5b8] sm:$0xff]  ;;  %v2249_v2 = vpack.c.bf16 %v179_v61, %v178_v60  ;;  %v169_v44 = vld [vmem:[%s3942_s1 + $0x468] sm:$0xff]  ;;  %v186_v48 = vld [vmem:[%s3942_s1 + $0x4f0] sm:$0xff] }
  0x3b   :  { %2228 = vmatpush3.bf16.msra.mxu1 %v2227_v62  ;;  %v210_v62 = vld [vmem:[%s3942_s1 + $0x5b0] sm:$0xff]  ;;  %v201_v47 = vld [vmem:[%s3942_s1 + $0x568] sm:$0xff]  ;;  %v187_v49 = vld [vmem:[%s3942_s1 + $0x4f8] sm:$0xff] }
  0x3c   :  { %2230 = vmatprep.subr.bf16.mxu1 %v2229_v3  ;;  %v162_v3 = vld [vmem:[%s3942_s1 + $0x430] sm:$0xff]  ;;  %v2281_v6 = vpack.c.bf16 %v211_v63, %v210_v62  ;;  %v2265_v55 = vpack.c.bf16 %v187_v49, %v186_v48  ;;  %v171_v57 = vld [vmem:[%s3942_s1 + $0x478] sm:$0xff]  ;;  %v236_v60 = vld [vmem:[%s3942_s1 + $0x680] sm:$0xff] }
  0x3d   :  { %2200 = vmatpush3.bf16.msra.mxu0 %v2199_v9  ;;  %v181_v9 = vld [vmem:[%s3942_s1 + $0x4c8] sm:$0xff]  ;;  %v2251_v13 = vpack.c.bf16 %v163_v4, %v162_v3  ;;  %v218_v50 = vld [vmem:[%s3942_s1 + $0x5f0] sm:$0xff]  ;;  %v203_v59 = vld [vmem:[%s3942_s1 + $0x578] sm:$0xff] }
  0x3e   :  { %2202 = vmatprep.subr.bf16.mxu0 %v2201_v12  ;;  %v213_v12 = vld [vmem:[%s3942_s1 + $0x5c8] sm:$0xff]  ;;  %v2253_v15 = vpack.c.bf16 %v181_v9, %v180_v8  ;;  %v170_v56 = vld [vmem:[%s3942_s1 + $0x470] sm:$0xff]  ;;  %v268_v62 = vld [vmem:[%s3942_s1 + $0x780] sm:$0xff] }
  0x3f   :  { %2232 = vmatpush3.bf16.msra.mxu1 %v2231_v11  ;;  %v212_v11 = vld [vmem:[%s3942_s1 + $0x5c0] sm:$0xff]  ;;  %v237_v61 = vld [vmem:[%s3942_s1 + $0x688] sm:$0xff]  ;;  %v238_v9 = vld [vmem:[%s3942_s1 + $0x690] sm:$0xff] }
  0x40   :  { %2234 = vmatprep.subr.bf16.mxu1 %v2233_v16  ;;  %v164_v16 = vld [vmem:[%s3942_s1 + $0x440] sm:$0xff]  ;;  %v2285_v19 = vpack.c.bf16 %v213_v12, %v212_v11  ;;  %v269_v63 = vld [vmem:[%s3942_s1 + $0x788] sm:$0xff]  ;;  %v2301_v3 = vpack.c.bf16 %v237_v61, %v236_v60  ;;  %v239_v11 = vld [vmem:[%s3942_s1 + $0x698] sm:$0xff] }
  0x41   :  { %2204 = vmatpush3.bf16.msra.mxu0 %v2203_v22  ;;  %v183_v22 = vld [vmem:[%s3942_s1 + $0x4d8] sm:$0xff]  ;;  %v220_v4 = vld [vmem:[%s3942_s1 + $0x600] sm:$0xff]  ;;  %v221_v5 = vld [vmem:[%s3942_s1 + $0x608] sm:$0xff]  ;;  %v2333_v7 = vpack.c.bf16 %v269_v63, %v268_v62  ;;  %v2305_v18 = vpack.c.bf16 %v239_v11, %v238_v9 }
  0x42   :  { %2238 = vmatprep.subr.bf16.mxu0 %v2237_v25  ;;  %v2255_v25 = vpack.c.bf16 %v165_v17, %v164_v16  ;;  %v2257_v27 = vpack.c.bf16 %v183_v22, %v182_v21  ;;  %v253_v8 = vld [vmem:[%s3942_s1 + $0x708] sm:$0xff]  ;;  %v2303_v16 = vpack.c.bf16 %v221_v5, %v220_v4  ;;  %v223_v20 = vld [vmem:[%s3942_s1 + $0x618] sm:$0xff]  ;;  %v254_v21 = vld [vmem:[%s3942_s1 + $0x710] sm:$0xff] }
  0x43   :  { %2236 = vmatpush3.bf16.msra.mxu1 %v2235_v24  ;;  %v215_v24 = vld [vmem:[%s3942_s1 + $0x5d8] sm:$0xff]  ;;  %v258_v48 = vld [vmem:[%s3942_s1 + $0x730] sm:$0xff]  ;;  %v261_v61 = vld [vmem:[%s3942_s1 + $0x748] sm:$0xff] }
  0x44   :  { %2270 = vmatprep.subr.bf16.mxu1 %v2269_v29  ;;  %781 = vmatmul.mubr.f32.vlgmr.msra.gmra.mrb[2].mxu0 %v2911_v32  ;;  %v2275_v32 = vpack.c.bf16 %v191_v46, %v190_v42  ;;  %v167_v29 = vld [vmem:[%s3942_s1 + $0x458] sm:$0xff]  ;;  %v2289_v31 = vpack.c.bf16 %v215_v24, %v214_v23  ;;  %v168_v42 = vld [vmem:[%s3942_s1 + $0x460] sm:$0xff]  ;;  %v246_v62 = vld [vmem:[%s3942_s1 + $0x6d0] sm:$0xff] }
  0x45   :  { %2240 = vmatpush3.bf16.msra.mxu0 %v2239_v35  ;;  %920 = vmatprep.mubr.f32.mxu0 %v491_v51  ;;  %v185_v35 = vld [vmem:[%s3942_s1 + $0x4e8] sm:$0xff]  ;;  %v219_v51 = vld [vmem:[%s3942_s1 + $0x5f8] sm:$0xff]  ;;  %v240_v24 = vld [vmem:[%s3942_s1 + $0x6a0] sm:$0xff] }
  0x46   :  { %851 = vmatmul.mubr.f32.vlgmr.msra.gmra.mrb[2].mxu1 %v2925_v41  ;;  %2242 = vmatprep.subr.bf16.mxu0 %v2241_v38  ;;  %v492_v41 = vcombine.high %v3074_v52, %v3074_v52  ;;  %v2259_v38 = vpack.c.bf16 %v167_v29, %v166_v28  ;;  %v2261_v40 = vpack.c.bf16 %v185_v35, %v184_v34  ;;  %v255_v23 = vld [vmem:[%s3942_s1 + $0x718] sm:$0xff]  ;;  %v273_v28 = vld [vmem:[%s3942_s1 + $0x7a8] sm:$0xff]  ;;  %v256_v35 = vld [vmem:[%s3942_s1 + $0x720] sm:$0xff] }
  0x47   :  { %2272 = vmatpush3.bf16.msra.mxu1 %v2271_v36  ;;  %v216_v36 = vld [vmem:[%s3942_s1 + $0x5e0] sm:$0xff]  ;;  %v225_v34 = vld [vmem:[%s3942_s1 + $0x628] sm:$0xff]  ;;  %v247_v63 = vld [vmem:[%s3942_s1 + $0x6d8] sm:$0xff] }
  0x48   :  { %2274 = vmatprep.subr.bf16.mxu1 %v2273_v45  ;;  %990 = vmatprep.mubr.f32.mxu1 %v492_v41  ;;  %v200_v45 = vld [vmem:[%s3942_s1 + $0x560] sm:$0xff]  ;;  %v2293_v46 = vpack.c.bf16 %v217_v37, %v216_v36  ;;  %v202_v41 = vld [vmem:[%s3942_s1 + $0x570] sm:$0xff]  ;;  %v2321_v4 = vpack.c.bf16 %v247_v63, %v246_v62  ;;  %v263_v9 = vld [vmem:[%s3942_s1 + $0x758] sm:$0xff] }
  0x49   :  { %2244 = vmatpush3.bf16.msra.mxu0 %v2243_v53  ;;  %v2263_v53 = vpack.c.bf16 %v169_v44, %v168_v42  ;;  %v242_v37 = vld [vmem:[%s3942_s1 + $0x6b0] sm:$0xff]  ;;  %v248_v11 = vld [vmem:[%s3942_s1 + $0x6e0] sm:$0xff] }
  0x4a   :  { %2246 = vmatprep.subr.bf16.mxu0 %v2245_v54  ;;  %v2295_v54 = vpack.c.bf16 %v201_v47, %v200_v45  ;;  %v227_v47 = vld [vmem:[%s3942_s1 + $0x638] sm:$0xff]  ;;  %v230_v5 = vld [vmem:[%s3942_s1 + $0x650] sm:$0xff] }
  0x4b   :  { %2276 = vmatpush3.bf16.msra.mxu1 %v2275_v32  ;;  %v24_v32 = vld [vmem:[%s3941_s0 + $0x18] sm:$0xff]  ;;  %v318_v62 = vld [vmem:[%s3942_s1 + $0x910] sm:$0xff] }
  0x4c   :  { %2278 = vmatprep.subr.bf16.mxu1 %v2277_v58  ;;  %v2297_v58 = vpack.c.bf16 %v219_v51, %v218_v50  ;;  %v3245_v12 = vrot.slane %v24_v32, %v2744_v10  ;;  %v259_v50 = vld [vmem:[%s3942_s1 + $0x738] sm:$0xff]  ;;  %v244_v51 = vld [vmem:[%s3942_s1 + $0x6c0] sm:$0xff] }
  0x4d   :  { %2248 = vmatpush3.bf16.msra.mxu0 %v2247_v0  ;;  %v493_v0 = vcombine.high %v24_v32, %v24_v32  ;;  %v276_v32 = vld [vmem:[%s3942_s1 + $0x7c0] sm:$0xff] }
  0x4e   :  { %2250 = vmatprep.subr.bf16.mxu0 %v2249_v2  ;;  %v2299_v2 = vpack.c.bf16 %v203_v59, %v202_v41  ;;  %v228_v41 = vld [vmem:[%s3942_s1 + $0x640] sm:$0xff] }
  0x4f   :  { %2280 = vmatpush3.bf16.msra.mxu1 %v2279_v1  ;;  %v2267_v1 = vpack.c.bf16 %v171_v57, %v170_v56  ;;  %v2347_v56 = vpack.c.bf16 %v259_v50, %v258_v48  ;;  %v260_v59 = vld [vmem:[%s3942_s1 + $0x740] sm:$0xff]  ;;  %v285_v48 = vld [vmem:[%s3942_s1 + $0x808] sm:$0xff] }
  0x50   :  { %2282 = vmatprep.subr.bf16.mxu1 %v2281_v6  ;;  %v252_v6 = vld [vmem:[%s3942_s1 + $0x700] sm:$0xff] }
  0x51   :  { %2252 = vmatpush3.bf16.msra.mxu0 %v2251_v13  ;;  %v270_v13 = vld [vmem:[%s3942_s1 + $0x790] sm:$0xff]  ;;  %v2335_v17 = vpack.c.bf16 %v253_v8, %v252_v6  ;;  %v231_v6 = vld [vmem:[%s3942_s1 + $0x658] sm:$0xff] }
  0x52   :  { %2254 = vmatprep.subr.bf16.mxu0 %v2253_v15  ;;  %v3254_v15 = vrot.slane %v493_v0, %v2744_v10  ;;  %v278_v0 = vld [vmem:[%s3942_s1 + $0x7d0] sm:$0xff] }
  0x53   :  { %2284 = vmatpush3.bf16.msra.mxu1 %v2283_v14  ;;  %v271_v14 = vld [vmem:[%s3942_s1 + $0x798] sm:$0xff] }
  0x54   :  { %2286 = vmatprep.subr.bf16.mxu1 %v2285_v19  ;;  %v222_v19 = vld [vmem:[%s3942_s1 + $0x610] sm:$0xff]  ;;  %v2337_v22 = vpack.c.bf16 %v271_v14, %v270_v13  ;;  %v509_v29 = vcombine.high %v3254_v15, %v3254_v15  ;;  %v249_v13 = vld [vmem:[%s3942_s1 + $0x6e8] sm:$0xff]  ;;  %v280_v14 = vld [vmem:[%s3942_s1 + $0x7e0] sm:$0xff] }
  0x55   :  { %2256 = vmatpush3.bf16.msra.mxu0 %v2255_v25  ;;  %v241_v25 = vld [vmem:[%s3942_s1 + $0x6a8] sm:$0xff]  ;;  %v2307_v30 = vpack.c.bf16 %v223_v20, %v222_v19  ;;  %v2325_v19 = vpack.c.bf16 %v249_v13, %v248_v11  ;;  %v232_v20 = vld [vmem:[%s3942_s1 + $0x660] sm:$0xff] }
  0x56   :  { %2258 = vmatprep.subr.bf16.mxu0 %v2257_v27  ;;  %v272_v27 = vld [vmem:[%s3942_s1 + $0x7a0] sm:$0xff]  ;;  %v2309_v33 = vpack.c.bf16 %v241_v25, %v240_v24  ;;  %v265_v24 = vld [vmem:[%s3942_s1 + $0x768] sm:$0xff]  ;;  %v250_v25 = vld [vmem:[%s3942_s1 + $0x6f0] sm:$0xff] }
  0x57   :  { %2288 = vmatpush3.bf16.msra.mxu1 %v2287_v26  ;;  %v508_v26 = vcombine.high %v3245_v12, %v3245_v12  ;;  %v2341_v36 = vpack.c.bf16 %v273_v28, %v272_v27  ;;  %v282_v27 = vld [vmem:[%s3942_s1 + $0x7f0] sm:$0xff]  ;;  %v283_v28 = vld [vmem:[%s3942_s1 + $0x7f8] sm:$0xff]  ;;  %v289_v11 = vld [vmem:[%s3942_s1 + $0x828] sm:$0xff] }
  0x58   :  { %2290 = vmatprep.subr.bf16.mxu1 %v2289_v31  ;;  %v2339_v31 = vpack.c.bf16 %v255_v23, %v254_v21  ;;  %v233_v21 = vld [vmem:[%s3942_s1 + $0x668] sm:$0xff]  ;;  %v320_v13 = vld [vmem:[%s3942_s1 + $0x920] sm:$0xff] }
  0x59   :  { %2260 = vmatpush3.bf16.msra.mxu0 %v2259_v38  ;;  %v243_v38 = vld [vmem:[%s3942_s1 + $0x6b8] sm:$0xff] }
  0x5a   :  { %2262 = vmatprep.subr.bf16.mxu0 %v2261_v40  ;;  %v275_v40 = vld [vmem:[%s3942_s1 + $0x7b8] sm:$0xff]  ;;  %v2313_v45 = vpack.c.bf16 %v243_v38, %v242_v37  ;;  %v300_v37 = vld [vmem:[%s3942_s1 + $0x880] sm:$0xff]  ;;  %v301_v38 = vld [vmem:[%s3942_s1 + $0x888] sm:$0xff] }
  0x5b   :  { %2292 = vmatpush3.bf16.msra.mxu1 %v2291_v39  ;;  %v274_v39 = vld [vmem:[%s3942_s1 + $0x7b0] sm:$0xff] }
  0x5c   :  { %2294 = vmatprep.subr.bf16.mxu1 %v2293_v46  ;;  %v226_v46 = vld [vmem:[%s3942_s1 + $0x630] sm:$0xff]  ;;  %v2345_v49 = vpack.c.bf16 %v275_v40, %v274_v39  ;;  %v332_v39 = vld [vmem:[%s3942_s1 + $0x980] sm:$0xff]  ;;  %v333_v40 = vld [vmem:[%s3942_s1 + $0x988] sm:$0xff] }
  0x5d   :  { %2264 = vmatpush3.bf16.msra.mxu0 %v2263_v53  ;;  %v245_v53 = vld [vmem:[%s3942_s1 + $0x6c8] sm:$0xff]  ;;  %v2397_v50 = vpack.c.bf16 %v333_v40, %v332_v39 }
  0x5e   :  { %2266 = vmatprep.subr.bf16.mxu0 %v2265_v55  ;;  %v2315_v55 = vpack.c.bf16 %v227_v47, %v226_v46  ;;  %v2317_v57 = vpack.c.bf16 %v245_v53, %v244_v51  ;;  %v2365_v46 = vpack.c.bf16 %v301_v38, %v300_v37  ;;  %v284_v47 = vld [vmem:[%s3942_s1 + $0x800] sm:$0xff]  ;;  %v317_v51 = vld [vmem:[%s3942_s1 + $0x908] sm:$0xff]  ;;  %v302_v53 = vld [vmem:[%s3942_s1 + $0x890] sm:$0xff] }
  0x5f   :  { %2296 = vmatpush3.bf16.msra.mxu1 %v2295_v54  ;;  %v277_v54 = vld [vmem:[%s3942_s1 + $0x7c8] sm:$0xff] }
  0x60   :  { %2298 = vmatprep.subr.bf16.mxu1 %v2297_v58  ;;  %v229_v58 = vld [vmem:[%s3942_s1 + $0x648] sm:$0xff]  ;;  %v2349_v60 = vpack.c.bf16 %v277_v54, %v276_v32  ;;  %v303_v32 = vld [vmem:[%s3942_s1 + $0x898] sm:$0xff] }
  0x61   :  { %2268 = vmatpush3.bf16.msra.mxu0 %v2267_v1  ;;  %v279_v1 = vld [vmem:[%s3942_s1 + $0x7d8] sm:$0xff] }
  0x62   :  { %2302 = vmatprep.subr.bf16.mxu0 %v2301_v3  ;;  %v2351_v3 = vpack.c.bf16 %v261_v61, %v260_v59  ;;  %v2353_v8 = vpack.c.bf16 %v279_v1, %v278_v0  ;;  %v2369_v59 = vpack.c.bf16 %v303_v32, %v302_v53  ;;  %v287_v61 = vld [vmem:[%s3942_s1 + $0x818] sm:$0xff]  ;;  %v304_v1 = vld [vmem:[%s3942_s1 + $0x8a0] sm:$0xff] }
  0x63   :  { %2300 = vmatpush3.bf16.msra.mxu1 %v2299_v2  ;;  %v2319_v2 = vpack.c.bf16 %v229_v58, %v228_v41  ;;  %v2367_v41 = vpack.c.bf16 %v285_v48, %v284_v47  ;;  %v319_v0 = vld [vmem:[%s3942_s1 + $0x918] sm:$0xff] }
  0x64   :  { %2334 = vmatprep.subr.bf16.mxu1 %v2333_v7  ;;  %921 = vmatmul.mubr.f32.vlgmr.msra.gmra.mrb[4].mxu0 %v3053_v43  ;;  %v224_v43 = vld [vmem:[%s3942_s1 + $0x620] sm:$0xff]  ;;  %v262_v7 = vld [vmem:[%s3942_s1 + $0x750] sm:$0xff] }
  0x65   :  { %2304 = vmatpush3.bf16.msra.mxu0 %v2303_v16  ;;  %1060 = vmatprep.mubr.f32.mxu0 %v508_v26  ;;  %v2311_v42 = vpack.c.bf16 %v225_v34, %v224_v43  ;;  %v281_v16 = vld [vmem:[%s3942_s1 + $0x7e8] sm:$0xff]  ;;  %v251_v26 = vld [vmem:[%s3942_s1 + $0x6f8] sm:$0xff]  ;;  %v234_v43 = vld [vmem:[%s3942_s1 + $0x670] sm:$0xff] }
  0x66   :  { %991 = vmatmul.mubr.f32.vlgmr.msra.gmra.mrb[4].mxu1 %v3074_v52  ;;  %2306 = vmatprep.subr.bf16.mxu0 %v2305_v18  ;;  %v257_v52 = vld [vmem:[%s3942_s1 + $0x728] sm:$0xff]  ;;  %v2355_v18 = vpack.c.bf16 %v263_v9, %v262_v7  ;;  %v2357_v23 = vpack.c.bf16 %v281_v16, %v280_v14  ;;  %v235_v34 = vld [vmem:[%s3942_s1 + $0x678] sm:$0xff]  ;;  %v306_v16 = vld [vmem:[%s3942_s1 + $0x8b0] sm:$0xff] }
  0x67   :  { %2336 = vmatpush3.bf16.msra.mxu1 %v2335_v17  ;;  %1130 = vmatprep.mubr.f32.mxu1 %v509_v29  ;;  %v2343_v44 = vpack.c.bf16 %v257_v52, %v256_v35  ;;  %v2323_v17 = vpack.c.bf16 %v231_v6, %v230_v5  ;;  %v2327_v29 = vpack.c.bf16 %v233_v21, %v232_v20  ;;  %v266_v35 = vld [vmem:[%s3942_s1 + $0x770] sm:$0xff]  ;;  %v267_v52 = vld [vmem:[%s3942_s1 + $0x778] sm:$0xff]  ;;  %v337_v5 = vld [vmem:[%s3942_s1 + $0x9a8] sm:$0xff] }
  0x68   :  { %2338 = vmatprep.subr.bf16.mxu1 %v2337_v22  ;;  %v264_v22 = vld [vmem:[%s3942_s1 + $0x760] sm:$0xff] }
  0x69   :  { %2308 = vmatpush3.bf16.msra.mxu0 %v2307_v30  ;;  %v25_v30 = vld [vmem:[%s3941_s0 + $0x20] sm:$0xff] }
  0x6a   :  { %2310 = vmatprep.subr.bf16.mxu0 %v2309_v33  ;;  %v2329_v33 = vpack.c.bf16 %v251_v26, %v250_v25  ;;  %v3452_v54 = vrot.slane %v25_v30, %v2744_v10 }
  0x6b   :  { %2340 = vmatpush3.bf16.msra.mxu1 %v2339_v31  ;;  %v2359_v31 = vpack.c.bf16 %v265_v24, %v264_v22 }
  0x6c   :  { %2342 = vmatprep.subr.bf16.mxu1 %v2341_v36  ;;  %v2361_v36 = vpack.c.bf16 %v283_v28, %v282_v27 }
  0x6d   :  { %2312 = vmatpush3.bf16.msra.mxu0 %v2311_v42  ;;  %v510_v42 = vcombine.high %v25_v30, %v25_v30 }
  0x6e   :  { %2314 = vmatprep.subr.bf16.mxu0 %v2313_v45  ;;  %v2363_v45 = vpack.c.bf16 %v267_v52, %v266_v35 }
  0x6f   :  { %2344 = vmatpush3.bf16.msra.mxu1 %v2343_v44  ;;  %v2331_v44 = vpack.c.bf16 %v235_v34, %v234_v43 }
  0x70   :  { %2346 = vmatprep.subr.bf16.mxu1 %v2345_v49  ;;  %v316_v49 = vld [vmem:[%s3942_s1 + $0x900] sm:$0xff] }
  0x71   :  { %2316 = vmatpush3.bf16.msra.mxu0 %v2315_v55  ;;  %v334_v55 = vld [vmem:[%s3942_s1 + $0x990] sm:$0xff]  ;;  %v2399_v58 = vpack.c.bf16 %v317_v51, %v316_v49 }
  0x72   :  { %2318 = vmatprep.subr.bf16.mxu0 %v2317_v57  ;;  %v3461_v57 = vrot.slane %v510_v42, %v2744_v10 }
  0x73   :  { %2348 = vmatpush3.bf16.msra.mxu1 %v2347_v56  ;;  %v335_v56 = vld [vmem:[%s3942_s1 + $0x998] sm:$0xff] }
  0x74   :  { %2350 = vmatprep.subr.bf16.mxu1 %v2349_v60  ;;  %v286_v60 = vld [vmem:[%s3942_s1 + $0x810] sm:$0xff]  ;;  %v2401_v63 = vpack.c.bf16 %v335_v56, %v334_v55  ;;  %v526_v6 = vcombine.high %v3461_v57, %v3461_v57 }
  0x75   :  { %2320 = vmatpush3.bf16.msra.mxu0 %v2319_v2  ;;  %v305_v2 = vld [vmem:[%s3942_s1 + $0x8a8] sm:$0xff]  ;;  %v2371_v7 = vpack.c.bf16 %v287_v61, %v286_v60 }
  0x76   :  { %2322 = vmatprep.subr.bf16.mxu0 %v2321_v4  ;;  %v336_v4 = vld [vmem:[%s3942_s1 + $0x9a0] sm:$0xff]  ;;  %v2373_v9 = vpack.c.bf16 %v305_v2, %v304_v1 }
  0x77   :  { %2352 = vmatpush3.bf16.msra.mxu1 %v2351_v3  ;;  %v525_v3 = vcombine.high %v3452_v54, %v3452_v54  ;;  %v2405_v14 = vpack.c.bf16 %v337_v5, %v336_v4 }
  0x78   :  { %2354 = vmatprep.subr.bf16.mxu1 %v2353_v8  ;;  %v2403_v8 = vpack.c.bf16 %v319_v0, %v318_v62 }
  0x79   :  { %2324 = vmatpush3.bf16.msra.mxu0 %v2323_v17  ;;  %v307_v17 = vld [vmem:[%s3942_s1 + $0x8b8] sm:$0xff] }
  0x7a   :  { %2326 = vmatprep.subr.bf16.mxu0 %v2325_v19  ;;  %v339_v19 = vld [vmem:[%s3942_s1 + $0x9b8] sm:$0xff] }
  0x7b   :  { %2356 = vmatpush3.bf16.msra.mxu1 %v2355_v18  ;;  %v338_v18 = vld [vmem:[%s3942_s1 + $0x9b0] sm:$0xff] }
  0x7c   :  { %2358 = vmatprep.subr.bf16.mxu1 %v2357_v23 }
  0x7d   :  { %2328 = vmatpush3.bf16.msra.mxu0 %v2327_v29 }
  0x7e   :  { %2330 = vmatprep.subr.bf16.mxu0 %v2329_v33 }
  0x7f   :  { %2360 = vmatpush3.bf16.msra.mxu1 %v2359_v31 }
  0x80   :  { %2362 = vmatprep.subr.bf16.mxu1 %v2361_v36 }
  0x81   :  { %2332 = vmatpush3.bf16.msra.mxu0 %v2331_v44 }
  0x82   :  { %2366 = vmatprep.subr.bf16.mxu0 %v2365_v46 }
  0x83   :  { %2364 = vmatpush3.bf16.msra.mxu1 %v2363_v45 }
  0x84   :  { %2398 = vmatprep.subr.bf16.mxu1 %v2397_v50  ;;  %1061 = vmatmul.mubr.f32.vlgmr.msra.gmra.mrb[6].mxu0 %v3245_v12  ;;  %v288_v12 = vld [vmem:[%s3942_s1 + $0x820] sm:$0xff] }
  0x85   :  { %2368 = vmatpush3.bf16.msra.mxu0 %v2367_v41  ;;  %1200 = vmatprep.mubr.f32.mxu0 %v525_v3  ;;  %v2375_v20 = vpack.c.bf16 %v289_v11, %v288_v12 }
  0x86   :  { %1131 = vmatmul.mubr.f32.vlgmr.msra.gmra.mrb[6].mxu1 %v3254_v15  ;;  %2370 = vmatprep.subr.bf16.mxu0 %v2369_v59  ;;  %v321_v15 = vld [vmem:[%s3942_s1 + $0x928] sm:$0xff] }
  0x87   :  { %2400 = vmatpush3.bf16.msra.mxu1 %v2399_v58  ;;  %1270 = vmatprep.mubr.f32.mxu1 %v526_v6 }
  0x88   :  { %2402 = vmatprep.subr.bf16.mxu1 %v2401_v63 }
  0x89   :  { %2372 = vmatpush3.bf16.msra.mxu0 %v2371_v7 }
  0x8a   :  { %10 = vsyncpa [#allocation3], 0  ;;  %2374 = vmatprep.subr.bf16.mxu0 %v2373_v9  ;;  %v2407_v21 = vpack.c.bf16 %v321_v15, %v320_v13  ;;  %v2377_v22 = vpack.c.bf16 %v307_v17, %v306_v16  ;;  %v290_v23 = vld [vmem:[%s3942_s1 + $0x830] sm:$0xff]  ;;  %v291_v24 = vld [vmem:[%s3942_s1 + $0x838] sm:$0xff]  ;;  %v2409_v26 = vpack.c.bf16 %v339_v19, %v338_v18  ;;  %vm2567_vm0 = vmmov 0   ;;  %s2569_s21 = smov [#allocation2]  }
  0x8b   :  { %2404 = vmatpush3.bf16.msra.mxu1 %v2403_v8  ;;  %v322_v25 = vld [vmem:[%s3942_s1 + $0x930] sm:$0xff]  ;;  %v323_v27 = vld [vmem:[%s3942_s1 + $0x938] sm:$0xff]  ;;  %v308_v28 = vld [vmem:[%s3942_s1 + $0x8c0] sm:$0xff]  ;;  %v2379_v33 = vpack.c.bf16 %v291_v24, %v290_v23  ;;  %vm1505_vm1 = vcmask 1041408   ;;  %vm1501_vm2 = vcmask 408576   ;;  %vm1579_vm3 = vcmask 91136  }
  0x8c   :  { %2406 = vmatprep.subr.bf16.mxu1 %v2405_v14  ;;  %v309_v29 = vld [vmem:[%s3942_s1 + $0x8c8] sm:$0xff]  ;;  %v340_v30 = vld [vmem:[%s3942_s1 + $0x9c0] sm:$0xff]  ;;  %v2411_v43 = vpack.c.bf16 %v323_v27, %v322_v25  ;;  %v310_v39 = vld [vmem:[%s3942_s1 + $0x8d0] sm:$0xff] }
  0x8d   :  { %v341_v31 = vld [vmem:[%s3942_s1 + $0x9c8] sm:$0xff]  ;;  %2376 = vmatpush3.bf16.msra.mxu0 %v2375_v20  ;;  %v2381_v34 = vpack.c.bf16 %v309_v29, %v308_v28  ;;  %v292_v35 = vld [vmem:[%s3942_s1 + $0x840] sm:$0xff]  ;;  %v311_v40 = vld [vmem:[%s3942_s1 + $0x8d8] sm:$0xff] }
  0x8e   :  { %2378 = vmatprep.subr.bf16.mxu0 %v2377_v22  ;;  %v293_v36 = vld [vmem:[%s3942_s1 + $0x848] sm:$0xff]  ;;  %v324_v52 = vld [vmem:[%s3942_s1 + $0x940] sm:$0xff]  ;;  %v2413_v37 = vpack.c.bf16 %v341_v31, %v340_v30  ;;  %v342_v42 = vld [vmem:[%s3942_s1 + $0x9d0] sm:$0xff]  ;;  %v2385_v47 = vpack.c.bf16 %v311_v40, %v310_v39 }
  0x8f   :  { %2408 = vmatpush3.bf16.msra.mxu1 %v2407_v21  ;;  %v325_v38 = vld [vmem:[%s3942_s1 + $0x948] sm:$0xff]  ;;  %v343_v44 = vld [vmem:[%s3942_s1 + $0x9d8] sm:$0xff]  ;;  %v2383_v45 = vpack.c.bf16 %v293_v36, %v292_v35  ;;  %v294_v48 = vld [vmem:[%s3942_s1 + $0x850] sm:$0xff] }
  0x90   :  { %2410 = vmatprep.subr.bf16.mxu1 %v2409_v26  ;;  %v2415_v46 = vpack.c.bf16 %v325_v38, %v324_v52  ;;  %v295_v49 = vld [vmem:[%s3942_s1 + $0x858] sm:$0xff]  ;;  %v326_v50 = vld [vmem:[%s3942_s1 + $0x950] sm:$0xff]  ;;  %v2417_v51 = vpack.c.bf16 %v343_v44, %v342_v42  ;;  %v312_v32 = vld [vmem:[%s3942_s1 + $0x8e0] sm:$0xff] }
  0x91   :  { %2380 = vmatpush3.bf16.msra.mxu0 %v2379_v33  ;;  %v327_v53 = vld [vmem:[%s3942_s1 + $0x958] sm:$0xff]  ;;  %v313_v55 = vld [vmem:[%s3942_s1 + $0x8e8] sm:$0xff]  ;;  %v344_v56 = vld [vmem:[%s3942_s1 + $0x9e0] sm:$0xff]  ;;  %v2387_v58 = vpack.c.bf16 %v295_v49, %v294_v48 }
  0x92   :  { %2382 = vmatprep.subr.bf16.mxu0 %v2381_v34  ;;  %v345_v41 = vld [vmem:[%s3942_s1 + $0x9e8] sm:$0xff]  ;;  %v2419_v59 = vpack.c.bf16 %v327_v53, %v326_v50  ;;  %v2389_v60 = vpack.c.bf16 %v313_v55, %v312_v32  ;;  %v296_v61 = vld [vmem:[%s3942_s1 + $0x860] sm:$0xff]  ;;  %v314_v2 = vld [vmem:[%s3942_s1 + $0x8f0] sm:$0xff] }
  0x93   :  { %2412 = vmatpush3.bf16.msra.mxu1 %v2411_v43  ;;  %v297_v62 = vld [vmem:[%s3942_s1 + $0x868] sm:$0xff]  ;;  %v328_v63 = vld [vmem:[%s3942_s1 + $0x960] sm:$0xff]  ;;  %v2421_v0 = vpack.c.bf16 %v345_v41, %v344_v56  ;;  %v315_v3 = vld [vmem:[%s3942_s1 + $0x8f8] sm:$0xff] }
  0x94   :  { %2414 = vmatprep.subr.bf16.mxu1 %v2413_v37  ;;  %v329_v1 = vld [vmem:[%s3942_s1 + $0x968] sm:$0xff]  ;;  %v346_v4 = vld [vmem:[%s3942_s1 + $0x9f0] sm:$0xff]  ;;  %v347_v5 = vld [vmem:[%s3942_s1 + $0x9f8] sm:$0xff]  ;;  %v2391_v6 = vpack.c.bf16 %v297_v62, %v296_v61  ;;  %v2393_v9 = vpack.c.bf16 %v315_v3, %v314_v2 }
  0x95   :  { %2384 = vmatpush3.bf16.msra.mxu0 %v2383_v45  ;;  %v26_v7 = vld [vmem:[%s3941_s0 + $0x28] sm:$0xff]  ;;  %v2423_v8 = vpack.c.bf16 %v329_v1, %v328_v63  ;;  %v298_v12 = vld [vmem:[%s3942_s1 + $0x870] sm:$0xff]  ;;  %v299_v11 = vld [vmem:[%s3942_s1 + $0x878] sm:$0xff]  ;;  %v2425_v14 = vpack.c.bf16 %v347_v5, %v346_v4 }
  0x96   :  { %2386 = vmatprep.subr.bf16.mxu0 %v2385_v47  ;;  %v330_v13 = vld [vmem:[%s3942_s1 + $0x970] sm:$0xff]  ;;  %v331_v15 = vld [vmem:[%s3942_s1 + $0x978] sm:$0xff]  ;;  %v364_v16 = vld [vmem:[%s3942_s1 + $0xa80] sm:$0xff]  ;;  %v527_v20 = vcombine.high %v26_v7, %v26_v7  ;;  %v2395_v21 = vpack.c.bf16 %v299_v11, %v298_v12  ;;  %v3659_v31 = vrot.slane %v26_v7, %v2744_v10 }
  0x97   :  { %2416 = vmatpush3.bf16.msra.mxu1 %v2415_v46  ;;  %v365_v17 = vld [vmem:[%s3942_s1 + $0xa88] sm:$0xff]  ;;  %v396_v18 = vld [vmem:[%s3942_s1 + $0xb80] sm:$0xff]  ;;  %v2427_v22 = vpack.c.bf16 %v331_v15, %v330_v13  ;;  %v366_v29 = vld [vmem:[%s3942_s1 + $0xa90] sm:$0xff] }
  0x98   :  { %2418 = vmatprep.subr.bf16.mxu1 %v2417_v51  ;;  %v397_v19 = vld [vmem:[%s3942_s1 + $0xb88] sm:$0xff]  ;;  %v2429_v23 = vpack.c.bf16 %v365_v17, %v364_v16  ;;  %v348_v24 = vld [vmem:[%s3942_s1 + $0xa00] sm:$0xff]  ;;  %v367_v30 = vld [vmem:[%s3942_s1 + $0xa98] sm:$0xff]  ;;  %v3668_v34 = vrot.slane %v527_v20, %v2744_v10  ;;  %v542_v45 = vcombine.high %v3659_v31, %v3659_v31 }
  0x99   :  { %2388 = vmatpush3.bf16.msra.mxu0 %v2387_v58  ;;  %v349_v25 = vld [vmem:[%s3942_s1 + $0xa08] sm:$0xff]  ;;  %v380_v26 = vld [vmem:[%s3942_s1 + $0xb00] sm:$0xff]  ;;  %v2461_v27 = vpack.c.bf16 %v397_v19, %v396_v18  ;;  %v398_v33 = vld [vmem:[%s3942_s1 + $0xb90] sm:$0xff]  ;;  %v2433_v52 = vpack.c.bf16 %v367_v30, %v366_v29 }
  0x9a   :  { %2390 = vmatprep.subr.bf16.mxu0 %v2389_v60  ;;  %v381_v28 = vld [vmem:[%s3942_s1 + $0xb08] sm:$0xff]  ;;  %v399_v43 = vld [vmem:[%s3942_s1 + $0xb98] sm:$0xff]  ;;  %v2431_v35 = vpack.c.bf16 %v349_v25, %v348_v24  ;;  %v350_v37 = vld [vmem:[%s3942_s1 + $0xa10] sm:$0xff]  ;;  %v543_v48 = vcombine.high %v3668_v34, %v3668_v34 }
  0x9b   :  { %2420 = vmatpush3.bf16.msra.mxu1 %v2419_v59  ;;  %v2463_v36 = vpack.c.bf16 %v381_v28, %v380_v26  ;;  %v351_v38 = vld [vmem:[%s3942_s1 + $0xa18] sm:$0xff]  ;;  %v382_v39 = vld [vmem:[%s3942_s1 + $0xb10] sm:$0xff]  ;;  %v2465_v10 = vpack.c.bf16 %v399_v43, %v398_v33  ;;  %v368_v42 = vld [vmem:[%s3942_s1 + $0xaa0] sm:$0xff] }
  0x9c   :  { %2422 = vmatprep.subr.bf16.mxu1 %v2421_v0  ;;  %v383_v40 = vld [vmem:[%s3942_s1 + $0xb18] sm:$0xff]  ;;  %v369_v44 = vld [vmem:[%s3942_s1 + $0xaa8] sm:$0xff]  ;;  %v400_v46 = vld [vmem:[%s3942_s1 + $0xba0] sm:$0xff]  ;;  %v2435_v49 = vpack.c.bf16 %v351_v38, %v350_v37 }
  0x9d   :  { %2392 = vmatpush3.bf16.msra.mxu0 %v2391_v6  ;;  %v401_v47 = vld [vmem:[%s3942_s1 + $0xba8] sm:$0xff]  ;;  %v2467_v50 = vpack.c.bf16 %v383_v40, %v382_v39  ;;  %v2437_v51 = vpack.c.bf16 %v369_v44, %v368_v42  ;;  %v384_v32 = vld [vmem:[%s3942_s1 + $0xb20] sm:$0xff]  ;;  %v370_v56 = vld [vmem:[%s3942_s1 + $0xab0] sm:$0xff] }
  0x9e   :  { %2394 = vmatprep.subr.bf16.mxu0 %v2393_v9  ;;  %v353_v53 = vld [vmem:[%s3942_s1 + $0xa28] sm:$0xff]  ;;  %v2469_v55 = vpack.c.bf16 %v401_v47, %v400_v46  ;;  %v371_v41 = vld [vmem:[%s3942_s1 + $0xab8] sm:$0xff]  ;;  %v402_v58 = vld [vmem:[%s3942_s1 + $0xbb0] sm:$0xff] }
  0x9f   :  { %2424 = vmatpush3.bf16.msra.mxu1 %v2423_v8  ;;  %v403_v59 = vld [vmem:[%s3942_s1 + $0xbb8] sm:$0xff]  ;;  %v2441_v62 = vpack.c.bf16 %v371_v41, %v370_v56  ;;  %v354_v63 = vld [vmem:[%s3942_s1 + $0xa30] sm:$0xff]  ;;  %v372_v4 = vld [vmem:[%s3942_s1 + $0xac0] sm:$0xff] }
  0xa0   :  { %2426 = vmatprep.subr.bf16.mxu1 %v2425_v14  ;;  %v355_v0 = vld [vmem:[%s3942_s1 + $0xa38] sm:$0xff]  ;;  %v386_v1 = vld [vmem:[%s3942_s1 + $0xb30] sm:$0xff]  ;;  %v2473_v2 = vpack.c.bf16 %v403_v59, %v402_v58  ;;  %v373_v5 = vld [vmem:[%s3942_s1 + $0xac8] sm:$0xff]  ;;  %v2566_v59 = vmov 0.0|0.0  }
  0xa1   :  { %2396 = vmatpush3.bf16.msra.mxu0 %v2395_v21  ;;  %v387_v3 = vld [vmem:[%s3942_s1 + $0xb38] sm:$0xff]  ;;  %v404_v6 = vld [vmem:[%s3942_s1 + $0xbc0] sm:$0xff]  ;;  %v405_v7 = vld [vmem:[%s3942_s1 + $0xbc8] sm:$0xff]  ;;  %v2443_v8 = vpack.c.bf16 %v355_v0, %v354_v63  ;;  %v2445_v12 = vpack.c.bf16 %v373_v5, %v372_v4 }
  0xa2   :  { %2430 = vmatprep.subr.bf16.mxu0 %v2429_v23  ;;  %v2475_v9 = vpack.c.bf16 %v387_v3, %v386_v1  ;;  %v356_v11 = vld [vmem:[%s3942_s1 + $0xa40] sm:$0xff]  ;;  %v357_v13 = vld [vmem:[%s3942_s1 + $0xa48] sm:$0xff]  ;;  %v2477_v15 = vpack.c.bf16 %v405_v7, %v404_v6  ;;  %v374_v17 = vld [vmem:[%s3942_s1 + $0xad0] sm:$0xff]  ;;  %v2568_v1 = vmov 0.0  }
  0xa3   :  { %2428 = vmatpush3.bf16.msra.mxu1 %v2427_v22  ;;  %v388_v14 = vld [vmem:[%s3942_s1 + $0xb40] sm:$0xff]  ;;  %v389_v16 = vld [vmem:[%s3942_s1 + $0xb48] sm:$0xff]  ;;  %v375_v18 = vld [vmem:[%s3942_s1 + $0xad8] sm:$0xff]  ;;  %v2447_v21 = vpack.c.bf16 %v357_v13, %v356_v11 }
  0xa4   :  { %2462 = vmatprep.subr.bf16.mxu1 %v2461_v27  ;;  %1201 = vmatmul.mubr.f32.vlgmr.msra.gmra.mrb[8].mxu0 %v3452_v54  ;;  %v352_v54 = vld [vmem:[%s3942_s1 + $0xa20] sm:$0xff]  ;;  %v406_v19 = vld [vmem:[%s3942_s1 + $0xbd0] sm:$0xff]  ;;  %v407_v20 = vld [vmem:[%s3942_s1 + $0xbd8] sm:$0xff]  ;;  %v2479_v22 = vpack.c.bf16 %v389_v16, %v388_v14  ;;  %v2449_v23 = vpack.c.bf16 %v375_v18, %v374_v17 }
  0xa5   :  { %2432 = vmatpush3.bf16.msra.mxu0 %v2431_v35  ;;  %1340 = vmatprep.mubr.f32.mxu0 %v542_v45  ;;  %v2439_v60 = vpack.c.bf16 %v353_v53, %v352_v54  ;;  %v358_v24 = vld [vmem:[%s3942_s1 + $0xa50] sm:$0xff]  ;;  %v359_v25 = vld [vmem:[%s3942_s1 + $0xa58] sm:$0xff]  ;;  %v2481_v27 = vpack.c.bf16 %v407_v20, %v406_v19  ;;  %v376_v29 = vld [vmem:[%s3942_s1 + $0xae0] sm:$0xff] }
  0xa6   :  { %1271 = vmatmul.mubr.f32.vlgmr.msra.gmra.mrb[8].mxu1 %v3461_v57  ;;  %2434 = vmatprep.subr.bf16.mxu0 %v2433_v52  ;;  %v385_v57 = vld [vmem:[%s3942_s1 + $0xb28] sm:$0xff]  ;;  %v390_v26 = vld [vmem:[%s3942_s1 + $0xb50] sm:$0xff]  ;;  %v391_v28 = vld [vmem:[%s3942_s1 + $0xb58] sm:$0xff]  ;;  %v2451_v35 = vpack.c.bf16 %v359_v25, %v358_v24 }
  0xa7   :  { %2464 = vmatpush3.bf16.msra.mxu1 %v2463_v36  ;;  %1410 = vmatprep.mubr.f32.mxu1 %v543_v48  ;;  %v2471_v61 = vpack.c.bf16 %v385_v57, %v384_v32  ;;  %v377_v30 = vld [vmem:[%s3942_s1 + $0xae8] sm:$0xff]  ;;  %v408_v33 = vld [vmem:[%s3942_s1 + $0xbe0] sm:$0xff]  ;;  %v2483_v36 = vpack.c.bf16 %v391_v28, %v390_v26  ;;  %v378_v42 = vld [vmem:[%s3942_s1 + $0xaf0] sm:$0xff] }
  0xa8   :  { %2466 = vmatprep.subr.bf16.mxu1 %v2465_v10  ;;  %v409_v43 = vld [vmem:[%s3942_s1 + $0xbe8] sm:$0xff]  ;;  %v2453_v52 = vpack.c.bf16 %v377_v30, %v376_v29  ;;  %v360_v37 = vld [vmem:[%s3942_s1 + $0xa60] sm:$0xff]  ;;  %v379_v44 = vld [vmem:[%s3942_s1 + $0xaf8] sm:$0xff] }
  0xa9   :  { %2436 = vmatpush3.bf16.msra.mxu0 %v2435_v49  ;;  %v361_v38 = vld [vmem:[%s3942_s1 + $0xa68] sm:$0xff]  ;;  %v392_v39 = vld [vmem:[%s3942_s1 + $0xb60] sm:$0xff]  ;;  %v2485_v10 = vpack.c.bf16 %v409_v43, %v408_v33  ;;  %v410_v45 = vld [vmem:[%s3942_s1 + $0xbf0] sm:$0xff]  ;;  %v2457_v49 = vpack.c.bf16 %v379_v44, %v378_v42 }
  0xaa   :  { %2438 = vmatprep.subr.bf16.mxu0 %v2437_v51  ;;  %v393_v40 = vld [vmem:[%s3942_s1 + $0xb68] sm:$0xff]  ;;  %v411_v46 = vld [vmem:[%s3942_s1 + $0xbf8] sm:$0xff]  ;;  %v2455_v47 = vpack.c.bf16 %v361_v38, %v360_v37  ;;  %v394_v53 = vld [vmem:[%s3942_s1 + $0xb70] sm:$0xff] }
  0xab   :  { %2468 = vmatpush3.bf16.msra.mxu1 %v2467_v50  ;;  %v2487_v48 = vpack.c.bf16 %v393_v40, %v392_v39  ;;  %v362_v50 = vld [vmem:[%s3942_s1 + $0xa70] sm:$0xff]  ;;  %v363_v51 = vld [vmem:[%s3942_s1 + $0xa78] sm:$0xff]  ;;  %v2489_v54 = vpack.c.bf16 %v411_v46, %v410_v45  ;;  %v412_v56 = vld [vmem:[%s3942_s1 + $0xc00] sm:$0xff] }
  0xac   :  { %2470 = vmatprep.subr.bf16.mxu1 %v2469_v55  ;;  %v395_v32 = vld [vmem:[%s3942_s1 + $0xb78] sm:$0xff]  ;;  %v2459_v55 = vpack.c.bf16 %v363_v51, %v362_v50  ;;  %v413_v41 = vld [vmem:[%s3942_s1 + $0xc08] sm:$0xff]  ;;  %v416_v63 = vld [vmem:[%s3942_s1 + $0xc20] sm:$0xff] }
  0xad   :  { %2440 = vmatpush3.bf16.msra.mxu0 %v2439_v60  ;;  %v2491_v57 = vpack.c.bf16 %v395_v32, %v394_v53  ;;  %v2494_v58 = vpack.c.bf16 %v413_v41, %v412_v56  ;;  %v414_v60 = vld [vmem:[%s3942_s1 + $0xc10] sm:$0xff]  ;;  %v417_v0 = vld [vmem:[%s3942_s1 + $0xc28] sm:$0xff]  ;;  %v420_v4 = vld [vmem:[%s3942_s1 + $0xc40] sm:$0xff] }
  0xae   :  { %2442 = vmatprep.subr.bf16.mxu0 %v2441_v62  ;;  %v421_v5 = vld [vmem:[%s3942_s1 + $0xc48] sm:$0xff]  ;;  %v422_v7 = vld [vmem:[%s3942_s1 + $0xc50] sm:$0xff]  ;;  %v1607_v19 = vld [vmem:[%s3943_s2] ss:$0 sm:$0xff] }
  0xaf   :  { %2472 = vmatpush3.bf16.msra.mxu1 %v2471_v61  ;;  %v415_v61 = vld [vmem:[%s3942_s1 + $0xc18] sm:$0xff]  ;;  %v2506_v6 = vpack.c.bf16 %v421_v5, %v420_v4  ;;  %v425_v11 = vld [vmem:[%s3942_s1 + $0xc68] sm:$0xff]  ;;  %v426_v14 = vld [vmem:[%s3942_s1 + $0xc70] sm:$0xff] }
  0xb0   :  { %2474 = vmatprep.subr.bf16.mxu1 %v2473_v2  ;;  %v2497_v62 = vpack.c.bf16 %v415_v61, %v414_v60  ;;  %v419_v2 = vld [vmem:[%s3942_s1 + $0xc38] sm:$0xff]  ;;  %v1608_v17 = vld.sshfl [vmem:[%s3941_s0 + $0x30] sm:$0x3 pattern:$0x76325410]  ;;  %v1491_v42 = vld [vmem:[%s3944_s3 + $0x20] sm:$0xff] }
  0xb1   :  { %2444 = vmatpush3.bf16.msra.mxu0 %v2443_v8  ;;  %v423_v8 = vld [vmem:[%s3942_s1 + $0xc58] sm:$0xff]  ;;  %v1489_v37 = vld [vmem:[%s3944_s3 + $0x10] sm:$0xff]  ;;  %v1492_v44 = vld [vmem:[%s3944_s3 + $0x28] sm:$0xff] }
  0xb2   :  { %2446 = vmatprep.subr.bf16.mxu0 %v2445_v12  ;;  %v424_v12 = vld [vmem:[%s3942_s1 + $0xc60] sm:$0xff]  ;;  %v1490_v39 = vld [vmem:[%s3944_s3 + $0x18] sm:$0xff]  ;;  %v2524_v45 = vpack.c.bf16 %v1492_v44, %v1491_v42 }
  0xb3   :  { %2476 = vmatpush3.bf16.msra.mxu1 %v2475_v9  ;;  %v2509_v9 = vpack.c.bf16 %v423_v8, %v422_v7  ;;  %v2512_v13 = vpack.c.bf16 %v425_v11, %v424_v12  ;;  %v2521_v40 = vpack.c.bf16 %v1490_v39, %v1489_v37 }
  0xb4   :  { %2478 = vmatprep.subr.bf16.mxu1 %v2477_v15  ;;  %v427_v15 = vld [vmem:[%s3942_s1 + $0xc78] sm:$0xff] }
  0xb5   :  { %2448 = vmatpush3.bf16.msra.mxu0 %v2447_v21  ;;  %v2515_v16 = vpack.c.bf16 %v427_v15, %v426_v14 }
  0xb6   :  { %2450 = vmatprep.subr.bf16.mxu0 %v2449_v23 }
  0xb7   :  { %2480 = vmatpush3.bf16.msra.mxu1 %v2479_v22 }
  0xb8   :  { %2482 = vmatprep.subr.bf16.mxu1 %v2481_v27 }
  0xb9   :  { %2452 = vmatpush3.bf16.msra.mxu0 %v2451_v35 }
  0xba   :  { %2454 = vmatprep.subr.bf16.mxu0 %v2453_v52  ;;  %v1488_v52 = vld [vmem:[%s3944_s3 + $0x8] sm:$0xff] }
  0xbb   :  { %2484 = vmatpush3.bf16.msra.mxu1 %v2483_v36  ;;  %v1487_v36 = vld [vmem:[%s3944_s3] sm:$0xff] }
  0xbc   :  { %2486 = vmatprep.subr.bf16.mxu1 %v2485_v10  ;;  %v2518_v38 = vpack.c.bf16 %v1488_v52, %v1487_v36 }
  0xbd   :  { %2456 = vmatpush3.bf16.msra.mxu0 %v2455_v47 }
  0xbe   :  { %2458 = vmatprep.subr.bf16.mxu0 %v2457_v49 }
  0xbf   :  { %2488 = vmatpush3.bf16.msra.mxu1 %v2487_v48 }
  0xc0   :  { %2490 = vmatprep.subr.bf16.mxu1 %v2489_v54  ;;  %v1493_v54 = vld [vmem:[%s3944_s3 + $0x30] sm:$0x3] }
  0xc1   :  { %2460 = vmatpush3.bf16.msra.mxu0 %v2459_v55 }
  0xc2   :  { %2493 = vmatprep.subr.bf16.mxu0 %v2566_v59 }
  0xc3   :  { %2492 = vmatpush3.bf16.msra.mxu1 %v2491_v57 }
  0xc4   :  { %2517 = vmatprep.subr.bf16.mxu1 %v2566_v59  ;;  %1341 = vmatmul.mubr.f32.vlgmr.msra.gmra.mrb[10].mxu0 %v3659_v31  ;;  %v2500_v31 = vpack.c.bf16 %v417_v0, %v416_v63 }
  0xc5   :  { %2495 = vmatpush3.bf16.msra.mxu0 %v2494_v58  ;;  %2089 = vmatprep.mubr.msk.f32.mxu0 %vm2567_vm0, %v2568_v1 }
  0xc6   :  { %1411 = vmatmul.mubr.f32.vlgmr.msra.gmra.mrb[10].mxu1 %v3668_v34  ;;  %2496 = vmatprep.subr.bf16.mxu0 %v2566_v59  ;;  %v418_v34 = vld [vmem:[%s3942_s1 + $0xc30] sm:$0xff] }
  0xc7   :  { %2106 = vmatprep.mubr.msk.f32.mxu1 %vm2567_vm0, %v2568_v1  ;;  %v2503_v3 = vpack.c.bf16 %v419_v2, %v418_v34  ;;  %2519 = vmatpush3.bf16.msra.mxu1 %v2518_v38 }
  0xc8   :  { %2520 = vmatprep.subr.bf16.mxu1 %v2566_v59 }
  0xc9   :  { %2498 = vmatpush3.bf16.msra.mxu0 %v2497_v62 }
  0xca   :  { %2499 = vmatprep.subr.bf16.mxu0 %v2566_v59 }
  0xcb   :  { %2522 = vmatpush3.bf16.msra.mxu1 %v2521_v40 }
  0xcc   :  { %2523 = vmatprep.subr.bf16.mxu1 %v2566_v59 }
  0xcd   :  { %2501 = vmatpush3.bf16.msra.mxu0 %v2500_v31 }
  0xce   :  { %2502 = vmatprep.subr.bf16.mxu0 %v2566_v59 }
  0xcf   :  { %2525 = vmatpush3.bf16.msra.mxu1 %v2524_v45 }
  0xd0   :  { %2104 = vmatprep.subr.mxu1 %v2568_v1 }
  0xd1   :  { %2504 = vmatpush3.bf16.msra.mxu0 %v2503_v3 }
  0xd2   :  { %2505 = vmatprep.subr.bf16.mxu0 %v2566_v59 }
  0xd3   :  { %2105 = vmatpush3.msk.msra.mxu1 %vm1505_vm1, %v1493_v54 }
  0xd5   :  { %2507 = vmatpush3.bf16.msra.mxu0 %v2506_v6 }
  0xd6   :  { %2508 = vmatprep.subr.bf16.mxu0 %v2566_v59 }
  0xd9   :  { %2510 = vmatpush3.bf16.msra.mxu0 %v2509_v9 }
  0xda   :  { %2511 = vmatprep.subr.bf16.mxu0 %v2566_v59 }
  0xdd   :  { %2513 = vmatpush3.bf16.msra.mxu0 %v2512_v13 }
  0xde   :  { %2514 = vmatprep.subr.bf16.mxu0 %v2566_v59 }
  0xe1   :  { %2516 = vmatpush3.bf16.msra.mxu0 %v2515_v16 }
  0xe4   :  { %2090 = vmatmul.mubr.f32.vlgmr.msra.gmra.mrb[12].mxu0 %v1608_v17  ;;  %v1609_v17 = vld [vmem:[%s3945_s4] ss:$0 sm:$0xff]  ;;  %s1599_s4 = sshll.u32 %s2569_s21, 4  ;;  %s1600_s4 = int_to_ptr.vmem [resolvable:$true] %s1599_s4 }
  0xe5   :  { %s2541_s22 = scalar_lea.vmem %s1600_s4, 32  ;;  %p2546_p1 = scmp.lt.s32.totalorder %s1600_s4, %s1600_s4 }
  0xe6   :  { %p2542_p0 = scmp.ne.s32.totalorder %s1600_s4, %s2541_s22  ;;  %p2547_p2 = scmp.lt.s32.totalorder %s2541_s22, %s2541_s22 }
  0xe8   :  { %p2548_p3 = por %p2547_p2, %p2546_p1 }
  0xea   :  { %p2549_p4 = pnand %p2548_p3, %p2542_p0 }
  0xf7   :  { %v1644_v18 = vpop.f32.mrb[0].mxu0 }
  0xf8   :  { %v1645_v20 = vpop.f32.mrb[1].mxu0 }
  0xf9   :  { %v1679_v21 = vpop.f32.mrb[0].mxu1  ;;  %v1646_v22 = vadd.f32 %v1645_v20, %v1644_v18 }
  0xfa   :  { %v1680_v23 = vpop.f32.mrb[1].mxu1 }
  0xfb   :  { %v1681_v24 = vadd.f32 %v1680_v23, %v1679_v21  ;;  %v643_v25 = vadd.f32 %v1646_v22, %v1607_v19 }
  0xfd   :  { %v713_v26 = vadd.f32 %v1681_v24, %v643_v25 }
 0x117   :  { %v1714_v27 = vpop.f32.mrb[2].mxu0 }
 0x118   :  { %v1715_v28 = vpop.f32.mrb[3].mxu0 }
 0x119   :  { %v1749_v29 = vpop.f32.mrb[2].mxu1  ;;  %v1716_v30 = vadd.f32 %v1715_v28, %v1714_v27 }
 0x11a   :  { %v1750_v33 = vpop.f32.mrb[3].mxu1 }
 0x11b   :  { %v1751_v43 = vadd.f32 %v1750_v33, %v1749_v29  ;;  %v783_v35 = vadd.f32 %v1716_v30, %v713_v26 }
 0x11d   :  { %v853_v10 = vadd.f32 %v1751_v43, %v783_v35 }
 0x137   :  { %v1784_v46 = vpop.f32.mrb[4].mxu0 }
 0x138   :  { %v1785_v47 = vpop.f32.mrb[5].mxu0 }
 0x139   :  { %v1819_v48 = vpop.f32.mrb[4].mxu1  ;;  %v1786_v49 = vadd.f32 %v1785_v47, %v1784_v46 }
 0x13a   :  { %v1820_v50 = vpop.f32.mrb[5].mxu1 }
 0x13b   :  { %v1821_v51 = vadd.f32 %v1820_v50, %v1819_v48  ;;  %v923_v53 = vadd.f32 %v1786_v49, %v853_v10 }
 0x13d   :  { %v993_v32 = vadd.f32 %v1821_v51, %v923_v53 }
 0x157   :  { %v1854_v55 = vpop.f32.mrb[6].mxu0 }
 0x158   :  { %v1855_v57 = vpop.f32.mrb[7].mxu0 }
 0x159   :  { %v1889_v56 = vpop.f32.mrb[6].mxu1  ;;  %v1856_v41 = vadd.f32 %v1855_v57, %v1854_v55 }
 0x15a   :  { %v1890_v58 = vpop.f32.mrb[7].mxu1 }
 0x15b   :  { %v1891_v59 = vadd.f32 %v1890_v58, %v1889_v56  ;;  %v1063_v60 = vadd.f32 %v1856_v41, %v993_v32 }
 0x15d   :  { %v1133_v61 = vadd.f32 %v1891_v59, %v1063_v60 }
 0x177   :  { %v1924_v62 = vpop.f32.mrb[8].mxu0 }
 0x178   :  { %v1925_v63 = vpop.f32.mrb[9].mxu0 }
 0x179   :  { %v1959_v0 = vpop.f32.mrb[8].mxu1  ;;  %v1926_v1 = vadd.f32 %v1925_v63, %v1924_v62 }
 0x17a   :  { %v1960_v31 = vpop.f32.mrb[9].mxu1 }
 0x17b   :  { %v1961_v34 = vadd.f32 %v1960_v31, %v1959_v0  ;;  %v1203_v2 = vadd.f32 %v1926_v1, %v1133_v61 }
 0x17d   :  { %v1273_v3 = vadd.f32 %v1961_v34, %v1203_v2 }
 0x197   :  { %v1994_v4 = vpop.f32.mrb[10].mxu0 }
 0x198   :  { %v1995_v5 = vpop.f32.mrb[11].mxu0 }
 0x199   :  { %v2029_v6 = vpop.f32.mrb[10].mxu1  ;;  %v1996_v7 = vadd.f32 %v1995_v5, %v1994_v4 }
 0x19a   :  { %v2030_v8 = vpop.f32.mrb[11].mxu1 }
 0x19b   :  { %v2031_v9 = vadd.f32 %v2030_v8, %v2029_v6  ;;  %v1343_v12 = vadd.f32 %v1996_v7, %v1273_v3 }
 0x19d   :  { %v1413_v11 = vadd.f32 %v2031_v9, %v1343_v12 }
 0x1b7   :  { %v1482_v13 = vpop.f32.mrb[12].mxu0 }
 0x1b8   :  { %v1483_v14 = vadd.f32 %v1482_v13, %v1413_v11  ;;  %v2091_v15 = vpop.f32.mrb[13].mxu0 }
 0x1ba   :  { %v1486_v16 = vmax.f32 %v1483_v14, 0.0 }
 0x1bc   :  { %2107 = vmatmul.mubr.msk.f32.vlgmr.msra.gmra.mrb[12].mxu1 %vm1501_vm2, %v1486_v16 }
 0x28f   :  { %v1575_v18 = vpop.f32.mrb[12].mxu1 }
 0x290   :  { %v1576_v19 = vadd.f32 %v1609_v17, %v1575_v18  ;;  %v2108_v20 = vpop.f32.mrb[13].mxu1 }
 0x292   :  { %v1580_v21 = vsel %vm1579_vm3, %v1576_v19, -inf }
 0x293   :  { %1581 = vmax.xlane.f32.xlu0 %v1580_v21 }
 0x320   :  { %v1582_v22 = vpop.xlane.xlu0 %1581 }
 0x321   :  { %v1583_v23 = vsub.f32 %v1576_v19, %v1582_v22 }
 0x323   :  { %v1584_v24 = vmul.f32 1.442695, %v1583_v23 }
 0x325   :  { %2537 = vpow2.f32 %v1584_v24 }
 0x32f   :  { %v2538_v25 = vpop.eup %2537 }
 0x330   :  { %v1586_v26 = vsel %vm1579_vm3, %v2538_v25, 0.0 }
 0x331   :  { %1587 = vadd.xlane.f32.xlu0 %v1586_v26 }
 0x3be   :  { %v1588_v27 = vpop.xlane.xlu0 %1587 }
 0x3bf   :  { %2539 = vlog2.f32 %v1588_v27 }
 0x3c9   :  { %v2540_v28 = vpop.eup %2539 }
 0x3ca   :  { %v1590_v29 = vmul.f32 0.6931472, %v2540_v28 }
 0x3cc   :  { %v1591_v30 = vsub.f32 %v1583_v23, %v1590_v29 }
 0x3ce   :  { %1592 = vst.msk [vmem:[#allocation2] sm:$0x3] %vm1579_vm3, %v1591_v30 }
 0x3cf   :  { %2552 = shalt.err (!%p2549_p4)
}
 0x3d0   :  { %s2553_s25 = scalar_lea.hbm %s3946_s5, 32 }
 0x3d1   :  { %p2554_p5 = scmp.ne.s32.totalorder %s3946_s5, %s2553_s25  ;;  %p2557_p6 = scmp.lt.u32.totalorder %s2553_s25, %s3946_s5 }
 0x3d3   :  { %p2559_p7 = pnand %p2557_p6, %p2554_p5 }
 0x3d5   :  { %2562 = shalt.err (!%p2559_p7)
}
 0x3d6   :  { %1602 = dma.vmem_to_hbm [thread:$0]  %s1600_s4, 32, %s3946_s5, [#allocation3]  }
 0x3d7   :  { %2563 = dma.done.wait [#allocation3], 32  }
 0x3d8   :  { %2564 = vsyncadd [#allocation3], 4294967264 }
 0x3d9   :  { %1606 = vsyncpa [#allocation3], 1 }

</bundles_post_ra>
